<compile_context>
chip_gen: v7x
topology: tpu7x:2x2x1
jax: 0.10.0
libtpu: 0.0.40
codegen_flags: <defaults>
</compile_context>

<pallas_src>
import functools

import jax
import jax.numpy as jnp
from jax import lax
from jax.experimental import pallas as pl
from jax.experimental.pallas import tpu as pltpu


# Contract the last (feature / lane) dim of both operands: einsum('nd,md->nm').
_DN = (((1,), (1,)), ((), ()))
# Finite "-inf": avoids inf-inf NaN patterns in the online-LSE merges.
_NEG = -1.0e30


def _total_infonce_kernel(f_tile_ref, g_tile_ref, f_keys_ref, g_keys_ref,
                          out_ref,
                          m_col_ref, s_col_ref,
                          m_fg_ref, s_fg_ref, m_ff_ref, s_ff_ref, acc_ref,
                          *, n_valid, tm, tk, n_col_tiles, padded,
                          inv_tau, inv_n, dot_precision):
    i = pl.program_id(0)                  # query-row tile (outer)
    j = pl.program_id(1)                  # key / column tile (inner reduction)
    ni = pl.num_programs(0)
    nj = pl.num_programs(1)
    # Static index in the resident-key fast path (single column tile).
    col_idx = 0 if n_col_tiles == 1 else j

    @pl.when(jnp.logical_and(i == 0, j == 0))
    def _init_global():
        m_col_ref[...] = jnp.full_like(m_col_ref, _NEG)
        s_col_ref[...] = jnp.zeros_like(s_col_ref)
        acc_ref[0] = jnp.float32(0.0)

    @pl.when(j == 0)
    def _init_row_state():
        m_fg_ref[...] = jnp.full_like(m_fg_ref, _NEG)
        s_fg_ref[...] = jnp.zeros_like(s_fg_ref)
        m_ff_ref[...] = jnp.full_like(m_ff_ref, _NEG)
        s_ff_ref[...] = jnp.zeros_like(s_ff_ref)

    ft = f_tile_ref[...]                               # (tm, D) query rows of f
    fk = f_keys_ref[...]                               # (tk, D) key tile of f
    gk = g_keys_ref[...]                               # (tk, D) key tile of g

    ft32 = ft.astype(jnp.float32)
    fts32 = ft32 * inv_tau                             # fold 1/tau once, O(tm*D)
    fts_mm = fts32.astype(ft.dtype)                    # MXU operand dtype == inputs

    # Scaled logits on the MXU (f32 accumulation); contract the lane dim of both
    # operands -> no transpose relayout.
    # TODO(synk): when D << 128, fuse the two dots against concatenated [g; f]
    # keys to amortize MXU fill/drain on v6e/v7x.
    logits_fg = lax.dot_general(fts_mm, gk, _DN, precision=dot_precision,
                                preferred_element_type=jnp.float32)   # (tm, tk)
    logits_ff = lax.dot_general(fts_mm, fk, _DN, precision=dot_precision,
                                preferred_element_type=jnp.float32)   # (tm, tk)

    if padded:
        row_ids = i * tm + lax.broadcasted_iota(jnp.int32, (tm, 1), 0)
        col_ids = j * tk + lax.broadcasted_iota(jnp.int32, (1, tk), 1)
        row_ok = row_ids < n_valid
        col_ok = col_ids < n_valid
        logits_fg = jnp.where(col_ok, logits_fg, _NEG)
        logits_ff = jnp.where(col_ok, logits_ff, _NEG)

    # ---- f -> g: online row-LSE (the ONLY full-tile exp over the fg logits). ----
    m_tile_fg = jnp.max(logits_fg, axis=1, keepdims=True)          # (tm, 1)
    m_new_fg = jnp.maximum(m_fg_ref[...], m_tile_fg)
    p_fg = jnp.exp(logits_fg - m_new_fg)                           # (tm, tk)
    s_fg_ref[...] = (s_fg_ref[...] * jnp.exp(m_fg_ref[...] - m_new_fg)
                     + jnp.sum(p_fg, axis=1, keepdims=True))
    m_fg_ref[...] = m_new_fg

    # ---- g -> f: column-LSE of the SAME tile (sim_gf == sim_fg^T).  Reuse p_fg
    # via a rank-1 rescale instead of a second (tm, tk) exp pass; the merge is
    # done in log form so the exp argument stays <= log(tm).
    if padded:
        ref_max = jnp.max(jnp.where(row_ok, m_new_fg, _NEG))       # scalar
        col_src = jnp.where(row_ok, logits_fg, _NEG)
        scaled = jnp.where(row_ok, p_fg * jnp.exp(m_new_fg - ref_max), 0.0)
    else:
        ref_max = jnp.max(m_new_fg)
        col_src = logits_fg
        scaled = p_fg * jnp.exp(m_new_fg - ref_max)                # = exp(logits-ref)
    tile_col_max = jnp.max(col_src, axis=0, keepdims=True)         # (1, tk)
    lse_col_tile = jnp.log(jnp.sum(scaled, axis=0, keepdims=True)) + ref_max
    m_col_old = m_col_ref[col_idx]
    s_col_old = s_col_ref[col_idx]
    m_col_new = jnp.maximum(m_col_old, tile_col_max)
    s_col_ref[col_idx] = (s_col_old * jnp.exp(m_col_old - m_col_new)
                          + jnp.exp(lse_col_tile - m_col_new))
    m_col_ref[col_idx] = m_col_new

    # ---- f -> f: online row-LSE. ----
    m_tile_ff = jnp.max(logits_ff, axis=1, keepdims=True)
    m_new_ff = jnp.maximum(m_ff_ref[...], m_tile_ff)
    s_ff_ref[...] = (s_ff_ref[...] * jnp.exp(m_ff_ref[...] - m_new_ff)
                     + jnp.sum(jnp.exp(logits_ff - m_new_ff), axis=1, keepdims=True))
    m_ff_ref[...] = m_new_ff

    # ---- per-row-tile finalize: row-direction LSEs and positive-pair logits. ----
    @pl.when(j == nj - 1)
    def _finish_row_tile():
        gt32 = g_tile_ref[...].astype(jnp.float32)
        diag_fg = jnp.sum(fts32 * gt32, axis=1, keepdims=True)     # f_i.g_i / tau
        diag_ff = jnp.sum(fts32 * ft32, axis=1, keepdims=True)     # f_i.f_i / tau
        lse_fg = jnp.log(s_fg_ref[...]) + m_fg_ref[...]
        lse_ff = jnp.log(s_ff_ref[...]) + m_ff_ref[...]
        per_row = lse_fg + lse_ff - (2.0 * diag_fg + diag_ff)
        if padded:
            per_row = jnp.where(row_ok, per_row, 0.0)
        acc_ref[0] = acc_ref[0] + jnp.sum(per_row)

    # ---- global finalize: add the g -> f column-LSE terms and emit the mean. ----
    @pl.when(jnp.logical_and(i == ni - 1, j == nj - 1))
    def _finish():
        m_all = m_col_ref[...]                                      # (ncol, 1, tk)
        s_all = s_col_ref[...]
        lse_col = jnp.log(s_all) + m_all
        if padded:
            cj = lax.broadcasted_iota(jnp.int32, m_all.shape, 0)
            ck = lax.broadcasted_iota(jnp.int32, m_all.shape, 2)
            lse_col = jnp.where(cj * tk + ck < n_valid, lse_col, 0.0)
        out_ref[0, 0] = (acc_ref[0] + jnp.sum(lse_col)) * inv_n


def _round_up(x, m):
    return ((x + m - 1) // m) * m


def _physical_vmem_bytes():
    # Per-TensorCore VMEM; fall back to the smallest current generation (v7x).
    try:
        return int(pltpu.get_tpu_info().vmem_capacity_bytes)
    except Exception:
        return 64 * 1024 * 1024


def _vmem_estimate_bytes(tm, tk, d, n_col_tiles, key_buffers, key_itemsize):
    keys = 2 * key_buffers * tk * d * key_itemsize            # f / g key blocks
    row_tiles = 2 * 2 * tm * d * key_itemsize                 # double-buffered query tiles
    col_state = 2 * n_col_tiles * 8 * _round_up(tk, 128) * 4  # carried column LSE
    row_state = 4 * max(tm, 8) * 128 * 4                      # (tm, 1) row LSE scratch
    temporaries = 8 * tm * _round_up(tk, 128) * 4             # logits/exp tiles + slack
    return keys + row_tiles + col_state + row_state + temporaries


def _key_block_spec(shape, index_map, buffers):
    # Resident keys (constant index_map) only need ONE buffer; column-tiled keys
    # keep a double buffer.  Fall back if this JAX lacks the pipeline_mode kwarg.
    try:
        return pl.BlockSpec(shape, index_map, pipeline_mode=pl.Buffered(buffers))
    except Exception:
        return pl.BlockSpec(shape, index_map)


def total_infonce_loss(f, g, tau, *, row_tile=None, col_tile=None,
                       precision=lax.Precision.DEFAULT):
    """Pallas implementation of TotalInfoNCELoss.forward(f, g)."""
    assert f.ndim == 2 and f.shape == g.shape, (f.shape, g.shape)
    n, d = f.shape
    phys_vmem = _physical_vmem_bytes()

    # bf16 MXU operands (single pass) unless a high-precision matmul is requested.
    if precision is None or precision == lax.Precision.DEFAULT:
        mm_dtype = jnp.bfloat16
    else:
        mm_dtype = f.dtype
    itemsize = jnp.dtype(mm_dtype).itemsize

    # Row (query) tile: 256 is MXU-friendly on v6e/v7x; pad N instead of shrinking.
    tm = min(256, _round_up(n, 8)) if row_tile is None else int(row_tile)
    assert tm % 8 == 0, tm
    n_pad = _round_up(n, tm)

    if col_tile is None:
        # Fast path: all keys resident (single-buffered) when they comfortably fit.
        if _vmem_estimate_bytes(tm, n_pad, d, 1, 1, itemsize) <= 0.45 * phys_vmem:
            tk = n_pad
        else:
            tk = max(tm, 256) if n_pad % max(tm, 256) == 0 else tm
    else:
        tk = int(col_tile)
    assert tk % 8 == 0 and n_pad % tk == 0, (n_pad, tk)
    assert n_pad - n < tk, "column tile must exceed the padding amount"
    n_row_tiles = n_pad // tm
    n_col_tiles = n_pad // tk
    key_buffers = 1 if n_col_tiles == 1 else 2

    # Pad with zero rows; the kernel masks padded query rows and key columns.
    if n_pad != n:
        f_p = jnp.pad(f, ((0, n_pad - n), (0, 0)))
        g_p = jnp.pad(g, ((0, n_pad - n), (0, 0)))
    else:
        f_p, g_p = f, g
    f_p = f_p.astype(mm_dtype)
    g_p = g_p.astype(mm_dtype)

    vmem_need = _vmem_estimate_bytes(tm, tk, d, n_col_tiles, key_buffers, itemsize)
    vmem_limit = int(min(max(2 * vmem_need, 32 * 1024 * 1024), 0.85 * phys_vmem))

    kernel = functools.partial(
        _total_infonce_kernel,
        n_valid=n, tm=tm, tk=tk, n_col_tiles=n_col_tiles, padded=(n_pad != n),
        inv_tau=float(1.0 / tau), inv_n=float(1.0 / n),
        dot_precision=precision,
    )

    out = pl.pallas_call(
        kernel,
        grid=(n_row_tiles, n_col_tiles),
        in_specs=[
            pl.BlockSpec((tm, d), lambda i, j: (i, 0)),                  # f query rows
            pl.BlockSpec((tm, d), lambda i, j: (i, 0)),                  # g positives
            _key_block_spec((tk, d), lambda i, j: (j, 0), key_buffers),  # f keys
            _key_block_spec((tk, d), lambda i, j: (j, 0), key_buffers),  # g keys
        ],
        out_specs=pl.BlockSpec(memory_space=pltpu.MemorySpace.SMEM),
        out_shape=jax.ShapeDtypeStruct((1, 1), jnp.float32),
        scratch_shapes=[
            pltpu.VMEM((n_col_tiles, 1, tk), jnp.float32),   # running column max
            pltpu.VMEM((n_col_tiles, 1, tk), jnp.float32),   # running column exp-sum
            pltpu.VMEM((tm, 1), jnp.float32),                # row max      (f -> g)
            pltpu.VMEM((tm, 1), jnp.float32),                # row exp-sum  (f -> g)
            pltpu.VMEM((tm, 1), jnp.float32),                # row max      (f -> f)
            pltpu.VMEM((tm, 1), jnp.float32),                # row exp-sum  (f -> f)
            pltpu.SMEM((1,), jnp.float32),                   # scalar loss partial
        ],
        compiler_params=pltpu.CompilerParams(
            # Column-LSE state + scalar accumulator carry across BOTH axes.
            # TODO(synk): v7x (2 TCs) - emit per-core partials (g->f as its own
            # row-LSE pass) so the row axis can be made parallel/core_parallel.
            dimension_semantics=("arbitrary", "arbitrary"),
            vmem_limit_bytes=vmem_limit,
        ),
    )(f_p, g_p, f_p, g_p)
    return out[0, 0]


def _reference_loss(f, g, tau):
    """Plain-JAX reference mirroring the PyTorch module exactly (naive exp form)."""
    def pair(a, b):
        sim = jnp.exp(jnp.dot(a, b.T, precision=lax.Precision.HIGHEST) / tau)
        pos = jnp.diag(sim)
        denom = sim.sum(axis=1)          # pos + neg
        return -jnp.mean(jnp.log(pos / denom))
    return pair(f, g) + pair(g, f) + pair(f, f)


if __name__ == "__main__":
    tau = 0.5

    def make_inputs(key, n, d):
        kf, kg = jax.random.split(key)
        f = jax.random.normal(kf, (n, d), dtype=jnp.float32)
        g = jax.random.normal(kg, (n, d), dtype=jnp.float32)
        # L2-normalize (standard for InfoNCE); keeps the naive reference finite.
        f = f / jnp.linalg.norm(f, axis=1, keepdims=True)
        g = g / jnp.linalg.norm(g, axis=1, keepdims=True)
        return f, g

    k1, k2 = jax.random.split(jax.random.PRNGKey(0))

    # Case 1: aligned N -> resident-key fast path (single column tile, keys
    # single-buffered).  Checked at HIGHEST (tight) and DEFAULT/bf16 MXU (loose).
    f1, g1 = make_inputs(k1, 128, 32)
    ref1 = jax.block_until_ready(_reference_loss(f1, g1, tau))
    hi1 = jax.block_until_ready(
        total_infonce_loss(f1, g1, tau, precision=lax.Precision.HIGHEST))
    fast1 = jax.block_until_ready(total_infonce_loss(f1, g1, tau))
    assert jnp.isfinite(ref1) and jnp.isfinite(hi1) and jnp.isfinite(fast1)
    assert jnp.allclose(hi1, ref1, rtol=2e-3, atol=2e-2), (hi1, ref1)
    assert jnp.allclose(fast1, ref1, rtol=2e-2, atol=1e-1), (fast1, ref1)

    # Case 2: ragged N=90 -> padded rows/columns, 3x3 grid of row/column tiles,
    # exercising the online row-LSE, the carried column-LSE and all masking.
    f2, g2 = make_inputs(k2, 90, 32)
    ref2 = jax.block_until_ready(_reference_loss(f2, g2, tau))
    tiled2 = jax.block_until_ready(
        total_infonce_loss(f2, g2, tau, row_tile=32, col_tile=32,
                           precision=lax.Precision.HIGHEST))
    assert jnp.isfinite(ref2) and jnp.isfinite(tiled2)
    assert jnp.allclose(tiled2, ref2, rtol=2e-3, atol=2e-2), (tiled2, ref2)

    print("KERNEL_OK")
</pallas_src>

<mosaic_0001>
module attributes {stable_mosaic.version = 11 : i64} {
  func.func @_total_infonce_kernel(%arg0: i32, %arg1: i32, %arg2: memref<128x32xf32, #tpu.memory_space<vmem>>, %arg3: memref<128x32xf32, #tpu.memory_space<vmem>>, %arg4: memref<128x32xf32, #tpu.memory_space<vmem>>, %arg5: memref<128x32xf32, #tpu.memory_space<vmem>>, %arg6: memref<1x1xf32, #tpu.memory_space<smem>>, %arg7: memref<1x1x128xf32, #tpu.memory_space<vmem>>, %arg8: memref<1x1x128xf32, #tpu.memory_space<vmem>>, %arg9: memref<128x1xf32, #tpu.memory_space<vmem>>, %arg10: memref<128x1xf32, #tpu.memory_space<vmem>>, %arg11: memref<128x1xf32, #tpu.memory_space<vmem>>, %arg12: memref<128x1xf32, #tpu.memory_space<vmem>>, %arg13: memref<1xf32, #tpu.memory_space<smem>>) attributes {dimension_semantics = [#tpu.dimension_semantics<arbitrary>, #tpu.dimension_semantics<arbitrary>], iteration_bounds = array<i64: 1, 1>, scalar_prefetch = 0 : i64, scratch_operands = 7 : i64, tpu.core_type = #tpu.core_type<tc>, window_params = [{transform_indices = @transform_0, window_bounds = array<i64: 128, 32>}, {transform_indices = @transform_1, window_bounds = array<i64: 128, 32>}, {pipeline_mode = #tpu.pipeline_mode<synchronous>, transform_indices = @transform_2, window_bounds = array<i64: 128, 32>}, {pipeline_mode = #tpu.pipeline_mode<synchronous>, transform_indices = @transform_3, window_bounds = array<i64: 128, 32>}, {transform_indices = @transform_4, window_bounds = array<i64: 1, 1>}]} {
    %c0_i32 = arith.constant 0 : i32
    %0 = arith.cmpi eq, %arg0, %c0_i32 : i32
    %c0_i32_0 = arith.constant 0 : i32
    %1 = arith.cmpi eq, %arg1, %c0_i32_0 : i32
    %2 = arith.andi %0, %1 : i1
    %3 = arith.extui %2 : i1 to i32
    %c0_i32_1 = arith.constant 0 : i32
    %4 = arith.cmpi ne, %3, %c0_i32_1 : i32
    scf.if %4 {
      %cst_55 = arith.constant -1.000000e+30 : f32
      %90 = vector.broadcast %cst_55 : f32 to vector<1x1x128xf32>
      %c0_56 = arith.constant 0 : index
      %c0_57 = arith.constant 0 : index
      %c0_58 = arith.constant 0 : index
      %91 = vector.load %arg7[%c0_56, %c0_57, %c0_58] : memref<1x1x128xf32, #tpu.memory_space<vmem>>, vector<1x1x128xf32>
      tpu.vector_store %arg7[%c0_56, %c0_57, %c0_58], %90 {strides = array<i32>} : memref<1x1x128xf32, #tpu.memory_space<vmem>>, vector<1x1x128xf32>,
      %cst_59 = arith.constant 0.000000e+00 : f32
      %92 = vector.broadcast %cst_59 : f32 to vector<1x1x128xf32>
      %c0_60 = arith.constant 0 : index
      %c0_61 = arith.constant 0 : index
      %c0_62 = arith.constant 0 : index
      %93 = vector.load %arg8[%c0_60, %c0_61, %c0_62] : memref<1x1x128xf32, #tpu.memory_space<vmem>>, vector<1x1x128xf32>
      tpu.vector_store %arg8[%c0_60, %c0_61, %c0_62], %92 {strides = array<i32>} : memref<1x1x128xf32, #tpu.memory_space<vmem>>, vector<1x1x128xf32>,
      %cst_63 = arith.constant 0.000000e+00 : f32
      %c0_64 = arith.constant 0 : index
      %94 = memref.load %arg13[%c0_64] : memref<1xf32, #tpu.memory_space<smem>>
      memref.store %cst_63, %arg13[%c0_64] : memref<1xf32, #tpu.memory_space<smem>>
    } else {
    }
    %c0_i32_2 = arith.constant 0 : i32
    %5 = arith.cmpi eq, %arg1, %c0_i32_2 : i32
    %6 = arith.extui %5 : i1 to i32
    %c0_i32_3 = arith.constant 0 : i32
    %7 = arith.cmpi ne, %6, %c0_i32_3 : i32
    scf.if %7 {
      %cst_55 = arith.constant -1.000000e+30 : f32
      %90 = vector.broadcast %cst_55 : f32 to vector<128x1xf32>
      %c0_56 = arith.constant 0 : index
      %c0_57 = arith.constant 0 : index
      %91 = vector.load %arg9[%c0_56, %c0_57] : memref<128x1xf32, #tpu.memory_space<vmem>>, vector<128x1xf32>
      tpu.vector_store %arg9[%c0_56, %c0_57], %90 {strides = array<i32>} : memref<128x1xf32, #tpu.memory_space<vmem>>, vector<128x1xf32>,
      %cst_58 = arith.constant 0.000000e+00 : f32
      %92 = vector.broadcast %cst_58 : f32 to vector<128x1xf32>
      %c0_59 = arith.constant 0 : index
      %c0_60 = arith.constant 0 : index
      %93 = vector.load %arg10[%c0_59, %c0_60] : memref<128x1xf32, #tpu.memory_space<vmem>>, vector<128x1xf32>
      tpu.vector_store %arg10[%c0_59, %c0_60], %92 {strides = array<i32>} : memref<128x1xf32, #tpu.memory_space<vmem>>, vector<128x1xf32>,
      %cst_61 = arith.constant -1.000000e+30 : f32
      %94 = vector.broadcast %cst_61 : f32 to vector<128x1xf32>
      %c0_62 = arith.constant 0 : index
      %c0_63 = arith.constant 0 : index
      %95 = vector.load %arg11[%c0_62, %c0_63] : memref<128x1xf32, #tpu.memory_space<vmem>>, vector<128x1xf32>
      tpu.vector_store %arg11[%c0_62, %c0_63], %94 {strides = array<i32>} : memref<128x1xf32, #tpu.memory_space<vmem>>, vector<128x1xf32>,
      %cst_64 = arith.constant 0.000000e+00 : f32
      %96 = vector.broadcast %cst_64 : f32 to vector<128x1xf32>
      %c0_65 = arith.constant 0 : index
      %c0_66 = arith.constant 0 : index
      %97 = vector.load %arg12[%c0_65, %c0_66] : memref<128x1xf32, #tpu.memory_space<vmem>>, vector<128x1xf32>
      tpu.vector_store %arg12[%c0_65, %c0_66], %96 {strides = array<i32>} : memref<128x1xf32, #tpu.memory_space<vmem>>, vector<128x1xf32>,
    } else {
    }
    %c0 = arith.constant 0 : index
    %c0_4 = arith.constant 0 : index
    %8 = vector.load %arg2[%c0, %c0_4] : memref<128x32xf32, #tpu.memory_space<vmem>>, vector<128x32xf32>
    %c0_5 = arith.constant 0 : index
    %c0_6 = arith.constant 0 : index
    %9 = vector.load %arg4[%c0_5, %c0_6] : memref<128x32xf32, #tpu.memory_space<vmem>>, vector<128x32xf32>
    %c0_7 = arith.constant 0 : index
    %c0_8 = arith.constant 0 : index
    %10 = vector.load %arg5[%c0_7, %c0_8] : memref<128x32xf32, #tpu.memory_space<vmem>>, vector<128x32xf32>
    %cst = arith.constant 2.000000e+00 : f32
    %11 = vector.broadcast %cst : f32 to vector<128x32xf32>
    %12 = arith.mulf %8, %11 : vector<128x32xf32>
    %cst_9 = arith.constant dense<0.000000e+00> : vector<128x128xf32>
    %13 = tpu.matmul %12, %10, %cst_9 {dimension_numbers = #tpu.dot_dimension_numbers<[1], [1], [0], [0], [0, 0, 1, 0], [], []>, precision = #tpu.contract_precision<fp32>} : vector<128x32xf32>, vector<128x32xf32>, vector<128x128xf32> -> vector<128x128xf32>
    %cst_10 = arith.constant dense<0.000000e+00> : vector<128x128xf32>
    %14 = tpu.matmul %12, %9, %cst_10 {dimension_numbers = #tpu.dot_dimension_numbers<[1], [1], [0], [0], [0, 0, 1, 0], [], []>, precision = #tpu.contract_precision<fp32>} : vector<128x32xf32>, vector<128x32xf32>, vector<128x128xf32> -> vector<128x128xf32>
    %cst_11 = arith.constant dense<0xFF800000> : vector<128xf32>
    %15 = vector.multi_reduction <maximumf>, %13, %cst_11 [1] : vector<128x128xf32> to vector<128xf32>
    %16 = vector.shape_cast %15 : vector<128xf32> to vector<128x1xf32>
    %c0_12 = arith.constant 0 : index
    %c0_13 = arith.constant 0 : index
    %17 = vector.load %arg9[%c0_12, %c0_13] : memref<128x1xf32, #tpu.memory_space<vmem>>, vector<128x1xf32>
    %18 = arith.maximumf %17, %16 : vector<128x1xf32>
    %19 = vector.broadcast %18 : vector<128x1xf32> to vector<128x128xf32>
    %20 = arith.subf %13, %19 : vector<128x128xf32>
    %21 = math.exp %20 : vector<128x128xf32>
    %c0_14 = arith.constant 0 : index
    %c0_15 = arith.constant 0 : index
    %22 = vector.load %arg10[%c0_14, %c0_15] : memref<128x1xf32, #tpu.memory_space<vmem>>, vector<128x1xf32>
    %c0_16 = arith.constant 0 : index
    %c0_17 = arith.constant 0 : index
    %23 = vector.load %arg9[%c0_16, %c0_17] : memref<128x1xf32, #tpu.memory_space<vmem>>, vector<128x1xf32>
    %24 = arith.subf %23, %18 : vector<128x1xf32>
    %25 = math.exp %24 : vector<128x1xf32>
    %26 = arith.mulf %22, %25 : vector<128x1xf32>
    %cst_18 = arith.constant dense<0.000000e+00> : vector<128xf32>
    %27 = vector.multi_reduction <add>, %21, %cst_18 [1] : vector<128x128xf32> to vector<128xf32>
    %28 = vector.shape_cast %27 : vector<128xf32> to vector<128x1xf32>
    %29 = arith.addf %26, %28 : vector<128x1xf32>
    %c0_19 = arith.constant 0 : index
    %c0_20 = arith.constant 0 : index
    %30 = vector.load %arg10[%c0_19, %c0_20] : memref<128x1xf32, #tpu.memory_space<vmem>>, vector<128x1xf32>
    tpu.vector_store %arg10[%c0_19, %c0_20], %29 {strides = array<i32>} : memref<128x1xf32, #tpu.memory_space<vmem>>, vector<128x1xf32>,
    %c0_21 = arith.constant 0 : index
    %c0_22 = arith.constant 0 : index
    %31 = vector.load %arg9[%c0_21, %c0_22] : memref<128x1xf32, #tpu.memory_space<vmem>>, vector<128x1xf32>
    tpu.vector_store %arg9[%c0_21, %c0_22], %18 {strides = array<i32>} : memref<128x1xf32, #tpu.memory_space<vmem>>, vector<128x1xf32>,
    %32 = vector.shape_cast %18 : vector<128x1xf32> to vector<1x128x1xf32>
    %cst_23 = arith.constant dense<0xFF800000> : vector<1xf32>
    %33 = vector.multi_reduction <maximumf>, %32, %cst_23 [1, 2] : vector<1x128x1xf32> to vector<1xf32>
    %34 = vector.shape_cast %33 : vector<1xf32> to vector<1x1x1xf32>
    %35 = vector.extract %34[0, 0, 0] : f32 from vector<1x1x1xf32>
    %36 = vector.broadcast %35 : f32 to vector<128x1xf32>
    %37 = arith.subf %18, %36 : vector<128x1xf32>
    %38 = math.exp %37 : vector<128x1xf32>
    %39 = vector.broadcast %38 : vector<128x1xf32> to vector<128x128xf32>
    %40 = arith.mulf %21, %39 : vector<128x128xf32>
    %cst_24 = arith.constant dense<0xFF800000> : vector<128xf32>
    %41 = vector.multi_reduction <maximumf>, %13, %cst_24 [0] : vector<128x128xf32> to vector<128xf32>
    %42 = vector.shape_cast %41 : vector<128xf32> to vector<1x128xf32>
    %cst_25 = arith.constant dense<0.000000e+00> : vector<128xf32>
    %43 = vector.multi_reduction <add>, %40, %cst_25 [0] : vector<128x128xf32> to vector<128xf32>
    %44 = vector.shape_cast %43 : vector<128xf32> to vector<1x128xf32>
    %45 = math.log %44 : vector<1x128xf32>
    %46 = vector.broadcast %35 : f32 to vector<1x128xf32>
    %47 = arith.addf %45, %46 : vector<1x128xf32>
    %c0_26 = arith.constant 0 : index
    %c0_27 = arith.constant 0 : index
    %c0_28 = arith.constant 0 : index
    %48 = vector.load %arg7[%c0_26, %c0_27, %c0_28] : memref<1x1x128xf32, #tpu.memory_space<vmem>>, vector<1x1x128xf32>
    %49 = vector.shape_cast %48 : vector<1x1x128xf32> to vector<1x128xf32>
    %c0_29 = arith.constant 0 : index
    %c0_30 = arith.constant 0 : index
    %c0_31 = arith.constant 0 : index
    %50 = vector.load %arg8[%c0_29, %c0_30, %c0_31] : memref<1x1x128xf32, #tpu.memory_space<vmem>>, vector<1x1x128xf32>
    %51 = vector.shape_cast %50 : vector<1x1x128xf32> to vector<1x128xf32>
    %52 = arith.maximumf %49, %42 : vector<1x128xf32>
    %53 = arith.subf %49, %52 : vector<1x128xf32>
    %54 = math.exp %53 : vector<1x128xf32>
    %55 = arith.mulf %51, %54 : vector<1x128xf32>
    %56 = arith.subf %47, %52 : vector<1x128xf32>
    %57 = math.exp %56 : vector<1x128xf32>
    %58 = arith.addf %55, %57 : vector<1x128xf32>
    %c0_32 = arith.constant 0 : index
    %c0_33 = arith.constant 0 : index
    %c0_34 = arith.constant 0 : index
    %59 = vector.load %arg8[%c0_32, %c0_33, %c0_34] : memref<1x1x128xf32, #tpu.memory_space<vmem>>, vector<1x1x128xf32>
    %60 = vector.shape_cast %59 : vector<1x1x128xf32> to vector<1x128xf32>
    %61 = vector.shape_cast %58 : vector<1x128xf32> to vector<1x1x128xf32>
    tpu.vector_store %arg8[%c0_32, %c0_33, %c0_34], %61 {strides = array<i32>} : memref<1x1x128xf32, #tpu.memory_space<vmem>>, vector<1x1x128xf32>,
    %c0_35 = arith.constant 0 : index
    %c0_36 = arith.constant 0 : index
    %c0_37 = arith.constant 0 : index
    %62 = vector.load %arg7[%c0_35, %c0_36, %c0_37] : memref<1x1x128xf32, #tpu.memory_space<vmem>>, vector<1x1x128xf32>
    %63 = vector.shape_cast %62 : vector<1x1x128xf32> to vector<1x128xf32>
    %64 = vector.shape_cast %52 : vector<1x128xf32> to vector<1x1x128xf32>
    tpu.vector_store %arg7[%c0_35, %c0_36, %c0_37], %64 {strides = array<i32>} : memref<1x1x128xf32, #tpu.memory_space<vmem>>, vector<1x1x128xf32>,
    %cst_38 = arith.constant dense<0xFF800000> : vector<128xf32>
    %65 = vector.multi_reduction <maximumf>, %14, %cst_38 [1] : vector<128x128xf32> to vector<128xf32>
    %66 = vector.shape_cast %65 : vector<128xf32> to vector<128x1xf32>
    %c0_39 = arith.constant 0 : index
    %c0_40 = arith.constant 0 : index
    %67 = vector.load %arg11[%c0_39, %c0_40] : memref<128x1xf32, #tpu.memory_space<vmem>>, vector<128x1xf32>
    %68 = arith.maximumf %67, %66 : vector<128x1xf32>
    %c0_41 = arith.constant 0 : index
    %c0_42 = arith.constant 0 : index
    %69 = vector.load %arg12[%c0_41, %c0_42] : memref<128x1xf32, #tpu.memory_space<vmem>>, vector<128x1xf32>
    %c0_43 = arith.constant 0 : index
    %c0_44 = arith.constant 0 : index
    %70 = vector.load %arg11[%c0_43, %c0_44] : memref<128x1xf32, #tpu.memory_space<vmem>>, vector<128x1xf32>
    %71 = arith.subf %70, %68 : vector<128x1xf32>
    %72 = math.exp %71 : vector<128x1xf32>
    %73 = arith.mulf %69, %72 : vector<128x1xf32>
    %74 = vector.broadcast %68 : vector<128x1xf32> to vector<128x128xf32>
    %75 = arith.subf %14, %74 : vector<128x128xf32>
    %76 = math.exp %75 : vector<128x128xf32>
    %cst_45 = arith.constant dense<0.000000e+00> : vector<128xf32>
    %77 = vector.multi_reduction <add>, %76, %cst_45 [1] : vector<128x128xf32> to vector<128xf32>
    %78 = vector.shape_cast %77 : vector<128xf32> to vector<128x1xf32>
    %79 = arith.addf %73, %78 : vector<128x1xf32>
    %c0_46 = arith.constant 0 : index
    %c0_47 = arith.constant 0 : index
    %80 = vector.load %arg12[%c0_46, %c0_47] : memref<128x1xf32, #tpu.memory_space<vmem>>, vector<128x1xf32>
    tpu.vector_store %arg12[%c0_46, %c0_47], %79 {strides = array<i32>} : memref<128x1xf32, #tpu.memory_space<vmem>>, vector<128x1xf32>,
    %c0_48 = arith.constant 0 : index
    %c0_49 = arith.constant 0 : index
    %81 = vector.load %arg11[%c0_48, %c0_49] : memref<128x1xf32, #tpu.memory_space<vmem>>, vector<128x1xf32>
    tpu.vector_store %arg11[%c0_48, %c0_49], %68 {strides = array<i32>} : memref<128x1xf32, #tpu.memory_space<vmem>>, vector<128x1xf32>,
    %c0_i32_50 = arith.constant 0 : i32
    %82 = arith.cmpi eq, %arg1, %c0_i32_50 : i32
    %83 = arith.extui %82 : i1 to i32
    %c0_i32_51 = arith.constant 0 : i32
    %84 = arith.cmpi ne, %83, %c0_i32_51 : i32
    scf.if %84 {
      %c0_55 = arith.constant 0 : index
      %c0_56 = arith.constant 0 : index
      %90 = vector.load %arg3[%c0_55, %c0_56] : memref<128x32xf32, #tpu.memory_space<vmem>>, vector<128x32xf32>
      %91 = arith.mulf %12, %90 : vector<128x32xf32>
      %cst_57 = arith.constant dense<0.000000e+00> : vector<128xf32>
      %92 = vector.multi_reduction <add>, %91, %cst_57 [1] : vector<128x32xf32> to vector<128xf32>
      %93 = vector.shape_cast %92 : vector<128xf32> to vector<128x1xf32>
      %94 = arith.mulf %12, %8 : vector<128x32xf32>
      %cst_58 = arith.constant dense<0.000000e+00> : vector<128xf32>
      %95 = vector.multi_reduction <add>, %94, %cst_58 [1] : vector<128x32xf32> to vector<128xf32>
      %96 = vector.shape_cast %95 : vector<128xf32> to vector<128x1xf32>
      %c0_59 = arith.constant 0 : index
      %c0_60 = arith.constant 0 : index
      %97 = vector.load %arg10[%c0_59, %c0_60] : memref<128x1xf32, #tpu.memory_space<vmem>>, vector<128x1xf32>
      %98 = math.log %97 : vector<128x1xf32>
      %c0_61 = arith.constant 0 : index
      %c0_62 = arith.constant 0 : index
      %99 = vector.load %arg9[%c0_61, %c0_62] : memref<128x1xf32, #tpu.memory_space<vmem>>, vector<128x1xf32>
      %100 = arith.addf %98, %99 : vector<128x1xf32>
      %c0_63 = arith.constant 0 : index
      %c0_64 = arith.constant 0 : index
      %101 = vector.load %arg12[%c0_63, %c0_64] : memref<128x1xf32, #tpu.memory_space<vmem>>, vector<128x1xf32>
      %102 = math.log %101 : vector<128x1xf32>
      %c0_65 = arith.constant 0 : index
      %c0_66 = arith.constant 0 : index
      %103 = vector.load %arg11[%c0_65, %c0_66] : memref<128x1xf32, #tpu.memory_space<vmem>>, vector<128x1xf32>
      %104 = arith.addf %102, %103 : vector<128x1xf32>
      %105 = arith.addf %100, %104 : vector<128x1xf32>
      %cst_67 = arith.constant 2.000000e+00 : f32
      %106 = vector.broadcast %cst_67 : f32 to vector<128x1xf32>
      %107 = arith.mulf %106, %93 : vector<128x1xf32>
      %108 = arith.addf %107, %96 : vector<128x1xf32>
      %109 = arith.subf %105, %108 : vector<128x1xf32>
      %c0_68 = arith.constant 0 : index
      %110 = memref.load %arg13[%c0_68] : memref<1xf32, #tpu.memory_space<smem>>
      %111 = vector.shape_cast %109 : vector<128x1xf32> to vector<1x128x1xf32>
      %cst_69 = arith.constant dense<0.000000e+00> : vector<1xf32>
      %112 = vector.multi_reduction <add>, %111, %cst_69 [1, 2] : vector<1x128x1xf32> to vector<1xf32>
      %113 = vector.shape_cast %112 : vector<1xf32> to vector<1x1x1xf32>
      %114 = vector.extract %113[0, 0, 0] : f32 from vector<1x1x1xf32>
      %115 = arith.addf %110, %114 : f32
      %c0_70 = arith.constant 0 : index
      %116 = memref.load %arg13[%c0_70] : memref<1xf32, #tpu.memory_space<smem>>
      memref.store %115, %arg13[%c0_70] : memref<1xf32, #tpu.memory_space<smem>>
    } else {
    }
    %c0_i32_52 = arith.constant 0 : i32
    %85 = arith.cmpi eq, %arg0, %c0_i32_52 : i32
    %c0_i32_53 = arith.constant 0 : i32
    %86 = arith.cmpi eq, %arg1, %c0_i32_53 : i32
    %87 = arith.andi %85, %86 : i1
    %88 = arith.extui %87 : i1 to i32
    %c0_i32_54 = arith.constant 0 : i32
    %89 = arith.cmpi ne, %88, %c0_i32_54 : i32
    scf.if %89 {
      %c0_55 = arith.constant 0 : index
      %c0_56 = arith.constant 0 : index
      %c0_57 = arith.constant 0 : index
      %90 = vector.load %arg7[%c0_55, %c0_56, %c0_57] : memref<1x1x128xf32, #tpu.memory_space<vmem>>, vector<1x1x128xf32>
      %c0_58 = arith.constant 0 : index
      %c0_59 = arith.constant 0 : index
      %c0_60 = arith.constant 0 : index
      %91 = vector.load %arg8[%c0_58, %c0_59, %c0_60] : memref<1x1x128xf32, #tpu.memory_space<vmem>>, vector<1x1x128xf32>
      %92 = math.log %91 : vector<1x1x128xf32>
      %93 = arith.addf %92, %90 : vector<1x1x128xf32>
      %c0_61 = arith.constant 0 : index
      %94 = memref.load %arg13[%c0_61] : memref<1xf32, #tpu.memory_space<smem>>
      %95 = vector.shape_cast %93 : vector<1x1x128xf32> to vector<1x1x1x128xf32>
      %cst_62 = arith.constant dense<0.000000e+00> : vector<1xf32>
      %96 = vector.multi_reduction <add>, %95, %cst_62 [1, 2, 3] : vector<1x1x1x128xf32> to vector<1xf32>
      %97 = vector.shape_cast %96 : vector<1xf32> to vector<1x1x1x1xf32>
      %98 = vector.extract %97[0, 0, 0, 0] : f32 from vector<1x1x1x1xf32>
      %99 = arith.addf %94, %98 : f32
      %cst_63 = arith.constant 7.812500e-03 : f32
      %100 = arith.mulf %99, %cst_63 : f32
      %c0_64 = arith.constant 0 : index
      %c0_65 = arith.constant 0 : index
      %101 = memref.load %arg6[%c0_64, %c0_65] : memref<1x1xf32, #tpu.memory_space<smem>>
      memref.store %100, %arg6[%c0_64, %c0_65] : memref<1x1xf32, #tpu.memory_space<smem>>
    } else {
    }
    return
  }
  func.func @transform_0(%arg0: i32, %arg1: i32) -> (i32, i32) {
    %c0_i32 = arith.constant 0 : i32
    %c0_i32_0 = arith.constant 0 : i32
    return %arg0, %c0_i32 : i32, i32
  }
  func.func @transform_1(%arg0: i32, %arg1: i32) -> (i32, i32) {
    %c0_i32 = arith.constant 0 : i32
    %c0_i32_0 = arith.constant 0 : i32
    return %arg0, %c0_i32 : i32, i32
  }
  func.func @transform_2(%arg0: i32, %arg1: i32) -> (i32, i32) {
    %c0_i32 = arith.constant 0 : i32
    %c0_i32_0 = arith.constant 0 : i32
    return %arg1, %c0_i32 : i32, i32
  }
  func.func @transform_3(%arg0: i32, %arg1: i32) -> (i32, i32) {
    %c0_i32 = arith.constant 0 : i32
    %c0_i32_0 = arith.constant 0 : i32
    return %arg1, %c0_i32 : i32, i32
  }
  func.func @transform_4(%arg0: i32, %arg1: i32) -> (i32, i32) {
    %c0_i32 = arith.constant 0 : i32
    %c0_i32_0 = arith.constant 0 : i32
    %c0_i32_1 = arith.constant 0 : i32
    return %c0_i32, %c0_i32_0 : i32, i32
  }
}

</mosaic_0001>

<bundles_post_ra>
// kernel: tpu_custom_call.1
= control target key start
LH: loop header
LB: loop body
LE: loop exit
PB: predicated region body
PF: predicated region fallthrough
CT: control target
= control target key end

     0   :  { %vm160_vm0 = vcmask 261120   ;;  %s8626_s0 = inlined_call_operand.vmem [shape: f32[128,32], index: 0, kind: input, shape index: {}]   ;;  %s8627_s1 = inlined_call_operand.vmem [shape: f32[128,32], index: 1, kind: input, shape index: {}]   ;;  %s8628_s2 = inlined_call_operand.vmem [shape: f32[128,32], index: 2, kind: input, shape index: {}]   ;;  %s8629_s3 = inlined_call_operand.vmem [shape: f32[128,32], index: 3, kind: input, shape index: {}]   ;;  %s8630_s4 = inlined_call_operand.hbm [shape: f32[1,1], index: 4, kind: output, shape index: {}]  }
   0x1   :  { %v128_v0 = vld [vmem:[%s8629_s3] sm:$0xff]  ;;  %v129_v1 = vld [vmem:[%s8629_s3 + $0x8] sm:$0xff]  ;;  %v130_v7 = vld [vmem:[%s8629_s3 + $0x10] sm:$0xff] }
   0x2   :  { %v112_v2 = vld [vmem:[%s8628_s2] sm:$0xff]  ;;  %v6187_v3 = vsel %vm160_vm0, %v128_v0, 0  ;;  %v6190_v4 = vsel %vm160_vm0, %v129_v1, 0  ;;  %v113_v5 = vld [vmem:[%s8628_s2 + $0x8] sm:$0xff]  ;;  %v131_v8 = vld [vmem:[%s8629_s3 + $0x18] sm:$0xff]  ;;  %v6218_v16 = vsel %vm160_vm0, %v130_v7, 0 }
   0x3   :  { %v6196_v6 = vsel %vm160_vm0, %v112_v2, 0  ;;  %v258_v9 = vand.u32 4294901760, %v6187_v3  ;;  %v261_v10 = vand.u32 4294901760, %v6190_v4  ;;  %v6207_v11 = vsel %vm160_vm0, %v113_v5, 0  ;;  %v114_v13 = vld [vmem:[%s8628_s2 + $0x10] sm:$0xff]  ;;  %v115_v14 = vld [vmem:[%s8628_s2 + $0x18] sm:$0xff] }
   0x4   :  { %v1592_v12 = vand.u32 4294901760, %v6196_v6  ;;  %v1595_v15 = vand.u32 4294901760, %v6207_v11  ;;  %v6221_v17 = vsel %vm160_vm0, %v131_v8, 0  ;;  %v6224_v18 = vsel %vm160_vm0, %v114_v13, 0  ;;  %v132_v19 = vld [vmem:[%s8629_s3 + $0x20] sm:$0xff]  ;;  %v133_v20 = vld [vmem:[%s8629_s3 + $0x28] sm:$0xff] }
   0x5   :  { %v6236_v21 = vpack.c.bf16 %v261_v10, %v258_v9  ;;  %v264_v22 = vand.u32 4294901760, %v6218_v16  ;;  %v267_v23 = vand.u32 4294901760, %v6221_v17  ;;  %v6241_v24 = vsel %vm160_vm0, %v115_v14, 0  ;;  %v116_v25 = vld [vmem:[%s8628_s2 + $0x20] sm:$0xff]  ;;  %v117_v26 = vld [vmem:[%s8628_s2 + $0x28] sm:$0xff]  ;;  %v134_v40 = vld [vmem:[%s8629_s3 + $0x30] sm:$0xff] }
   0x6   :  { %v6253_v27 = vpack.c.bf16 %v1595_v15, %v1592_v12  ;;  %v1598_v28 = vand.u32 4294901760, %v6224_v18  ;;  %v1601_v29 = vand.u32 4294901760, %v6241_v24  ;;  %v6258_v30 = vsel %vm160_vm0, %v132_v19, 0  ;;  %v135_v41 = vld [vmem:[%s8629_s3 + $0x38] sm:$0xff]  ;;  %v118_v42 = vld [vmem:[%s8628_s2 + $0x30] sm:$0xff]  ;;  %v136_v52 = vld [vmem:[%s8629_s3 + $0x40] sm:$0xff] }
   0x7   :  { %8883 = vst [vmem:[#allocation12_spill] sm:$0xff] %v6236_v21  ;;  %5333 = vmatprep.subr.bf16.mxu0 %v6236_v21  ;;  %v6265_v31 = vpack.c.bf16 %v267_v23, %v264_v22  ;;  %v6268_v32 = vsel %vm160_vm0, %v133_v20, 0  ;;  %v6271_v33 = vsel %vm160_vm0, %v116_v25, 0  ;;  %v6282_v35 = vsel %vm160_vm0, %v117_v26, 0  ;;  %v119_v43 = vld [vmem:[%s8628_s2 + $0x38] sm:$0xff]  ;;  %v137_v55 = vld [vmem:[%s8629_s3 + $0x48] sm:$0xff] }
   0x8   :  { %8884 = vst [vmem:[#allocation13_spill] sm:$0xff] %v6253_v27  ;;  %5525 = vmatprep.subr.bf16.mxu1 %v6253_v27  ;;  %5335 = vmatpush3.bf16.xpose.msra.mxu0 %v6236_v21  ;;  %v6279_v34 = vpack.c.bf16 %v1601_v29, %v1598_v28  ;;  %v8646_v36 = vand.u32 4294901760, %v6258_v30  ;;  %v8643_v37 = vand.u32 4294901760, %v6268_v32  ;;  %v8642_v38 = vand.u32 4294901760, %v6271_v33  ;;  %v96_v56 = vld [vmem:[%s8626_s0] sm:$0xff] }
   0x9   :  { %8885 = vst [vmem:[#allocation14_spill] sm:$0xff] %v6265_v31  ;;  %5527 = vmatpush3.bf16.xpose.msra.mxu1 %v6253_v27  ;;  %5337 = vmatprep.subr.bf16.mxu0 %v6265_v31  ;;  %v8641_v39 = vand.u32 4294901760, %v6282_v35  ;;  %v6316_v46 = vsel %vm160_vm0, %v134_v40, 0  ;;  %v6319_v47 = vsel %vm160_vm0, %v135_v41, 0  ;;  %v6322_v48 = vsel %vm160_vm0, %v118_v42, 0 }
   0xa   :  { %8886 = vst [vmem:[#allocation15_spill] sm:$0xff] %v6279_v34  ;;  %5529 = vmatprep.subr.bf16.mxu1 %v6279_v34  ;;  %v6307_v44 = vpack.c.bf16 %v8643_v37, %v8646_v36  ;;  %v6325_v49 = vsel %vm160_vm0, %v119_v43, 0  ;;  %v8638_v50 = vand.u32 4294901760, %v6316_v46  ;;  %v8635_v51 = vand.u32 4294901760, %v6319_v47 }
   0xb   :  { %v6313_v45 = vpack.c.bf16 %v8641_v39, %v8642_v38  ;;  %v8632_v53 = vand.u32 4294901760, %v6322_v48  ;;  %v8631_v54 = vand.u32 4294901760, %v6325_v49 }
   0xc   :  { %8887 = vst [vmem:[#allocation16_spill] sm:$0xff] %v6307_v44 }
   0xd   :  { %8888 = vst [vmem:[#allocation17_spill] sm:$0xff] %v6313_v45 }
  0x10   :  { %5339 = vmatpush3.bf16.xpose.msra.mxu0 %v6265_v31 }
  0x11   :  { %5531 = vmatpush3.bf16.xpose.msra.mxu1 %v6279_v34  ;;  %5341 = vmatprep.subr.bf16.mxu0 %v6307_v44 }
  0x12   :  { %5533 = vmatprep.subr.bf16.mxu1 %v6313_v45 }
  0x13   :  { %9 = vsyncpa [#allocation10], 0  ;;  %v120_v57 = vld [vmem:[%s8628_s2 + $0x40] sm:$0xff]  ;;  %v121_v58 = vld [vmem:[%s8628_s2 + $0x48] sm:$0xff]  ;;  %v6351_v59 = vsel %vm160_vm0, %v136_v52, 0  ;;  %v6357_v60 = vpack.c.bf16 %v8635_v51, %v8638_v50  ;;  %v6360_v61 = vsel %vm160_vm0, %v137_v55, 0  ;;  %v6374_v1 = vpack.c.bf16 %v8631_v54, %v8632_v53 }
  0x14   :  { %v138_v62 = vld [vmem:[%s8629_s3 + $0x50] sm:$0xff]  ;;  %v139_v63 = vld [vmem:[%s8629_s3 + $0x58] sm:$0xff]  ;;  %v6368_v0 = vmul.f32 2.0, %v96_v56  ;;  %v6377_v2 = vsel %vm160_vm0, %v120_v57, 0  ;;  %v6380_v5 = vsel %vm160_vm0, %v121_v58, 0  ;;  %v8634_v7 = vand.u32 4294901760, %v6351_v59 }
  0x15   :  { %8889 = vst [vmem:[#allocation18_spill] sm:$0xff] %v6357_v60  ;;  %8891 = vst [vmem:[#allocation20_spill] sm:$0xff] %v6374_v1  ;;  %v122_v8 = vld [vmem:[%s8628_s2 + $0x50] sm:$0xff]  ;;  %v123_v13 = vld [vmem:[%s8628_s2 + $0x58] sm:$0xff]  ;;  %v8633_v19 = vand.u32 4294901760, %v6360_v61  ;;  %v6394_v20 = vsel %vm160_vm0, %v138_v62, 0  ;;  %v6515_v39 = vsub.f32 %v6221_v17, %v267_v23  ;;  %v6546_v17 = vsub.f32 %v6224_v18, %v1598_v28 }
  0x16   :  { %8890 = vst [vmem:[#allocation19_spill] sm:$0xff] %v6368_v0  ;;  %v162_v14 = vsel %vm160_vm0, %v6368_v0, 0  ;;  %v6397_v25 = vsel %vm160_vm0, %v139_v63, 0  ;;  %v97_v40 = vld [vmem:[%s8626_s0 + $0x8] sm:$0xff]  ;;  %v8637_v41 = vand.u32 4294901760, %v6377_v2  ;;  %v8636_v42 = vand.u32 4294901760, %v6380_v5 }
  0x17   :  { %v6399_v26 = vand.u32 4294901760, %v162_v14  ;;  %v6410_v43 = vsel %vm160_vm0, %v122_v8, 0  ;;  %v6413_v52 = vsel %vm160_vm0, %v123_v13, 0  ;;  %v140_v55 = vld [vmem:[%s8629_s3 + $0x60] sm:$0xff]  ;;  %v8640_v57 = vand.u32 4294901760, %v6394_v20  ;;  %v141_v62 = vld [vmem:[%s8629_s3 + $0x68] sm:$0xff] }
  0x18   :  { %5343 = vmatpush3.bf16.xpose.msra.mxu0 %v6307_v44  ;;  %v8639_v58 = vand.u32 4294901760, %v6397_v25  ;;  %v6426_v63 = vmul.f32 2.0, %v97_v40  ;;  %v6432_v8 = vpack.c.bf16 %v8633_v19, %v8634_v7  ;;  %v8645_v54 = vand.u32 4294901760, %v6410_v43  ;;  %v124_v19 = vld [vmem:[%s8628_s2 + $0x60] sm:$0xff]  ;;  %v125_v7 = vld [vmem:[%s8628_s2 + $0x68] sm:$0xff]  ;;  %8904 = vst [vmem:[#allocation33_spill] sm:$0xff] %v6515_v39 }
  0x19   :  { %8892 = vst [vmem:[#allocation21_spill] sm:$0xff] %v6399_v26  ;;  %5535 = vmatpush3.bf16.xpose.msra.mxu1 %v6313_v45  ;;  %5345 = vmatprep.subr.bf16.mxu0 %v6357_v60  ;;  %v6419_v56 = vsub.f32 %v162_v14, %v6399_v26  ;;  %v6441_v14 = vpack.c.bf16 %v8636_v42, %v8637_v41  ;;  %v8644_v40 = vand.u32 4294901760, %v6413_v52  ;;  %v6446_v53 = vsel %vm160_vm0, %v140_v55, 0  ;;  %s6136_s16 = scalar_lea.hbm %s8630_s4, 16 }
  0x1a   :  { %5537 = vmatprep.subr.bf16.mxu1 %v6374_v1  ;;  %8894 = vst [vmem:[#allocation23_spill] sm:$0xff] %v6426_v63  ;;  %8895 = vst [vmem:[#allocation24_spill] sm:$0xff] %v6432_v8  ;;  %v6455_v51 = vsel %vm160_vm0, %v141_v62, 0  ;;  %v6462_v41 = vsub.f32 %v6187_v3, %v258_v9  ;;  %v6467_v55 = vsub.f32 %v6190_v4, %v261_v10  ;;  %v165_v3 = vsel %vm160_vm0, %v6426_v63, 0  ;;  %p6137_p0 = scmp.ne.s32.totalorder %s8630_s4, %s6136_s16  ;;  %p6140_p1 = scmp.lt.u32.totalorder %s6136_s16, %s8630_s4 }
  0x1b   :  { %8893 = vst [vmem:[#allocation22_spill] sm:$0xff] %v6419_v56  ;;  %v6435_v13 = vand.u32 4294901760, %v6419_v56  ;;  %8897 = vst [vmem:[#allocation26_spill] sm:$0xff] %v6441_v14  ;;  %v6473_v50 = vpack.c.bf16 %v8639_v58, %v8640_v57  ;;  %v6478_v62 = vsub.f32 %v6196_v6, %v1592_v12  ;;  %v8648_v9 = vand.u32 4294901760, %v6446_v53  ;;  %v142_v58 = vld [vmem:[%s8629_s3 + $0x70] sm:$0xff]  ;;  %v143_v12 = vld [vmem:[%s8629_s3 + $0x78] sm:$0xff] }
  0x1c   :  { %8898 = vst [vmem:[#allocation27_spill] sm:$0xff] %v6462_v41  ;;  %8899 = vst [vmem:[#allocation28_spill] sm:$0xff] %v6467_v55  ;;  %v6485_v4 = vsel %vm160_vm0, %v124_v19, 0  ;;  %v6488_v10 = vsel %vm160_vm0, %v125_v7, 0  ;;  %v8647_v6 = vand.u32 4294901760, %v6455_v51  ;;  %v126_v7 = vld [vmem:[%s8628_s2 + $0x70] sm:$0xff]  ;;  %v6505_v19 = vsub.f32 %v6207_v11, %v1595_v15  ;;  %p6142_p2 = pnand %p6140_p1, %p6137_p0 }
  0x1d   :  { %8896 = vst [vmem:[#allocation25_spill] sm:$0xff] %v6435_v13  ;;  %v341_v42 = vsub.f32 %v6419_v56, %v6435_v13  ;;  %8900 = vst [vmem:[#allocation29_spill] sm:$0xff] %v6473_v50  ;;  %v6522_v38 = vpack.c.bf16 %v8644_v40, %v8645_v54  ;;  %v8649_v11 = vand.u32 4294901760, %v6462_v41  ;;  %v8650_v15 = vand.u32 4294901760, %v6467_v55  ;;  %v127_v54 = vld [vmem:[%s8628_s2 + $0x78] sm:$0xff] }
  0x1e   :  { %8901 = vst [vmem:[#allocation30_spill] sm:$0xff] %v6478_v62  ;;  %8902 = vst [vmem:[#allocation31_spill] sm:$0xff] %v6505_v19  ;;  %v6531_v23 = vsel %vm160_vm0, %v142_v58, 0  ;;  %v6535_v40 = vsel %vm160_vm0, %v143_v12, 0  ;;  %v6541_v36 = vsel %vm160_vm0, %v126_v7, 0  ;;  %v6557_v58 = vpack.c.bf16 %v8647_v6, %v8648_v9 }
  0x1f   :  { %v342_v57 = vand.u32 4294901760, %v341_v42  ;;  %v6510_v42 = vsub.f32 %v6218_v16, %v264_v22  ;;  %8905 = vst [vmem:[#allocation34_spill] sm:$0xff] %v6522_v38  ;;  %v6526_v16 = vand.u32 4294901760, %v165_v3  ;;  %v8651_v22 = vand.u32 4294901760, %v6485_v4  ;;  %8907 = vst [vmem:[#allocation36_spill] sm:$0xff] %v6546_v17 }
  0x20   :  { %5347 = vmatpush3.bf16.xpose.msra.mxu0 %v6357_v60  ;;  %8909 = vst [vmem:[#allocation38_spill] sm:$0xff] %v6557_v58  ;;  %v502_v28 = vsub.f32 %v6462_v41, %v8649_v11  ;;  %v8911_v6 = vand.u32 4294901760, %v6488_v10  ;;  %v6580_v18 = vsel %vm160_vm0, %v127_v54, 0  ;;  %v8913_v11 = vand.u32 4294901760, %v6478_v62 }
  0x21   :  { %5539 = vmatpush3.bf16.xpose.msra.mxu1 %v6374_v1  ;;  %5349 = vmatprep.subr.bf16.mxu0 %v6432_v8  ;;  %8903 = vst [vmem:[#allocation32_spill] sm:$0xff] %v6510_v42  ;;  %8906 = vst [vmem:[#allocation35_spill] sm:$0xff] %v6526_v16  ;;  %v8914_v12 = vand.u32 4294901760, %v6258_v30  ;;  %v8919_v37 = vand.u32 4294901760, %v6510_v42  ;;  %v8922_v13 = vand.u32 4294901760, %v6531_v23  ;;  %v8927_v1 = vand.u32 4294901760, %v6282_v35 }
  0x22   :  { %5541 = vmatprep.subr.bf16.mxu1 %v6441_v14  ;;  %4692 = vmatprep.mubr.f32.mxu0 %v342_v57  ;;  %v6576_v9 = vpack.c.bf16 %v8911_v6, %v8651_v22  ;;  %v1836_v7 = vsub.f32 %v6478_v62, %v8913_v11  ;;  %v8916_v22 = vand.u32 4294901760, %v6268_v32  ;;  %v8931_v44 = vand.u32 4294901760, %v6316_v46 }
  0x23   :  { %5028 = vmatprep.mubr.f32.mxu1 %v342_v57  ;;  %v6551_v57 = vsub.f32 %v6241_v24, %v1601_v29  ;;  %v509_v24 = vsub.f32 %v6467_v55, %v8650_v15  ;;  %v6570_v29 = vsub.f32 %v165_v3, %v6526_v16  ;;  %v6591_v6 = vsub.f32 %v6258_v30, %v8914_v12 }
  0x24   :  { %8912 = vst [vmem:[#allocation40_spill] sm:$0xff] %v6576_v9  ;;  %v6596_v54 = vsub.f32 %v6268_v32, %v8916_v22  ;;  %v8918_v3 = vand.u32 4294901760, %v6505_v19  ;;  %v516_v30 = vsub.f32 %v6510_v42, %v8919_v37  ;;  %v8920_v12 = vand.u32 4294901760, %v6515_v39 }
  0x25   :  { %8908 = vst [vmem:[#allocation37_spill] sm:$0xff] %v6551_v57  ;;  %8910 = vst [vmem:[#allocation39_spill] sm:$0xff] %v6570_v29  ;;  %v503_v22 = vand.u32 4294901760, %v502_v28  ;;  %v510_v0 = vand.u32 4294901760, %v509_v24  ;;  %v6613_v11 = vand.u32 4294901760, %v6570_v29  ;;  %v1837_v37 = vand.u32 4294901760, %v1836_v7 }
  0x26   :  { %8915 = vst [vmem:[#allocation41_spill] sm:$0xff] %v6591_v6  ;;  %8917 = vst [vmem:[#allocation42_spill] sm:$0xff] %v6596_v54  ;;  %v1843_v15 = vsub.f32 %v6505_v19, %v8918_v3  ;;  %v523_v63 = vsub.f32 %v6515_v39, %v8920_v12  ;;  %v8923_v3 = vand.u32 4294901760, %v6535_v40  ;;  %v6629_v28 = vsub.f32 %v6282_v35, %v8927_v1  ;;  %v98_v24 = vld [vmem:[%s8626_s0 + $0x10] sm:$0xff]  ;;  %v99_v35 = vld [vmem:[%s8626_s0 + $0x18] sm:$0xff] }
  0x27   :  { %8921 = vst [vmem:[#allocation43_spill] sm:$0xff] %v6613_v11  ;;  %v8929_v32 = vand.u32 4294901760, %v6546_v17  ;;  %v8930_v7 = vand.u32 4294901760, %v6551_v57  ;;  %v517_v60 = vand.u32 4294901760, %v516_v30  ;;  %v6648_v34 = vsub.f32 %v6316_v46, %v8931_v44 }
  0x28   :  { %5351 = vmatpush3.bf16.xpose.msra.mxu0 %v6432_v8  ;;  %v8925_v8 = vand.u32 4294901760, %v6271_v33  ;;  %8928 = vst [vmem:[#allocation46_spill] sm:$0xff] %v6629_v28  ;;  %v1844_v1 = vand.u32 4294901760, %v1843_v15  ;;  %v524_v45 = vand.u32 4294901760, %v523_v63  ;;  %v6660_v27 = vmul.f32 2.0, %v98_v24  ;;  %v100_v63 = vld [vmem:[%s8626_s0 + $0x20] sm:$0xff] }
  0x29   :  { %5543 = vmatpush3.bf16.xpose.msra.mxu1 %v6441_v14  ;;  %5353 = vmatprep.subr.bf16.mxu0 %v6473_v50  ;;  %v6619_v14 = vpack.c.bf16 %v8923_v3, %v8922_v13  ;;  %v1850_v13 = vsub.f32 %v6546_v17, %v8929_v32  ;;  %v1857_v3 = vsub.f32 %v6551_v57, %v8930_v7  ;;  %v8933_v32 = vand.u32 4294901760, %v6541_v36 }
  0x2a   :  { %5545 = vmatprep.subr.bf16.mxu1 %v6522_v38  ;;  %v6624_v12 = vsub.f32 %v6271_v33, %v8925_v8  ;;  %8932 = vst [vmem:[#allocation47_spill] sm:$0xff] %v6648_v34  ;;  %v8934_v7 = vand.u32 4294901760, %v6580_v18  ;;  %v6656_v33 = vpack.c.bf16 %v510_v0, %v503_v22  ;;  %v351_v8 = vsub.f32 %v6570_v29, %v6613_v11 }
  0x2b   :  { %8924 = vst [vmem:[#allocation44_spill] sm:$0xff] %v6619_v14  ;;  %8936 = vst [vmem:[#allocation49_spill] sm:$0xff] %v6660_v27  ;;  %v8937_v15 = vand.u32 4294901760, %v6319_v47  ;;  %v6672_v0 = vmul.f32 2.0, %v99_v35  ;;  %v1851_v22 = vand.u32 4294901760, %v1850_v13  ;;  %v1858_v24 = vand.u32 4294901760, %v1857_v3 }
  0x2c   :  { %8926 = vst [vmem:[#allocation45_spill] sm:$0xff] %v6624_v12  ;;  %v6654_v31 = vpack.c.bf16 %v8934_v7, %v8933_v32  ;;  %v8940_v32 = vand.u32 4294901760, %v6591_v6  ;;  %v8941_v44 = vand.u32 4294901760, %v6596_v54  ;;  %v6689_v35 = vpack.c.bf16 %v524_v45, %v517_v60 }
  0x2d   :  { %v6670_v30 = vsub.f32 %v6319_v47, %v8937_v15  ;;  %8939 = vst [vmem:[#allocation51_spill] sm:$0xff] %v6672_v0  ;;  %v6687_v47 = vpack.c.bf16 %v1844_v1, %v1837_v37  ;;  %v6692_v3 = vmul.f32 2.0, %v100_v63  ;;  %v8943_v15 = vand.u32 4294901760, %v6322_v48  ;;  %v101_v37 = vld [vmem:[%s8626_s0 + $0x28] sm:$0xff] }
  0x2e   :  { %8935 = vst [vmem:[#allocation48_spill] sm:$0xff] %v6654_v31  ;;  %v6678_v7 = vsub.f32 %v6591_v6, %v8940_v32  ;;  %v6683_v46 = vsub.f32 %v6596_v54, %v8941_v44  ;;  %v8945_v44 = vand.u32 4294901760, %v6325_v49  ;;  %v168_v45 = vsel %vm160_vm0, %v6660_v27, 0 }
  0x2f   :  { %8938 = vst [vmem:[#allocation50_spill] sm:$0xff] %v6670_v30  ;;  %8942 = vst [vmem:[#allocation52_spill] sm:$0xff] %v6692_v3  ;;  %v6698_v32 = vsub.f32 %v6322_v48, %v8943_v15  ;;  %v171_v60 = vsel %vm160_vm0, %v6672_v0, 0  ;;  %v8947_v1 = vand.u32 4294901760, %v6624_v12  ;;  %v8948_v63 = vand.u32 4294901760, %v6629_v28 }
  0x30   :  { %5355 = vmatpush3.bf16.xpose.msra.mxu0 %v6473_v50  ;;  %v6703_v11 = vsub.f32 %v6325_v49, %v8945_v44  ;;  %v8949_v44 = vand.u32 4294901760, %v6351_v59  ;;  %v6724_v0 = vand.u32 4294901760, %v351_v8  ;;  %v6726_v27 = vpack.c.bf16 %v1858_v24, %v1851_v22 }
  0x31   :  { %5547 = vmatpush3.bf16.xpose.msra.mxu1 %v6522_v38  ;;  %5357 = vmatprep.subr.bf16.mxu0 %v6557_v58  ;;  %8944 = vst [vmem:[#allocation53_spill] sm:$0xff] %v6698_v32  ;;  %v1864_v48 = vsub.f32 %v6624_v12, %v8947_v1  ;;  %v1871_v15 = vsub.f32 %v6629_v28, %v8948_v63  ;;  %v531_v38 = vand.u32 4294901760, %v6678_v7  ;;  %v538_v50 = vand.u32 4294901760, %v6683_v46 }
  0x32   :  { %5549 = vmatprep.subr.bf16.mxu1 %v6576_v9  ;;  %8946 = vst [vmem:[#allocation54_spill] sm:$0xff] %v6703_v11  ;;  %v6722_v13 = vsub.f32 %v6351_v59, %v8949_v44  ;;  %v6730_v1 = vand.u32 4294901760, %v168_v45  ;;  %v6732_v29 = vand.u32 4294901760, %v171_v60  ;;  %v174_v63 = vsel %vm160_vm0, %v6692_v3, 0  ;;  %v102_v44 = vld [vmem:[%s8626_s0 + $0x30] sm:$0xff] }
  0x33   :  { %v6736_v49 = vmul.f32 2.0, %v101_v37  ;;  %v8954_v59 = vand.u32 4294901760, %v6648_v34  ;;  %v8955_v7 = vand.u32 4294901760, %v6360_v61  ;;  %v103_v37 = vld [vmem:[%s8626_s0 + $0x38] sm:$0xff]  ;;  %v1865_v3 = vand.u32 4294901760, %v1864_v48 }
  0x34   :  { %8950 = vst [vmem:[#allocation55_spill] sm:$0xff] %v6722_v13  ;;  %8951 = vst [vmem:[#allocation56_spill] sm:$0xff] %v6730_v1  ;;  %v1872_v21 = vand.u32 4294901760, %v1871_v15  ;;  %v8960_v56 = vand.u32 4294901760, %v6380_v5  ;;  %v6769_v48 = vand.u32 4294901760, %v174_v63  ;;  %vm31_vm1 = vcmask 7168  }
  0x35   :  { %8952 = vst [vmem:[#allocation57_spill] sm:$0xff] %v6732_v29  ;;  %8953 = vst [vmem:[#allocation58_spill] sm:$0xff] %v6736_v49  ;;  %v544_v8 = vsub.f32 %v6648_v34, %v8954_v59  ;;  %v6746_v46 = vsub.f32 %v6360_v61, %v8955_v7  ;;  %v8957_v59 = vand.u32 4294901760, %v6670_v30  ;;  %v8958_v61 = vand.u32 4294901760, %v6377_v2 }
  0x36   :  { %v6767_v16 = vsub.f32 %v6380_v5, %v8960_v56  ;;  %8962 = vst [vmem:[#allocation62_spill] sm:$0xff] %v6769_v48  ;;  %v177_v15 = vsel %vm160_vm0, %v6736_v49, 0  ;;  %v6784_v5 = vmul.f32 2.0, %v102_v44  ;;  %v6786_v56 = vmul.f32 2.0, %v103_v37 }
  0x37   :  { %8956 = vst [vmem:[#allocation59_spill] sm:$0xff] %v6746_v46  ;;  %v551_v22 = vsub.f32 %v6670_v30, %v8957_v59  ;;  %v6762_v7 = vsub.f32 %v6377_v2, %v8958_v61  ;;  %v104_v59 = vld [vmem:[%s8626_s0 + $0x40] sm:$0xff]  ;;  %v6779_v2 = vsub.f32 %v168_v45, %v6730_v1  ;;  %v6782_v61 = vsub.f32 %v171_v60, %v6732_v29 }
  0x38   :  { %5359 = vmatpush3.bf16.xpose.msra.mxu0 %v6557_v58  ;;  %8961 = vst [vmem:[#allocation61_spill] sm:$0xff] %v6767_v16  ;;  %8965 = vst [vmem:[#allocation65_spill] sm:$0xff] %v6784_v5  ;;  %v545_v24 = vand.u32 4294901760, %v544_v8  ;;  %v8967_v49 = vand.u32 4294901760, %v6698_v32  ;;  %v6796_v1 = vand.u32 4294901760, %v177_v15  ;;  %v180_v60 = vsel %vm160_vm0, %v6784_v5, 0 }
  0x39   :  { %8959 = vst [vmem:[#allocation60_spill] sm:$0xff] %v6762_v7  ;;  %5551 = vmatpush3.bf16.xpose.msra.mxu1 %v6576_v9  ;;  %5361 = vmatprep.subr.bf16.mxu0 %v6619_v14  ;;  %8963 = vst [vmem:[#allocation63_spill] sm:$0xff] %v6779_v2  ;;  %v8968_v9 = vand.u32 4294901760, %v6703_v11  ;;  %v183_v44 = vsel %vm160_vm0, %v6786_v56, 0  ;;  %v6802_v37 = vmul.f32 2.0, %v104_v59  ;;  %v552_v8 = vand.u32 4294901760, %v551_v22 }
  0x3a   :  { %8964 = vst [vmem:[#allocation64_spill] sm:$0xff] %v6782_v61  ;;  %8966 = vst [vmem:[#allocation66_spill] sm:$0xff] %v6786_v56  ;;  %5553 = vmatprep.subr.bf16.mxu1 %v6654_v31  ;;  %v1878_v58 = vsub.f32 %v6698_v32, %v8967_v49  ;;  %v8971_v29 = vand.u32 4294901760, %v6722_v13  ;;  %v6811_v45 = vsub.f32 %v174_v63, %v6769_v48  ;;  %v6815_v5 = vand.u32 4294901760, %v6779_v2 }
  0x3b   :  { %v1885_v26 = vsub.f32 %v6703_v11, %v8968_v9  ;;  %8969 = vst [vmem:[#allocation67_spill] sm:$0xff] %v6796_v1  ;;  %8970 = vst [vmem:[#allocation68_spill] sm:$0xff] %v6802_v37  ;;  %v6818_v56 = vand.u32 4294901760, %v6782_v61  ;;  %v186_v22 = vsel %vm160_vm0, %v6802_v37, 0  ;;  %v6826_v9 = vpack.c.bf16 %v538_v50, %v531_v38 }
  0x3c   :  { %v6807_v49 = vsub.f32 %v6722_v13, %v8971_v29  ;;  %8972 = vst [vmem:[#allocation69_spill] sm:$0xff] %v6811_v45  ;;  %8973 = vst [vmem:[#allocation70_spill] sm:$0xff] %v6815_v5  ;;  %v1879_v59 = vand.u32 4294901760, %v1878_v58  ;;  %v6822_v29 = vand.u32 4294901760, %v180_v60  ;;  %v6824_v13 = vand.u32 4294901760, %v183_v44 }
  0x3d   :  { %8974 = vst [vmem:[#allocation71_spill] sm:$0xff] %v6818_v56  ;;  %v1886_v32 = vand.u32 4294901760, %v1885_v26  ;;  %v8977_v63 = vand.u32 4294901760, %v6746_v46  ;;  %v6834_v48 = vsub.f32 %v177_v15, %v6796_v1  ;;  %v6836_v30 = vand.u32 4294901760, %v186_v22  ;;  %v105_v26 = vld [vmem:[%s8626_s0 + $0x48] sm:$0xff] }
  0x3e   :  { %8975 = vst [vmem:[#allocation72_spill] sm:$0xff] %v6822_v29  ;;  %8976 = vst [vmem:[#allocation73_spill] sm:$0xff] %v6824_v13  ;;  %v6842_v58 = vpack.c.bf16 %v1872_v21, %v1865_v3  ;;  %v6844_v38 = vpack.c.bf16 %v552_v8, %v545_v24  ;;  %v8981_v50 = vand.u32 4294901760, %v6762_v7  ;;  %v6852_v15 = vand.u32 4294901760, %v6811_v45 }
  0x3f   :  { %v6831_v11 = vsub.f32 %v6746_v46, %v8977_v63  ;;  %8979 = vst [vmem:[#allocation75_spill] sm:$0xff] %v6834_v48  ;;  %8980 = vst [vmem:[#allocation76_spill] sm:$0xff] %v6836_v30  ;;  %v361_v3 = vsub.f32 %v6779_v2, %v6815_v5  ;;  %v371_v24 = vsub.f32 %v6782_v61, %v6818_v56  ;;  %v8986_v56 = vand.u32 4294901760, %v6394_v20 }
  0x40   :  { %5363 = vmatpush3.bf16.xpose.msra.mxu0 %v6619_v14  ;;  %v6849_v63 = vsub.f32 %v6762_v7, %v8981_v50  ;;  %8983 = vst [vmem:[#allocation78_spill] sm:$0xff] %v6852_v15  ;;  %v8984_v14 = vand.u32 4294901760, %v6767_v16  ;;  %v6867_v8 = vpack.c.bf16 %v1886_v32, %v1879_v59  ;;  %v6870_v50 = vsub.f32 %v180_v60, %v6822_v29  ;;  %v108_v59 = vld [vmem:[%s8626_s0 + $0x60] sm:$0xff] }
  0x41   :  { %8978 = vst [vmem:[#allocation74_spill] sm:$0xff] %v6831_v11  ;;  %5555 = vmatpush3.bf16.xpose.msra.mxu1 %v6654_v31  ;;  %5365 = vmatprep.subr.bf16.mxu0 %v6656_v33  ;;  %v6873_v37 = vsub.f32 %v183_v44, %v6824_v13  ;;  %v6875_v31 = vmul.f32 2.0, %v105_v26  ;;  %v6884_v61 = vsub.f32 %v6394_v20, %v8986_v56  ;;  %v6887_v32 = vand.u32 4294901760, %v6834_v48  ;;  %v107_v44 = vld [vmem:[%s8626_s0 + $0x58] sm:$0xff] }
  0x42   :  { %8982 = vst [vmem:[#allocation77_spill] sm:$0xff] %v6849_v63  ;;  %v6860_v21 = vsub.f32 %v6767_v16, %v8984_v14  ;;  %5557 = vmatprep.subr.bf16.mxu1 %v6687_v47  ;;  %v106_v14 = vld [vmem:[%s8626_s0 + $0x50] sm:$0xff]  ;;  %v6890_v60 = vsub.f32 %v186_v22, %v6836_v30  ;;  %v381_v20 = vsub.f32 %v6811_v45, %v6852_v15  ;;  %v8988_v56 = vand.u32 4294901760, %v6397_v25 }
  0x43   :  { %8985 = vst [vmem:[#allocation79_spill] sm:$0xff] %v6875_v31  ;;  %8987 = vst [vmem:[#allocation80_spill] sm:$0xff] %v6887_v32  ;;  %v189_v22 = vsel %vm160_vm0, %v6875_v31, 0  ;;  %v362_v2 = vand.u32 4294901760, %v361_v3  ;;  %v372_v30 = vand.u32 4294901760, %v371_v24  ;;  %v6910_v29 = vmul.f32 2.0, %v106_v14 }
  0x44   :  { %v6904_v5 = vsub.f32 %v6397_v25, %v8988_v56  ;;  %v6908_v13 = vand.u32 4294901760, %v189_v22  ;;  %v6913_v1 = vand.u32 4294901760, %v6870_v50  ;;  %v6916_v26 = vand.u32 4294901760, %v6873_v37 }
  0x45   :  { %8990 = vst [vmem:[#allocation82_spill] sm:$0xff] %v6910_v29  ;;  %v6918_v15 = vmul.f32 2.0, %v107_v44  ;;  %v6920_v45 = vmul.f32 2.0, %v108_v59  ;;  %v391_v25 = vsub.f32 %v6834_v48, %v6887_v32  ;;  %v6926_v3 = vand.u32 4294901760, %v6890_v60  ;;  %v109_v44 = vld [vmem:[%s8626_s0 + $0x68] sm:$0xff] }
  0x46   :  { %8989 = vst [vmem:[#allocation81_spill] sm:$0xff] %v6908_v13  ;;  %8991 = vst [vmem:[#allocation83_spill] sm:$0xff] %v6913_v1  ;;  %v6929_v24 = vsub.f32 %v189_v22, %v6908_v13  ;;  %v192_v14 = vsel %vm160_vm0, %v6910_v29, 0  ;;  %v382_v59 = vand.u32 4294901760, %v381_v20  ;;  %v8997_v29 = vand.u32 4294901760, %v6410_v43 }
  0x47   :  { %8992 = vst [vmem:[#allocation84_spill] sm:$0xff] %v6916_v26  ;;  %8993 = vst [vmem:[#allocation85_spill] sm:$0xff] %v6918_v15  ;;  %4693 = vmatmul.mubr.f32.vlgmr.msra.gmra.mrb[0].mxu0 %v6724_v0  ;;  %v6938_v56 = vand.u32 4294901760, %v192_v14  ;;  %v195_v31 = vsel %vm160_vm0, %v6918_v15, 0  ;;  %v198_v22 = vsel %vm160_vm0, %v6920_v45, 0  ;;  %v6969_v15 = vmul.f32 2.0, %v109_v44 }
  0x48   :  { %8994 = vst [vmem:[#allocation86_spill] sm:$0xff] %v6920_v45  ;;  %8995 = vst [vmem:[#allocation87_spill] sm:$0xff] %v6926_v3  ;;  %5367 = vmatpush3.bf16.xpose.msra.mxu0 %v6656_v33  ;;  %5029 = vmatmul.mubr.f32.vlgmr.msra.gmra.mrb[0].mxu1 %v6724_v0  ;;  %v6949_v32 = vsub.f32 %v6410_v43, %v8997_v29  ;;  %v6952_v33 = vand.u32 4294901760, %v6929_v24  ;;  %v6954_v0 = vand.u32 4294901760, %v195_v31  ;;  %v6956_v20 = vand.u32 4294901760, %v198_v22  ;;  %v110_v45 = vld [vmem:[%s8626_s0 + $0x70] sm:$0xff] }
  0x49   :  { %8996 = vst [vmem:[#allocation88_spill] sm:$0xff] %v6929_v24  ;;  %5559 = vmatpush3.bf16.xpose.msra.mxu1 %v6687_v47  ;;  %5369 = vmatprep.subr.bf16.mxu0 %v6689_v35  ;;  %v401_v47 = vsub.f32 %v6870_v50, %v6913_v1  ;;  %v411_v43 = vsub.f32 %v6873_v37, %v6916_v26  ;;  %8999 = vst [vmem:[#allocation90_spill] sm:$0xff] %v6969_v15  ;;  %v392_v48 = vand.u32 4294901760, %v391_v25  ;;  %vm4248_vm2 = vcmask 1040384  }
  0x4a   :  { %8998 = vst [vmem:[#allocation89_spill] sm:$0xff] %v6952_v33  ;;  %5561 = vmatprep.subr.bf16.mxu1 %v6726_v27  ;;  %4695 = vmatprep.mubr.f32.mxu0 %v362_v2  ;;  %v6967_v29 = vsub.f32 %v192_v14, %v6938_v56  ;;  %v421_v13 = vsub.f32 %v6890_v60, %v6926_v3  ;;  %v9000_v26 = vand.u32 4294901760, %v6413_v52  ;;  %v9002_v44 = vand.u32 4294901760, %v6455_v51 }
  0x4b   :  { %5031 = vmatprep.mubr.f32.mxu1 %v362_v2  ;;  %4696 = vmatmul.mubr.f32.gmra.mrb[2].mxu0 %v372_v30  ;;  %v6974_v63 = vsub.f32 %v195_v31, %v6954_v0  ;;  %v6977_v11 = vsub.f32 %v198_v22, %v6956_v20  ;;  %v9001_v2 = vand.u32 4294901760, %v6446_v53  ;;  %v6994_v3 = vmul.f32 2.0, %v110_v45 }
  0x4c   :  { %5032 = vmatmul.mubr.f32.gmra.mrb[2].mxu1 %v372_v30  ;;  %4698 = vmatprep.mubr.f32.mxu0 %v382_v59  ;;  %v6982_v14 = vsub.f32 %v6413_v52, %v9000_v26  ;;  %v6992_v31 = vsub.f32 %v6455_v51, %v9002_v44  ;;  %v9004_v30 = vand.u32 4294901760, %v6485_v4  ;;  %v431_v52 = vsub.f32 %v6929_v24, %v6952_v33 }
  0x4d   :  { %v6987_v25 = vsub.f32 %v6446_v53, %v9001_v2  ;;  %9003 = vst [vmem:[#allocation91_spill] sm:$0xff] %v6994_v3  ;;  %5034 = vmatprep.mubr.f32.mxu1 %v382_v59  ;;  %v7004_v26 = vand.u32 4294901760, %v6967_v29  ;;  %v7007_v53 = vand.u32 4294901760, %v6974_v63  ;;  %v402_v2 = vand.u32 4294901760, %v401_v47 }
  0x4e   :  { %v6999_v22 = vsub.f32 %v6485_v4, %v9004_v30  ;;  %v412_v51 = vand.u32 4294901760, %v411_v43  ;;  %v9007_v45 = vand.u32 4294901760, %v6488_v10  ;;  %v201_v4 = vsel %vm160_vm0, %v6969_v15, 0 }
  0x4f   :  { %9005 = vst [vmem:[#allocation92_spill] sm:$0xff] %v7004_v26  ;;  %9006 = vst [vmem:[#allocation93_spill] sm:$0xff] %v7007_v53  ;;  %4699 = vmatmul.mubr.f32.gmra.mrb[4].mxu0 %v392_v48  ;;  %v422_v44 = vand.u32 4294901760, %v421_v13  ;;  %v7017_v30 = vand.u32 4294901760, %v6977_v11  ;;  %v9009_v33 = vand.u32 4294901760, %v6531_v23  ;;  %v7024_v47 = vand.u32 4294901760, %v201_v4 }
  0x50   :  { %v7012_v59 = vsub.f32 %v6488_v10, %v9007_v45  ;;  %v111_v10 = vld [vmem:[%s8626_s0 + $0x78] sm:$0xff]  ;;  %5371 = vmatpush3.bf16.xpose.msra.mxu0 %v6689_v35  ;;  %5035 = vmatmul.mubr.f32.gmra.mrb[4].mxu1 %v392_v48  ;;  %v9010_v43 = vand.u32 4294901760, %v6535_v40  ;;  %v9011_v45 = vand.u32 4294901760, %v6541_v36  ;;  %v204_v24 = vsel %vm160_vm0, %v6994_v3, 0 }
  0x51   :  { %9008 = vst [vmem:[#allocation94_spill] sm:$0xff] %v7017_v30  ;;  %v7022_v1 = vsub.f32 %v6531_v23, %v9009_v33  ;;  %v9012_v23 = vand.u32 4294901760, %v6580_v18  ;;  %5563 = vmatpush3.bf16.xpose.msra.mxu1 %v6726_v27  ;;  %5373 = vmatprep.subr.bf16.mxu0 %v6826_v9  ;;  %v432_v35 = vand.u32 4294901760, %v431_v52  ;;  %v7054_v48 = vsub.f32 %v201_v4, %v7024_v47 }
  0x52   :  { %v7033_v13 = vsub.f32 %v6535_v40, %v9010_v43  ;;  %v7038_v15 = vsub.f32 %v6541_v36, %v9011_v45  ;;  %v441_v40 = vsub.f32 %v6967_v29, %v7004_v26  ;;  %v451_v36 = vsub.f32 %v6974_v63, %v7007_v53  ;;  %5565 = vmatprep.subr.bf16.mxu1 %v6842_v58 }
  0x53   :  { %v7043_v33 = vsub.f32 %v6580_v18, %v9012_v23  ;;  %4701 = vmatprep.mubr.f32.mxu0 %v402_v2  ;;  %v7057_v18 = vand.u32 4294901760, %v204_v24  ;;  %v7059_v43 = vmul.f32 2.0, %v111_v10  ;;  %v7063_v27 = vpack.c.bf16 %v6467_v55, %v6462_v41  ;;  %5037 = vmatprep.mubr.f32.mxu1 %v402_v2 }
  0x54   :  { %v7067_v52 = vpack.c.bf16 %v6505_v19, %v6478_v62  ;;  %4702 = vmatmul.mubr.f32.gmra.mrb[6].mxu0 %v412_v51  ;;  %v461_v4 = vsub.f32 %v6977_v11, %v7017_v30  ;;  %v7072_v45 = vand.u32 4294901760, %v7054_v48  ;;  %v7076_v10 = vpack.c.bf16 %v6515_v39, %v6510_v42  ;;  %5038 = vmatmul.mubr.f32.gmra.mrb[6].mxu1 %v412_v51  ;;  %v9015_v51 = vld [vmem:[#allocation50_spill] sm:$0xff] }
  0x55   :  { %9013 = vst [vmem:[#allocation95_spill] sm:$0xff] %v7059_v43  ;;  %v7080_v23 = vpack.c.bf16 %v6551_v57, %v6546_v17  ;;  %4704 = vmatprep.mubr.f32.mxu0 %v422_v44  ;;  %v7083_v3 = vsub.f32 %v204_v24, %v7057_v18  ;;  %v207_v2 = vsel %vm160_vm0, %v7059_v43, 0  ;;  %v7089_v30 = vpack.c.bf16 %v6596_v54, %v6591_v6  ;;  %v9017_v43 = vld [vmem:[#allocation53_spill] sm:$0xff]  ;;  %v9018_v42 = vld [vmem:[#allocation54_spill] sm:$0xff]  ;;  %v9019_v6 = vld [vmem:[#allocation55_spill] sm:$0xff] }
  0x56   :  { %9014 = vst [vmem:[#allocation96_spill] sm:$0xff] %v7072_v45  ;;  %v7093_v53 = vpack.c.bf16 %v6629_v28, %v6624_v12  ;;  %5040 = vmatprep.mubr.f32.mxu1 %v422_v44  ;;  %v442_v26 = vand.u32 4294901760, %v441_v40  ;;  %v452_v57 = vand.u32 4294901760, %v451_v36  ;;  %v7095_v17 = vand.u32 4294901760, %v207_v2  ;;  %v9022_v19 = vld [vmem:[#allocation74_spill] sm:$0xff] }
  0x57   :  { %v7099_v24 = vpack.c.bf16 %v9015_v51, %v6648_v34  ;;  %v7102_v39 = vand.u32 4294901760, %v7083_v3  ;;  %v7106_v54 = vpack.c.bf16 %v9018_v42, %v9017_v43  ;;  %v7110_v28 = vpack.c.bf16 %v6746_v46, %v9019_v6 }
  0x58   :  { %v7114_v44 = vpack.c.bf16 %v6767_v16, %v6762_v7  ;;  %4705 = vmatmul.mubr.f32.gmra.mrb[8].mxu0 %v432_v35  ;;  %v471_v40 = vsub.f32 %v7054_v48, %v7072_v45  ;;  %v7119_v36 = vsub.f32 %v207_v2, %v7095_v17  ;;  %v7123_v51 = vpack.c.bf16 %v6904_v5, %v6884_v61 }
  0x59   :  { %9016 = vst [vmem:[#allocation97_spill] sm:$0xff] %v7102_v39  ;;  %v7127_v42 = vpack.c.bf16 %v6982_v14, %v6949_v32  ;;  %5375 = vmatpush3.bf16.xpose.msra.mxu0 %v6826_v9  ;;  %5041 = vmatmul.mubr.f32.gmra.mrb[8].mxu1 %v432_v35  ;;  %v462_v7 = vand.u32 4294901760, %v461_v4  ;;  %v7133_v45 = vpack.c.bf16 %v6992_v31, %v6987_v25  ;;  %v1900_v16 = vand.u32 4294901760, %v6860_v21 }
  0x5a   :  { %v7137_v2 = vpack.c.bf16 %v7012_v59, %v6999_v22  ;;  %5567 = vmatpush3.bf16.xpose.msra.mxu1 %v6842_v58  ;;  %5377 = vmatprep.subr.bf16.mxu0 %v6844_v38  ;;  %v7143_v9 = vand.u32 4294901760, %v7119_v36  ;;  %v7147_v35 = vpack.c.bf16 %v7033_v13, %v7022_v1  ;;  %v7151_v4 = vpack.c.bf16 %v7043_v33, %v7038_v15 }
  0x5b   :  { %5569 = vmatprep.subr.bf16.mxu1 %v6867_v8  ;;  %4707 = vmatprep.mubr.f32.mxu0 %v442_v26  ;;  %v481_v46 = vsub.f32 %v7083_v3, %v7102_v39  ;;  %v472_v43 = vand.u32 4294901760, %v471_v40  ;;  %v9021_v12 = vand.u32 4294901760, %v6807_v49  ;;  %v9023_v21 = vand.u32 4294901760, %v9022_v19  ;;  %v9026_v40 = vld [vmem:[#allocation77_spill] sm:$0xff] }
  0x5c   :  { %9020 = vst [vmem:[#allocation98_spill] sm:$0xff] %v7143_v9  ;;  %5043 = vmatprep.mubr.f32.mxu1 %v442_v26  ;;  %4708 = vmatmul.mubr.f32.gmra.mrb[10].mxu0 %v452_v57  ;;  %v491_v34 = vsub.f32 %v7119_v36, %v7143_v9  ;;  %v9024_v58 = vand.u32 4294901760, %v6884_v61  ;;  %v9025_v55 = vand.u32 4294901760, %v6904_v5  ;;  %v9027_v39 = vand.u32 4294901760, %v9026_v40 }
  0x5d   :  { %5044 = vmatmul.mubr.f32.gmra.mrb[10].mxu1 %v452_v57  ;;  %4710 = vmatprep.mubr.f32.mxu0 %v462_v7  ;;  %v5380_v62 = vpack.c.bf16 %v9023_v21, %v9021_v12  ;;  %v9028_v57 = vand.u32 4294901760, %v6949_v32  ;;  %v9029_v49 = vand.u32 4294901760, %v6982_v14  ;;  %v482_v12 = vand.u32 4294901760, %v481_v46 }
  0x5e   :  { %v572_v6 = vsub.f32 %v6884_v61, %v9024_v58  ;;  %v579_v26 = vsub.f32 %v6904_v5, %v9025_v55  ;;  %5046 = vmatprep.mubr.f32.mxu1 %v462_v7  ;;  %v5572_v41 = vpack.c.bf16 %v1900_v16, %v9027_v39  ;;  %v492_v21 = vand.u32 4294901760, %v491_v34  ;;  %v9030_v34 = vld [vmem:[#allocation21_spill] sm:$0xff] }
  0x5f   :  { %v1906_v9 = vsub.f32 %v6949_v32, %v9028_v57  ;;  %v1913_v19 = vsub.f32 %v6982_v14, %v9029_v49  ;;  %v585_v39 = vand.u32 4294901760, %v6987_v25  ;;  %v8811_v16 = vand.u32 4294901760, %v6992_v31 }
  0x60   :  { %4711 = vmatmul.mubr.f32.gmra.mrb[12].mxu0 %v472_v43  ;;  %v573_v55 = vand.u32 4294901760, %v572_v6  ;;  %v580_v7 = vand.u32 4294901760, %v579_v26  ;;  %v8808_v57 = vand.u32 4294901760, %v6999_v22  ;;  %v8810_v46 = vand.u32 4294901760, %v7012_v59 }
  0x61   :  { %5379 = vmatpush3.bf16.xpose.msra.mxu0 %v6844_v38  ;;  %5047 = vmatmul.mubr.f32.gmra.mrb[12].mxu1 %v472_v43  ;;  %v1907_v58 = vand.u32 4294901760, %v1906_v9  ;;  %v1914_v40 = vand.u32 4294901760, %v1913_v19  ;;  %v586_v6 = vsub.f32 %v6987_v25, %v585_v39 }
  0x62   :  { %5571 = vmatpush3.bf16.xpose.msra.mxu1 %v6867_v8  ;;  %5381 = vmatprep.subr.bf16.mxu0 %v5380_v62  ;;  %v5384_v38 = vpack.c.bf16 %v580_v7, %v573_v55  ;;  %v593_v8 = vsub.f32 %v6992_v31, %v8811_v16  ;;  %v1920_v9 = vsub.f32 %v6999_v22, %v8808_v57 }
  0x63   :  { %5573 = vmatprep.subr.bf16.mxu1 %v5572_v41  ;;  %4713 = vmatprep.mubr.f32.mxu0 %v482_v12  ;;  %v5576_v43 = vpack.c.bf16 %v1914_v40, %v1907_v58  ;;  %v1927_v26 = vsub.f32 %v7012_v59, %v8810_v46  ;;  %v587_v49 = vand.u32 4294901760, %v586_v6  ;;  %v1933_v58 = vand.u32 4294901760, %v7038_v15 }
  0x64   :  { %5049 = vmatprep.mubr.f32.mxu1 %v482_v12  ;;  %4714 = vmatmul.mubr.f32.gmra.mrb[14].mxu0 %v492_v21  ;;  %v594_v19 = vand.u32 4294901760, %v593_v8  ;;  %v8809_v12 = vand.u32 4294901760, %v7022_v1  ;;  %v1921_v55 = vand.u32 4294901760, %v1920_v9  ;;  %v1940_v40 = vand.u32 4294901760, %v7043_v33 }
  0x65   :  { %5050 = vmatmul.mubr.f32.gmra.mrb[14].mxu1 %v492_v21  ;;  %4748 = vmatprep.mubr.f32.mxu0 %v9030_v34  ;;  %v606_v21 = vand.u32 4294901760, %v7033_v13  ;;  %v1928_v7 = vand.u32 4294901760, %v1927_v26  ;;  %v1934_v8 = vsub.f32 %v7038_v15, %v1933_v58  ;;  %v6149_v15 = vmov 0.0  }
  0x66   :  { %5084 = vmatprep.mubr.f32.mxu1 %v9030_v34  ;;  %v5388_v57 = vpack.c.bf16 %v594_v19, %v587_v49  ;;  %v1941_v9 = vsub.f32 %v7043_v33, %v1940_v40  ;;  %v5680_v25 = vpack.c.bf16 %v1940_v40, %v1933_v58  ;;  %25 = vst [vmem:[#allocation3] sm:$0x1] %v6149_v15  ;;  %48 = vst.msk [vmem:[#allocation5] sm:$0xff] %vm31_vm1, %v6149_v15 }
  0x67   :  { %v5580_v6 = vpack.c.bf16 %v1928_v7, %v1921_v55  ;;  %v1935_v19 = vand.u32 4294901760, %v1934_v8  ;;  %v9053_v55 = vld [vmem:[#allocation18_spill] sm:$0xff]  ;;  %v9054_v7 = vld [vmem:[#allocation20_spill] sm:$0xff]  ;;  %49 = vst.msk [vmem:[#allocation5 + $0x8] sm:$0xff] %vm31_vm1, %v6149_v15  ;;  %50 = vst.msk [vmem:[#allocation5 + $0x10] sm:$0xff] %vm31_vm1, %v6149_v15 }
  0x68   :  { %51 = vst.msk [vmem:[#allocation5 + $0x18] sm:$0xff] %vm31_vm1, %v6149_v15  ;;  %52 = vst.msk [vmem:[#allocation5 + $0x20] sm:$0xff] %vm31_vm1, %v6149_v15 }
  0x69   :  { %5383 = vmatpush3.bf16.xpose.msra.mxu0 %v5380_v62  ;;  %v600_v62 = vsub.f32 %v7022_v1, %v8809_v12  ;;  %v1942_v12 = vand.u32 4294901760, %v1941_v9  ;;  %53 = vst.msk [vmem:[#allocation5 + $0x28] sm:$0xff] %vm31_vm1, %v6149_v15  ;;  %54 = vst.msk [vmem:[#allocation5 + $0x30] sm:$0xff] %vm31_vm1, %v6149_v15 }
  0x6a   :  { %5575 = vmatpush3.bf16.xpose.msra.mxu1 %v5572_v41  ;;  %5385 = vmatprep.subr.bf16.mxu0 %v5384_v38  ;;  %v607_v41 = vsub.f32 %v7033_v13, %v606_v21  ;;  %55 = vst.msk [vmem:[#allocation5 + $0x38] sm:$0xff] %vm31_vm1, %v6149_v15  ;;  %56 = vst.msk [vmem:[#allocation5 + $0x40] sm:$0xff] %vm31_vm1, %v6149_v15 }
  0x6b   :  { %5577 = vmatprep.subr.bf16.mxu1 %v5576_v43  ;;  %v601_v26 = vand.u32 4294901760, %v600_v62  ;;  %v5584_v16 = vpack.c.bf16 %v1942_v12, %v1935_v19  ;;  %v9038_v12 = vld [vmem:[#allocation76_spill] sm:$0xff]  ;;  %v9064_v62 = vld [vmem:[#allocation27_spill] sm:$0xff]  ;;  %57 = vst.msk [vmem:[#allocation5 + $0x48] sm:$0xff] %vm31_vm1, %v6149_v15  ;;  %58 = vst.msk [vmem:[#allocation5 + $0x50] sm:$0xff] %vm31_vm1, %v6149_v15 }
  0x6c   :  { %v608_v49 = vand.u32 4294901760, %v607_v41  ;;  %v9065_v41 = vand.u32 4294901760, %v9064_v62  ;;  %v9070_v19 = vld [vmem:[#allocation31_spill] sm:$0xff]  ;;  %59 = vst.msk [vmem:[#allocation5 + $0x58] sm:$0xff] %vm31_vm1, %v6149_v15  ;;  %60 = vst.msk [vmem:[#allocation5 + $0x60] sm:$0xff] %vm31_vm1, %v6149_v15 }
  0x6d   :  { %61 = vst.msk [vmem:[#allocation5 + $0x68] sm:$0xff] %vm31_vm1, %v6149_v15  ;;  %62 = vst.msk [vmem:[#allocation5 + $0x70] sm:$0xff] %vm31_vm1, %v6149_v15 }
  0x6e   :  { %v5392_v46 = vpack.c.bf16 %v608_v49, %v601_v26  ;;  %v9068_v26 = vld [vmem:[#allocation30_spill] sm:$0xff]  ;;  %63 = vst.msk [vmem:[#allocation5 + $0x78] sm:$0xff] %vm31_vm1, %v6149_v15  ;;  %80 = vst.msk [vmem:[#allocation7] sm:$0xff] %vm31_vm1, %v6149_v15 }
  0x6f   :  { %v9069_v49 = vand.u32 4294901760, %v9068_v26  ;;  %v9080_v26 = vld [vmem:[#allocation43_spill] sm:$0xff]  ;;  %81 = vst.msk [vmem:[#allocation7 + $0x8] sm:$0xff] %vm31_vm1, %v6149_v15  ;;  %82 = vst.msk [vmem:[#allocation7 + $0x10] sm:$0xff] %vm31_vm1, %v6149_v15 }
  0x70   :  { %83 = vst.msk [vmem:[#allocation7 + $0x18] sm:$0xff] %vm31_vm1, %v6149_v15  ;;  %84 = vst.msk [vmem:[#allocation7 + $0x20] sm:$0xff] %vm31_vm1, %v6149_v15 }
  0x71   :  { %5387 = vmatpush3.bf16.xpose.msra.mxu0 %v5384_v38  ;;  %v9031_v38 = vld [vmem:[#allocation35_spill] sm:$0xff]  ;;  %85 = vst.msk [vmem:[#allocation7 + $0x28] sm:$0xff] %vm31_vm1, %v6149_v15  ;;  %86 = vst.msk [vmem:[#allocation7 + $0x30] sm:$0xff] %vm31_vm1, %v6149_v15 }
  0x72   :  { %5579 = vmatpush3.bf16.xpose.msra.mxu1 %v5576_v43  ;;  %5389 = vmatprep.subr.bf16.mxu0 %v5388_v57  ;;  %v9037_v43 = vld [vmem:[#allocation73_spill] sm:$0xff]  ;;  %87 = vst.msk [vmem:[#allocation7 + $0x38] sm:$0xff] %vm31_vm1, %v6149_v15  ;;  %88 = vst.msk [vmem:[#allocation7 + $0x40] sm:$0xff] %vm31_vm1, %v6149_v15 }
  0x73   :  { %5581 = vmatprep.subr.bf16.mxu1 %v5580_v6  ;;  %89 = vst.msk [vmem:[#allocation7 + $0x48] sm:$0xff] %vm31_vm1, %v6149_v15  ;;  %90 = vst.msk [vmem:[#allocation7 + $0x50] sm:$0xff] %vm31_vm1, %v6149_v15 }
  0x74   :  { %91 = vst.msk [vmem:[#allocation7 + $0x58] sm:$0xff] %vm31_vm1, %v6149_v15  ;;  %92 = vst.msk [vmem:[#allocation7 + $0x60] sm:$0xff] %vm31_vm1, %v6149_v15 }
  0x75   :  { %93 = vst.msk [vmem:[#allocation7 + $0x68] sm:$0xff] %vm31_vm1, %v6149_v15  ;;  %94 = vst.msk [vmem:[#allocation7 + $0x70] sm:$0xff] %vm31_vm1, %v6149_v15 }
  0x76   :  { %95 = vst.msk [vmem:[#allocation7 + $0x78] sm:$0xff] %vm31_vm1, %v6149_v15 }
  0x79   :  { %5391 = vmatpush3.bf16.xpose.msra.mxu0 %v5388_v57  ;;  %v9032_v57 = vld [vmem:[#allocation56_spill] sm:$0xff] }
  0x7a   :  { %5583 = vmatpush3.bf16.xpose.msra.mxu1 %v5580_v6  ;;  %5393 = vmatprep.subr.bf16.mxu0 %v5392_v46  ;;  %v9066_v6 = vld [vmem:[#allocation28_spill] sm:$0xff] }
  0x7b   :  { %5585 = vmatprep.subr.bf16.mxu1 %v5584_v16  ;;  %v9067_v8 = vand.u32 4294901760, %v9066_v6  ;;  %v9078_v6 = vld [vmem:[#allocation37_spill] sm:$0xff] }
  0x7d   :  { %v5460_v9 = vpack.c.bf16 %v9067_v8, %v9065_v41  ;;  %v9079_v41 = vand.u32 4294901760, %v9078_v6 }
  0x81   :  { %5395 = vmatpush3.bf16.xpose.msra.mxu0 %v5392_v46  ;;  %v9034_v46 = vld [vmem:[#allocation62_spill] sm:$0xff] }
  0x82   :  { %5587 = vmatpush3.bf16.xpose.msra.mxu1 %v5584_v16  ;;  %5397 = vmatprep.subr.bf16.mxu0 %v7063_v27  ;;  %v9033_v16 = vld [vmem:[#allocation57_spill] sm:$0xff] }
  0x83   :  { %5589 = vmatprep.subr.bf16.mxu1 %v7067_v52 }
  0x88   :  { %4749 = vmatmul.mubr.f32.vlgmr.msra.gmra.mrb[0].mxu0 %v9031_v38 }
  0x89   :  { %5399 = vmatpush3.bf16.xpose.msra.mxu0 %v7063_v27  ;;  %5085 = vmatmul.mubr.f32.vlgmr.msra.gmra.mrb[0].mxu1 %v9031_v38  ;;  %v9035_v27 = vld [vmem:[#allocation67_spill] sm:$0xff] }
  0x8a   :  { %5591 = vmatpush3.bf16.xpose.msra.mxu1 %v7067_v52  ;;  %5401 = vmatprep.subr.bf16.mxu0 %v7076_v10  ;;  %v9036_v52 = vld [vmem:[#allocation72_spill] sm:$0xff] }
  0x8b   :  { %5593 = vmatprep.subr.bf16.mxu1 %v7080_v23  ;;  %4751 = vmatprep.mubr.f32.mxu0 %v9032_v57 }
  0x8c   :  { %5087 = vmatprep.mubr.f32.mxu1 %v9032_v57  ;;  %4752 = vmatmul.mubr.f32.gmra.mrb[2].mxu0 %v9033_v16 }
  0x8d   :  { %5088 = vmatmul.mubr.f32.gmra.mrb[2].mxu1 %v9033_v16  ;;  %4754 = vmatprep.mubr.f32.mxu0 %v9034_v46 }
  0x8e   :  { %5090 = vmatprep.mubr.f32.mxu1 %v9034_v46 }
  0x90   :  { %4755 = vmatmul.mubr.f32.gmra.mrb[4].mxu0 %v9035_v27 }
  0x91   :  { %5403 = vmatpush3.bf16.xpose.msra.mxu0 %v7076_v10  ;;  %5091 = vmatmul.mubr.f32.gmra.mrb[4].mxu1 %v9035_v27  ;;  %v9039_v10 = vld [vmem:[#allocation81_spill] sm:$0xff] }
  0x92   :  { %5595 = vmatpush3.bf16.xpose.msra.mxu1 %v7080_v23  ;;  %5405 = vmatprep.subr.bf16.mxu0 %v7089_v30  ;;  %v9046_v23 = vld [vmem:[#allocation63_spill] sm:$0xff] }
  0x93   :  { %5597 = vmatprep.subr.bf16.mxu1 %v7093_v53  ;;  %4757 = vmatprep.mubr.f32.mxu0 %v9036_v52 }
  0x94   :  { %5093 = vmatprep.mubr.f32.mxu1 %v9036_v52  ;;  %4758 = vmatmul.mubr.f32.gmra.mrb[6].mxu0 %v9037_v43 }
  0x95   :  { %5094 = vmatmul.mubr.f32.gmra.mrb[6].mxu1 %v9037_v43  ;;  %4760 = vmatprep.mubr.f32.mxu0 %v9038_v12 }
  0x96   :  { %5096 = vmatprep.mubr.f32.mxu1 %v9038_v12 }
  0x98   :  { %4761 = vmatmul.mubr.f32.gmra.mrb[8].mxu0 %v9039_v10 }
  0x99   :  { %5407 = vmatpush3.bf16.xpose.msra.mxu0 %v7089_v30  ;;  %5097 = vmatmul.mubr.f32.gmra.mrb[8].mxu1 %v9039_v10  ;;  %v9044_v30 = vld [vmem:[#allocation14_spill] sm:$0xff] }
  0x9a   :  { %5599 = vmatpush3.bf16.xpose.msra.mxu1 %v7093_v53  ;;  %5409 = vmatprep.subr.bf16.mxu0 %v7099_v24  ;;  %v9040_v53 = vld [vmem:[#allocation22_spill] sm:$0xff] }
  0x9b   :  { %5601 = vmatprep.subr.bf16.mxu1 %v7106_v54  ;;  %4763 = vmatprep.mubr.f32.mxu0 %v6938_v56 }
  0x9c   :  { %5099 = vmatprep.mubr.f32.mxu1 %v6938_v56  ;;  %4764 = vmatmul.mubr.f32.gmra.mrb[10].mxu0 %v6954_v0 }
  0x9d   :  { %5100 = vmatmul.mubr.f32.gmra.mrb[10].mxu1 %v6954_v0  ;;  %4766 = vmatprep.mubr.f32.mxu0 %v6956_v20 }
  0x9e   :  { %5102 = vmatprep.mubr.f32.mxu1 %v6956_v20 }
  0xa0   :  { %4767 = vmatmul.mubr.f32.gmra.mrb[12].mxu0 %v7024_v47 }
  0xa1   :  { %5411 = vmatpush3.bf16.xpose.msra.mxu0 %v7099_v24  ;;  %5103 = vmatmul.mubr.f32.gmra.mrb[12].mxu1 %v7024_v47  ;;  %v9048_v24 = vld [vmem:[#allocation69_spill] sm:$0xff] }
  0xa2   :  { %5603 = vmatpush3.bf16.xpose.msra.mxu1 %v7106_v54  ;;  %5413 = vmatprep.subr.bf16.mxu0 %v7110_v28  ;;  %v9041_v54 = vld [vmem:[#allocation12_spill] sm:$0xff] }
  0xa3   :  { %5605 = vmatprep.subr.bf16.mxu1 %v7114_v44  ;;  %4769 = vmatprep.mubr.f32.mxu0 %v7057_v18 }
  0xa4   :  { %5105 = vmatprep.mubr.f32.mxu1 %v7057_v18  ;;  %4770 = vmatmul.mubr.f32.gmra.mrb[14].mxu0 %v7095_v17 }
  0xa5   :  { %5106 = vmatmul.mubr.f32.gmra.mrb[14].mxu1 %v7095_v17  ;;  %4804 = vmatprep.mubr.f32.mxu0 %v9040_v53 }
  0xa6   :  { %5140 = vmatprep.mubr.f32.mxu1 %v9040_v53  ;;  %v9071_v53 = vand.u32 4294901760, %v9070_v19  ;;  %v9082_v19 = vld [vmem:[#allocation71_spill] sm:$0xff] }
  0xa9   :  { %5415 = vmatpush3.bf16.xpose.msra.mxu0 %v7110_v28  ;;  %v9042_v28 = vld [vmem:[#allocation13_spill] sm:$0xff] }
  0xaa   :  { %5607 = vmatpush3.bf16.xpose.msra.mxu1 %v7114_v44  ;;  %5417 = vmatprep.subr.bf16.mxu0 %v7123_v51  ;;  %v9049_v44 = vld [vmem:[#allocation75_spill] sm:$0xff] }
  0xab   :  { %5609 = vmatprep.subr.bf16.mxu1 %v7127_v42 }
  0xb1   :  { %5419 = vmatpush3.bf16.xpose.msra.mxu0 %v7123_v51  ;;  %v9047_v51 = vld [vmem:[#allocation64_spill] sm:$0xff] }
  0xb2   :  { %5611 = vmatpush3.bf16.xpose.msra.mxu1 %v7127_v42  ;;  %5421 = vmatprep.subr.bf16.mxu0 %v7133_v45  ;;  %v9043_v42 = vld [vmem:[#allocation39_spill] sm:$0xff] }
  0xb3   :  { %5613 = vmatprep.subr.bf16.mxu1 %v7137_v2 }
  0xb9   :  { %5423 = vmatpush3.bf16.xpose.msra.mxu0 %v7133_v45  ;;  %v9045_v45 = vld [vmem:[#allocation15_spill] sm:$0xff] }
  0xba   :  { %5615 = vmatpush3.bf16.xpose.msra.mxu1 %v7137_v2  ;;  %5425 = vmatprep.subr.bf16.mxu0 %v7147_v35  ;;  %v9050_v2 = vld [vmem:[#allocation16_spill] sm:$0xff] }
  0xbb   :  { %5617 = vmatprep.subr.bf16.mxu1 %v7151_v4 }
  0xc1   :  { %5427 = vmatpush3.bf16.xpose.msra.mxu0 %v7147_v35  ;;  %v9051_v35 = vld [vmem:[#allocation17_spill] sm:$0xff] }
  0xc2   :  { %5619 = vmatpush3.bf16.xpose.msra.mxu1 %v7151_v4  ;;  %5429 = vmatprep.subr.bf16.mxu0 %v9041_v54  ;;  %v9052_v4 = vld [vmem:[#allocation88_spill] sm:$0xff] }
  0xc3   :  { %5621 = vmatprep.subr.bf16.mxu1 %v9042_v28 }
  0xc8   :  { %4805 = vmatmul.mubr.f32.vlgmr.msra.gmra.mrb[0].mxu0 %v9043_v42 }
  0xc9   :  { %5431 = vmatpush3.bf16.xpose.msra.mxu0 %v9041_v54  ;;  %5141 = vmatmul.mubr.f32.vlgmr.msra.gmra.mrb[0].mxu1 %v9043_v42  ;;  %v5652_v42 = vpack.c.bf16 %v9071_v53, %v9069_v49  ;;  %v9081_v49 = vld [vmem:[#allocation70_spill] sm:$0xff] }
  0xca   :  { %5623 = vmatpush3.bf16.xpose.msra.mxu1 %v9042_v28  ;;  %5433 = vmatprep.subr.bf16.mxu0 %v9044_v30  ;;  %v9083_v53 = vld [vmem:[#allocation78_spill] sm:$0xff] }
  0xcb   :  { %5625 = vmatprep.subr.bf16.mxu1 %v9045_v45  ;;  %4807 = vmatprep.mubr.f32.mxu0 %v9046_v23 }
  0xcc   :  { %5143 = vmatprep.mubr.f32.mxu1 %v9046_v23  ;;  %4808 = vmatmul.mubr.f32.gmra.mrb[2].mxu0 %v9047_v51  ;;  %v9072_v23 = vld [vmem:[#allocation32_spill] sm:$0xff] }
  0xcd   :  { %5144 = vmatmul.mubr.f32.gmra.mrb[2].mxu1 %v9047_v51  ;;  %4810 = vmatprep.mubr.f32.mxu0 %v9048_v24  ;;  %v9073_v51 = vand.u32 4294901760, %v9072_v23  ;;  %v9084_v23 = vld [vmem:[#allocation41_spill] sm:$0xff] }
  0xce   :  { %5146 = vmatprep.mubr.f32.mxu1 %v9048_v24  ;;  %v9074_v24 = vld [vmem:[#allocation33_spill] sm:$0xff] }
  0xd0   :  { %4811 = vmatmul.mubr.f32.gmra.mrb[4].mxu0 %v9049_v44 }
  0xd1   :  { %5435 = vmatpush3.bf16.xpose.msra.mxu0 %v9044_v30  ;;  %5147 = vmatmul.mubr.f32.gmra.mrb[4].mxu1 %v9049_v44  ;;  %v9075_v44 = vand.u32 4294901760, %v9074_v24  ;;  %v9086_v24 = vld [vmem:[#allocation42_spill] sm:$0xff] }
  0xd2   :  { %5627 = vmatpush3.bf16.xpose.msra.mxu1 %v9045_v45  ;;  %5437 = vmatprep.subr.bf16.mxu0 %v9050_v2 }
  0xd3   :  { %5629 = vmatprep.subr.bf16.mxu1 %v9051_v35  ;;  %4813 = vmatprep.mubr.f32.mxu0 %v6870_v50 }
  0xd4   :  { %5149 = vmatprep.mubr.f32.mxu1 %v6870_v50  ;;  %4814 = vmatmul.mubr.f32.gmra.mrb[6].mxu0 %v6873_v37  ;;  %v9056_v50 = vld [vmem:[#allocation26_spill] sm:$0xff] }
  0xd5   :  { %5150 = vmatmul.mubr.f32.gmra.mrb[6].mxu1 %v6873_v37  ;;  %4816 = vmatprep.mubr.f32.mxu0 %v6890_v60  ;;  %v9055_v37 = vld [vmem:[#allocation24_spill] sm:$0xff] }
  0xd6   :  { %5152 = vmatprep.mubr.f32.mxu1 %v6890_v60  ;;  %v9059_v60 = vld [vmem:[#allocation34_spill] sm:$0xff] }
  0xd8   :  { %4817 = vmatmul.mubr.f32.gmra.mrb[8].mxu0 %v9052_v4 }
  0xd9   :  { %5439 = vmatpush3.bf16.xpose.msra.mxu0 %v9050_v2  ;;  %5153 = vmatmul.mubr.f32.gmra.mrb[8].mxu1 %v9052_v4  ;;  %v5464_v4 = vpack.c.bf16 %v9075_v44, %v9073_v51  ;;  %v9085_v51 = vand.u32 4294901760, %v9084_v23  ;;  %v9087_v44 = vand.u32 4294901760, %v9086_v24  ;;  %v9096_v23 = vld [vmem:[#allocation47_spill] sm:$0xff]  ;;  %v9098_v24 = vld [vmem:[#allocation50_spill] sm:$0xff] }
  0xda   :  { %5631 = vmatpush3.bf16.xpose.msra.mxu1 %v9051_v35  ;;  %5441 = vmatprep.subr.bf16.mxu0 %v9053_v55 }
  0xdb   :  { %5633 = vmatprep.subr.bf16.mxu1 %v9054_v7  ;;  %4819 = vmatprep.mubr.f32.mxu0 %v6967_v29 }
  0xdc   :  { %5155 = vmatprep.mubr.f32.mxu1 %v6967_v29  ;;  %4820 = vmatmul.mubr.f32.gmra.mrb[10].mxu0 %v6974_v63  ;;  %v9061_v29 = vld [vmem:[#allocation40_spill] sm:$0xff] }
  0xdd   :  { %5156 = vmatmul.mubr.f32.gmra.mrb[10].mxu1 %v6974_v63  ;;  %4822 = vmatprep.mubr.f32.mxu0 %v6977_v11  ;;  %v9058_v63 = vld [vmem:[#allocation29_spill] sm:$0xff] }
  0xde   :  { %5158 = vmatprep.mubr.f32.mxu1 %v6977_v11  ;;  %v9057_v11 = vld [vmem:[#allocation25_spill] sm:$0xff] }
  0xe0   :  { %4823 = vmatmul.mubr.f32.gmra.mrb[12].mxu0 %v7054_v48 }
  0xe1   :  { %5443 = vmatpush3.bf16.xpose.msra.mxu0 %v9053_v55  ;;  %5159 = vmatmul.mubr.f32.gmra.mrb[12].mxu1 %v7054_v48  ;;  %v9062_v48 = vld [vmem:[#allocation44_spill] sm:$0xff] }
  0xe2   :  { %5635 = vmatpush3.bf16.xpose.msra.mxu1 %v9054_v7  ;;  %5445 = vmatprep.subr.bf16.mxu0 %v9055_v37 }
  0xe3   :  { %5637 = vmatprep.subr.bf16.mxu1 %v9056_v50  ;;  %4825 = vmatprep.mubr.f32.mxu0 %v7083_v3 }
  0xe4   :  { %5161 = vmatprep.mubr.f32.mxu1 %v7083_v3  ;;  %4826 = vmatmul.mubr.f32.gmra.mrb[14].mxu0 %v7119_v36  ;;  %v9060_v3 = vld [vmem:[#allocation38_spill] sm:$0xff] }
  0xe5   :  { %5162 = vmatmul.mubr.f32.gmra.mrb[14].mxu1 %v7119_v36  ;;  %4860 = vmatprep.mubr.f32.mxu0 %v9057_v11  ;;  %v9063_v36 = vld [vmem:[#allocation48_spill] sm:$0xff] }
  0xe6   :  { %5196 = vmatprep.mubr.f32.mxu1 %v9057_v11  ;;  %v9076_v11 = vld [vmem:[#allocation36_spill] sm:$0xff] }
  0xe7   :  { %v9077_v62 = vand.u32 4294901760, %v9076_v11 }
  0xe9   :  { %5447 = vmatpush3.bf16.xpose.msra.mxu0 %v9055_v37  ;;  %v5656_v8 = vpack.c.bf16 %v9079_v41, %v9077_v62  ;;  %v9090_v62 = vld [vmem:[#allocation46_spill] sm:$0xff] }
  0xea   :  { %5639 = vmatpush3.bf16.xpose.msra.mxu1 %v9056_v50  ;;  %5449 = vmatprep.subr.bf16.mxu0 %v9058_v63  ;;  %v9091_v6 = vand.u32 4294901760, %v9090_v62 }
  0xeb   :  { %5641 = vmatprep.subr.bf16.mxu1 %v9059_v60 }
  0xf1   :  { %5451 = vmatpush3.bf16.xpose.msra.mxu0 %v9058_v63 }
  0xf2   :  { %5643 = vmatpush3.bf16.xpose.msra.mxu1 %v9059_v60  ;;  %5453 = vmatprep.subr.bf16.mxu0 %v9060_v3 }
  0xf3   :  { %5645 = vmatprep.subr.bf16.mxu1 %v9061_v29 }
  0xf9   :  { %5455 = vmatpush3.bf16.xpose.msra.mxu0 %v9060_v3 }
  0xfa   :  { %5647 = vmatpush3.bf16.xpose.msra.mxu1 %v9061_v29  ;;  %5457 = vmatprep.subr.bf16.mxu0 %v9062_v48 }
  0xfb   :  { %5649 = vmatprep.subr.bf16.mxu1 %v9063_v36 }
 0x101   :  { %5459 = vmatpush3.bf16.xpose.msra.mxu0 %v9062_v48 }
 0x102   :  { %5651 = vmatpush3.bf16.xpose.msra.mxu1 %v9063_v36  ;;  %5461 = vmatprep.subr.bf16.mxu0 %v5460_v9 }
 0x103   :  { %5653 = vmatprep.subr.bf16.mxu1 %v5652_v42 }
 0x108   :  { %4861 = vmatmul.mubr.f32.vlgmr.msra.gmra.mrb[0].mxu0 %v9080_v26 }
 0x109   :  { %5463 = vmatpush3.bf16.xpose.msra.mxu0 %v5460_v9  ;;  %5197 = vmatmul.mubr.f32.vlgmr.msra.gmra.mrb[0].mxu1 %v9080_v26  ;;  %v5468_v9 = vpack.c.bf16 %v9087_v44, %v9085_v51  ;;  %v9092_v26 = vld [vmem:[#allocation80_spill] sm:$0xff]  ;;  %v9097_v51 = vand.u32 4294901760, %v9096_v23  ;;  %v9099_v44 = vand.u32 4294901760, %v9098_v24  ;;  %v9108_v23 = vld [vmem:[#allocation55_spill] sm:$0xff] }
 0x10a   :  { %5655 = vmatpush3.bf16.xpose.msra.mxu1 %v5652_v42  ;;  %5465 = vmatprep.subr.bf16.mxu0 %v5464_v4  ;;  %v9088_v42 = vld [vmem:[#allocation45_spill] sm:$0xff]  ;;  %v9110_v24 = vld [vmem:[#allocation59_spill] sm:$0xff] }
 0x10b   :  { %5657 = vmatprep.subr.bf16.mxu1 %v5656_v8  ;;  %4863 = vmatprep.mubr.f32.mxu0 %v9081_v49  ;;  %v9089_v11 = vand.u32 4294901760, %v9088_v42 }
 0x10c   :  { %5199 = vmatprep.mubr.f32.mxu1 %v9081_v49  ;;  %4864 = vmatmul.mubr.f32.gmra.mrb[2].mxu0 %v9082_v19  ;;  %v9093_v49 = vld [vmem:[#allocation83_spill] sm:$0xff] }
 0x10d   :  { %5200 = vmatmul.mubr.f32.gmra.mrb[2].mxu1 %v9082_v19  ;;  %4866 = vmatprep.mubr.f32.mxu0 %v9083_v53  ;;  %v5660_v41 = vpack.c.bf16 %v9091_v6, %v9089_v11  ;;  %v9094_v19 = vld [vmem:[#allocation84_spill] sm:$0xff]  ;;  %v9102_v11 = vld [vmem:[#allocation54_spill] sm:$0xff] }
 0x10e   :  { %5202 = vmatprep.mubr.f32.mxu1 %v9083_v53  ;;  %v9095_v53 = vld [vmem:[#allocation87_spill] sm:$0xff]  ;;  %v9103_v62 = vand.u32 4294901760, %v9102_v11 }
 0x110   :  { %4867 = vmatmul.mubr.f32.gmra.mrb[4].mxu0 %v9092_v26 }
 0x111   :  { %5467 = vmatpush3.bf16.xpose.msra.mxu0 %v5464_v4  ;;  %5203 = vmatmul.mubr.f32.gmra.mrb[4].mxu1 %v9092_v26  ;;  %v5472_v4 = vpack.c.bf16 %v9099_v44, %v9097_v51  ;;  %v9104_v26 = vld [vmem:[#allocation89_spill] sm:$0xff]  ;;  %v9109_v51 = vand.u32 4294901760, %v9108_v23  ;;  %v9111_v44 = vand.u32 4294901760, %v9110_v24  ;;  %v9120_v23 = vand.u32 4294901760, %v6904_v5 }
 0x112   :  { %5659 = vmatpush3.bf16.xpose.msra.mxu1 %v5656_v8  ;;  %5469 = vmatprep.subr.bf16.mxu0 %v5468_v9  ;;  %v9100_v8 = vld [vmem:[#allocation53_spill] sm:$0xff]  ;;  %v9125_v5 = vand.u32 4294901760, %v7012_v59 }
 0x113   :  { %5661 = vmatprep.subr.bf16.mxu1 %v5660_v41  ;;  %4869 = vmatprep.mubr.f32.mxu0 %v9093_v49  ;;  %v9101_v42 = vand.u32 4294901760, %v9100_v8 }
 0x114   :  { %5205 = vmatprep.mubr.f32.mxu1 %v9093_v49  ;;  %4870 = vmatmul.mubr.f32.gmra.mrb[6].mxu0 %v9094_v19  ;;  %v9105_v49 = vld [vmem:[#allocation92_spill] sm:$0xff] }
 0x115   :  { %5206 = vmatmul.mubr.f32.gmra.mrb[6].mxu1 %v9094_v19  ;;  %4872 = vmatprep.mubr.f32.mxu0 %v9095_v53  ;;  %v5664_v6 = vpack.c.bf16 %v9103_v62, %v9101_v42  ;;  %v9106_v19 = vld [vmem:[#allocation93_spill] sm:$0xff] }
 0x116   :  { %5208 = vmatprep.mubr.f32.mxu1 %v9095_v53  ;;  %v9107_v53 = vld [vmem:[#allocation94_spill] sm:$0xff]  ;;  %v9114_v42 = vld [vmem:[#allocation61_spill] sm:$0xff] }
 0x117   :  { %v9115_v11 = vand.u32 4294901760, %v9114_v42 }
 0x118   :  { %4873 = vmatmul.mubr.f32.gmra.mrb[8].mxu0 %v9104_v26 }
 0x119   :  { %5471 = vmatpush3.bf16.xpose.msra.mxu0 %v5468_v9  ;;  %5209 = vmatmul.mubr.f32.gmra.mrb[8].mxu1 %v9104_v26  ;;  %v5476_v9 = vpack.c.bf16 %v9111_v44, %v9109_v51  ;;  %v9116_v26 = vld [vmem:[#allocation96_spill] sm:$0xff]  ;;  %v9122_v51 = vand.u32 4294901760, %v6982_v14  ;;  %v9123_v44 = vand.u32 4294901760, %v6992_v31 }
 0x11a   :  { %5663 = vmatpush3.bf16.xpose.msra.mxu1 %v5660_v41  ;;  %5473 = vmatprep.subr.bf16.mxu0 %v5472_v4  ;;  %v9112_v41 = vld [vmem:[#allocation60_spill] sm:$0xff] }
 0x11b   :  { %5665 = vmatprep.subr.bf16.mxu1 %v5664_v6  ;;  %4875 = vmatprep.mubr.f32.mxu0 %v9105_v49  ;;  %v9113_v8 = vand.u32 4294901760, %v9112_v41  ;;  %v5484_v41 = vpack.c.bf16 %v9123_v44, %v585_v39 }
 0x11c   :  { %5211 = vmatprep.mubr.f32.mxu1 %v9105_v49  ;;  %4876 = vmatmul.mubr.f32.gmra.mrb[10].mxu0 %v9106_v19  ;;  %v9117_v49 = vld [vmem:[#allocation97_spill] sm:$0xff] }
 0x11d   :  { %5212 = vmatmul.mubr.f32.gmra.mrb[10].mxu1 %v9106_v19  ;;  %4878 = vmatprep.mubr.f32.mxu0 %v9107_v53  ;;  %v5668_v62 = vpack.c.bf16 %v9115_v11, %v9113_v8  ;;  %v9118_v19 = vld [vmem:[#allocation98_spill] sm:$0xff] }
 0x11e   :  { %5214 = vmatprep.mubr.f32.mxu1 %v9107_v53  ;;  %v9119_v53 = vand.u32 4294901760, %v6884_v61  ;;  %v9124_v61 = vand.u32 4294901760, %v6999_v22 }
 0x120   :  { %4879 = vmatmul.mubr.f32.gmra.mrb[12].mxu0 %v9116_v26  ;;  %v5676_v8 = vpack.c.bf16 %v9125_v5, %v9124_v61 }
 0x121   :  { %5475 = vmatpush3.bf16.xpose.msra.mxu0 %v5472_v4  ;;  %5215 = vmatmul.mubr.f32.gmra.mrb[12].mxu1 %v9116_v26  ;;  %v5480_v4 = vpack.c.bf16 %v9120_v23, %v9119_v53 }
 0x122   :  { %5667 = vmatpush3.bf16.xpose.msra.mxu1 %v5664_v6  ;;  %5477 = vmatprep.subr.bf16.mxu0 %v5476_v9  ;;  %v9121_v6 = vand.u32 4294901760, %v6949_v32  ;;  %v9126_v32 = vand.u32 4294901760, %v7022_v1  ;;  %v6148_v1 = vmov -1e+30  }
 0x123   :  { %5669 = vmatprep.subr.bf16.mxu1 %v5668_v62  ;;  %4881 = vmatprep.mubr.f32.mxu0 %v9117_v49  ;;  %24 = vst [vmem:[#allocation2] sm:$0x1] %v6148_v1  ;;  %33 = vst.msk [vmem:[#allocation4 + $0x8] sm:$0xff] %vm31_vm1, %v6148_v1 }
 0x124   :  { %5217 = vmatprep.mubr.f32.mxu1 %v9117_v49  ;;  %4882 = vmatmul.mubr.f32.gmra.mrb[14].mxu0 %v9118_v19  ;;  %v5672_v24 = vpack.c.bf16 %v9122_v51, %v9121_v6  ;;  %v5488_v14 = vpack.c.bf16 %v606_v21, %v9126_v32  ;;  %32 = vst.msk [vmem:[#allocation4] sm:$0xff] %vm31_vm1, %v6148_v1  ;;  %34 = vst.msk [vmem:[#allocation4 + $0x10] sm:$0xff] %vm31_vm1, %v6148_v1 }
 0x125   :  { %5218 = vmatmul.mubr.f32.gmra.mrb[14].mxu1 %v9118_v19  ;;  %4916 = vmatprep.mubr.f32.mxu0 %v9030_v34  ;;  %35 = vst.msk [vmem:[#allocation4 + $0x18] sm:$0xff] %vm31_vm1, %v6148_v1  ;;  %36 = vst.msk [vmem:[#allocation4 + $0x20] sm:$0xff] %vm31_vm1, %v6148_v1 }
 0x126   :  { %5252 = vmatprep.mubr.f32.mxu1 %v9030_v34  ;;  %37 = vst.msk [vmem:[#allocation4 + $0x28] sm:$0xff] %vm31_vm1, %v6148_v1  ;;  %38 = vst.msk [vmem:[#allocation4 + $0x30] sm:$0xff] %vm31_vm1, %v6148_v1 }
 0x127   :  { %39 = vst.msk [vmem:[#allocation4 + $0x38] sm:$0xff] %vm31_vm1, %v6148_v1  ;;  %40 = vst.msk [vmem:[#allocation4 + $0x40] sm:$0xff] %vm31_vm1, %v6148_v1 }
 0x128   :  { %41 = vst.msk [vmem:[#allocation4 + $0x48] sm:$0xff] %vm31_vm1, %v6148_v1  ;;  %42 = vst.msk [vmem:[#allocation4 + $0x50] sm:$0xff] %vm31_vm1, %v6148_v1 }
 0x129   :  { %5479 = vmatpush3.bf16.xpose.msra.mxu0 %v5476_v9  ;;  %43 = vst.msk [vmem:[#allocation4 + $0x58] sm:$0xff] %vm31_vm1, %v6148_v1  ;;  %44 = vst.msk [vmem:[#allocation4 + $0x60] sm:$0xff] %vm31_vm1, %v6148_v1 }
 0x12a   :  { %5671 = vmatpush3.bf16.xpose.msra.mxu1 %v5668_v62  ;;  %5481 = vmatprep.subr.bf16.mxu0 %v5480_v4  ;;  %45 = vst.msk [vmem:[#allocation4 + $0x68] sm:$0xff] %vm31_vm1, %v6148_v1  ;;  %46 = vst.msk [vmem:[#allocation4 + $0x70] sm:$0xff] %vm31_vm1, %v6148_v1  ;;  %v7781_v61 = vld [vmem:[#allocation4 + $0x8] sm:$0xff] }
 0x12b   :  { %5673 = vmatprep.subr.bf16.mxu1 %v5672_v24  ;;  %47 = vst.msk [vmem:[#allocation4 + $0x78] sm:$0xff] %vm31_vm1, %v6148_v1  ;;  %64 = vst.msk [vmem:[#allocation6] sm:$0xff] %vm31_vm1, %v6148_v1 }
 0x12c   :  { %65 = vst.msk [vmem:[#allocation6 + $0x8] sm:$0xff] %vm31_vm1, %v6148_v1  ;;  %66 = vst.msk [vmem:[#allocation6 + $0x10] sm:$0xff] %vm31_vm1, %v6148_v1 }
 0x12d   :  { %67 = vst.msk [vmem:[#allocation6 + $0x18] sm:$0xff] %vm31_vm1, %v6148_v1  ;;  %68 = vst.msk [vmem:[#allocation6 + $0x20] sm:$0xff] %vm31_vm1, %v6148_v1 }
 0x12e   :  { %69 = vst.msk [vmem:[#allocation6 + $0x28] sm:$0xff] %vm31_vm1, %v6148_v1  ;;  %70 = vst.msk [vmem:[#allocation6 + $0x30] sm:$0xff] %vm31_vm1, %v6148_v1 }
 0x12f   :  { %71 = vst.msk [vmem:[#allocation6 + $0x38] sm:$0xff] %vm31_vm1, %v6148_v1  ;;  %72 = vst.msk [vmem:[#allocation6 + $0x40] sm:$0xff] %vm31_vm1, %v6148_v1 }
 0x130   :  { %73 = vst.msk [vmem:[#allocation6 + $0x48] sm:$0xff] %vm31_vm1, %v6148_v1  ;;  %74 = vst.msk [vmem:[#allocation6 + $0x50] sm:$0xff] %vm31_vm1, %v6148_v1 }
 0x131   :  { %5483 = vmatpush3.bf16.xpose.msra.mxu0 %v5480_v4  ;;  %75 = vst.msk [vmem:[#allocation6 + $0x58] sm:$0xff] %vm31_vm1, %v6148_v1  ;;  %76 = vst.msk [vmem:[#allocation6 + $0x60] sm:$0xff] %vm31_vm1, %v6148_v1 }
 0x132   :  { %5675 = vmatpush3.bf16.xpose.msra.mxu1 %v5672_v24  ;;  %5485 = vmatprep.subr.bf16.mxu0 %v5484_v41  ;;  %77 = vst.msk [vmem:[#allocation6 + $0x68] sm:$0xff] %vm31_vm1, %v6148_v1  ;;  %78 = vst.msk [vmem:[#allocation6 + $0x70] sm:$0xff] %vm31_vm1, %v6148_v1  ;;  %v7765_v24 = vld [vmem:[#allocation2] sm:$0x1] }
 0x133   :  { %5677 = vmatprep.subr.bf16.mxu1 %v5676_v8  ;;  %79 = vst.msk [vmem:[#allocation6 + $0x78] sm:$0xff] %vm31_vm1, %v6148_v1  ;;  %9127 = vst [vmem:[#allocation74_spill] sm:$0xff] %v7765_v24 }
 0x139   :  { %5487 = vmatpush3.bf16.xpose.msra.mxu0 %v5484_v41 }
 0x13a   :  { %5679 = vmatpush3.bf16.xpose.msra.mxu1 %v5676_v8  ;;  %5489 = vmatprep.subr.bf16.mxu0 %v5488_v14  ;;  %v7783_v8 = vld [vmem:[#allocation6] sm:$0xff] }
 0x13b   :  { %5681 = vmatprep.subr.bf16.mxu1 %v5680_v25  ;;  %9129 = vst [vmem:[#allocation21_spill] sm:$0xff] %v7783_v8 }
 0x141   :  { %5491 = vmatpush3.bf16.xpose.msra.mxu0 %v5488_v14 }
 0x142   :  { %5683 = vmatpush3.bf16.xpose.msra.mxu1 %v5680_v25  ;;  %5493 = vmatprep.subr.bf16.mxu0 %v9041_v54  ;;  %v7788_v25 = vld [vmem:[#allocation6 + $0x8] sm:$0xff] }
 0x143   :  { %5685 = vmatprep.subr.bf16.mxu1 %v9042_v28  ;;  %9130 = vst [vmem:[#allocation35_spill] sm:$0xff] %v7788_v25 }
 0x148   :  { %4917 = vmatmul.mubr.f32.vlgmr.msra.gmra.mrb[0].mxu0 %v9031_v38 }
 0x149   :  { %5495 = vmatpush3.bf16.xpose.msra.mxu0 %v9041_v54  ;;  %5253 = vmatmul.mubr.f32.vlgmr.msra.gmra.mrb[0].mxu1 %v9031_v38 }
 0x14a   :  { %5687 = vmatpush3.bf16.xpose.msra.mxu1 %v9042_v28  ;;  %5497 = vmatprep.subr.bf16.mxu0 %v9044_v30 }
 0x14b   :  { %5689 = vmatprep.subr.bf16.mxu1 %v9045_v45  ;;  %4919 = vmatprep.mubr.f32.mxu0 %v9032_v57 }
 0x14c   :  { %5255 = vmatprep.mubr.f32.mxu1 %v9032_v57  ;;  %4920 = vmatmul.mubr.f32.gmra.mrb[2].mxu0 %v9033_v16 }
 0x14d   :  { %5256 = vmatmul.mubr.f32.gmra.mrb[2].mxu1 %v9033_v16  ;;  %4922 = vmatprep.mubr.f32.mxu0 %v9034_v46 }
 0x14e   :  { %5258 = vmatprep.mubr.f32.mxu1 %v9034_v46 }
 0x150   :  { %4923 = vmatmul.mubr.f32.gmra.mrb[4].mxu0 %v9035_v27 }
 0x151   :  { %5499 = vmatpush3.bf16.xpose.msra.mxu0 %v9044_v30  ;;  %5259 = vmatmul.mubr.f32.gmra.mrb[4].mxu1 %v9035_v27 }
 0x152   :  { %5691 = vmatpush3.bf16.xpose.msra.mxu1 %v9045_v45  ;;  %5501 = vmatprep.subr.bf16.mxu0 %v9050_v2 }
 0x153   :  { %5693 = vmatprep.subr.bf16.mxu1 %v9051_v35  ;;  %4925 = vmatprep.mubr.f32.mxu0 %v9036_v52 }
 0x154   :  { %5261 = vmatprep.mubr.f32.mxu1 %v9036_v52  ;;  %4926 = vmatmul.mubr.f32.gmra.mrb[6].mxu0 %v9037_v43 }
 0x155   :  { %5262 = vmatmul.mubr.f32.gmra.mrb[6].mxu1 %v9037_v43  ;;  %4928 = vmatprep.mubr.f32.mxu0 %v9038_v12 }
 0x156   :  { %5264 = vmatprep.mubr.f32.mxu1 %v9038_v12 }
 0x158   :  { %4929 = vmatmul.mubr.f32.gmra.mrb[8].mxu0 %v9039_v10 }
 0x159   :  { %5503 = vmatpush3.bf16.xpose.msra.mxu0 %v9050_v2  ;;  %5265 = vmatmul.mubr.f32.gmra.mrb[8].mxu1 %v9039_v10 }
 0x15a   :  { %5695 = vmatpush3.bf16.xpose.msra.mxu1 %v9051_v35  ;;  %5505 = vmatprep.subr.bf16.mxu0 %v9053_v55 }
 0x15b   :  { %5697 = vmatprep.subr.bf16.mxu1 %v9054_v7  ;;  %4931 = vmatprep.mubr.f32.mxu0 %v6938_v56 }
 0x15c   :  { %5267 = vmatprep.mubr.f32.mxu1 %v6938_v56  ;;  %4932 = vmatmul.mubr.f32.gmra.mrb[10].mxu0 %v6954_v0 }
 0x15d   :  { %5268 = vmatmul.mubr.f32.gmra.mrb[10].mxu1 %v6954_v0  ;;  %4934 = vmatprep.mubr.f32.mxu0 %v6956_v20 }
 0x15e   :  { %5270 = vmatprep.mubr.f32.mxu1 %v6956_v20 }
 0x160   :  { %4935 = vmatmul.mubr.f32.gmra.mrb[12].mxu0 %v7024_v47 }
 0x161   :  { %5507 = vmatpush3.bf16.xpose.msra.mxu0 %v9053_v55  ;;  %5271 = vmatmul.mubr.f32.gmra.mrb[12].mxu1 %v7024_v47 }
 0x162   :  { %5699 = vmatpush3.bf16.xpose.msra.mxu1 %v9054_v7  ;;  %5509 = vmatprep.subr.bf16.mxu0 %v9055_v37 }
 0x163   :  { %5701 = vmatprep.subr.bf16.mxu1 %v9056_v50  ;;  %4937 = vmatprep.mubr.f32.mxu0 %v7057_v18 }
 0x164   :  { %5273 = vmatprep.mubr.f32.mxu1 %v7057_v18  ;;  %4938 = vmatmul.mubr.f32.gmra.mrb[14].mxu0 %v7095_v17 }
 0x165   :  { %5274 = vmatmul.mubr.f32.gmra.mrb[14].mxu1 %v7095_v17  ;;  %4972 = vmatprep.mubr.f32.mxu0 %v9030_v34 }
 0x166   :  { %5308 = vmatprep.mubr.f32.mxu1 %v9030_v34 }
 0x169   :  { %5511 = vmatpush3.bf16.xpose.msra.mxu0 %v9055_v37 }
 0x16a   :  { %5703 = vmatpush3.bf16.xpose.msra.mxu1 %v9056_v50  ;;  %5513 = vmatprep.subr.bf16.mxu0 %v9058_v63 }
 0x16b   :  { %5705 = vmatprep.subr.bf16.mxu1 %v9059_v60 }
 0x171   :  { %5515 = vmatpush3.bf16.xpose.msra.mxu0 %v9058_v63 }
 0x172   :  { %5707 = vmatpush3.bf16.xpose.msra.mxu1 %v9059_v60  ;;  %5517 = vmatprep.subr.bf16.mxu0 %v9060_v3 }
 0x173   :  { %5709 = vmatprep.subr.bf16.mxu1 %v9061_v29 }
 0x179   :  { %5519 = vmatpush3.bf16.xpose.msra.mxu0 %v9060_v3 }
 0x17a   :  { %5711 = vmatpush3.bf16.xpose.msra.mxu1 %v9061_v29  ;;  %5521 = vmatprep.subr.bf16.mxu0 %v9062_v48 }
 0x17b   :  { %5713 = vmatprep.subr.bf16.mxu1 %v9063_v36 }
 0x181   :  { %5523 = vmatpush3.bf16.xpose.msra.mxu0 %v9062_v48 }
 0x182   :  { %5715 = vmatpush3.bf16.xpose.msra.mxu1 %v9063_v36 }
 0x188   :  { %4973 = vmatmul.mubr.f32.vlgmr.msra.gmra.mrb[0].mxu0 %v9031_v38 }
 0x189   :  { %5309 = vmatmul.mubr.f32.vlgmr.msra.gmra.mrb[0].mxu1 %v9031_v38  ;;  %4975 = vmatprep.mubr.f32.mxu0 %v9032_v57 }
 0x18a   :  { %5311 = vmatprep.mubr.f32.mxu1 %v9032_v57 }
 0x18c   :  { %4976 = vmatmul.mubr.f32.gmra.mrb[2].mxu0 %v9033_v16 }
 0x18d   :  { %5312 = vmatmul.mubr.f32.gmra.mrb[2].mxu1 %v9033_v16  ;;  %4978 = vmatprep.mubr.f32.mxu0 %v9034_v46 }
 0x18e   :  { %5314 = vmatprep.mubr.f32.mxu1 %v9034_v46 }
 0x190   :  { %4979 = vmatmul.mubr.f32.gmra.mrb[4].mxu0 %v9035_v27 }
 0x191   :  { %5315 = vmatmul.mubr.f32.gmra.mrb[4].mxu1 %v9035_v27  ;;  %4981 = vmatprep.mubr.f32.mxu0 %v9036_v52 }
 0x192   :  { %5317 = vmatprep.mubr.f32.mxu1 %v9036_v52 }
 0x194   :  { %4982 = vmatmul.mubr.f32.gmra.mrb[6].mxu0 %v9037_v43 }
 0x195   :  { %5318 = vmatmul.mubr.f32.gmra.mrb[6].mxu1 %v9037_v43  ;;  %4984 = vmatprep.mubr.f32.mxu0 %v9038_v12 }
 0x196   :  { %5320 = vmatprep.mubr.f32.mxu1 %v9038_v12 }
 0x198   :  { %4985 = vmatmul.mubr.f32.gmra.mrb[8].mxu0 %v9039_v10 }
 0x199   :  { %5321 = vmatmul.mubr.f32.gmra.mrb[8].mxu1 %v9039_v10  ;;  %4987 = vmatprep.mubr.f32.mxu0 %v6938_v56  ;;  %v6150_v10 = vmov 0  }
 0x19a   :  { %5323 = vmatprep.mubr.f32.mxu1 %v6938_v56  ;;  %5887 = vset.pattern.permute.xlu1 %v6150_v10 }
 0x19b   :  { %5886 = vset.pattern.permute.xlu0 %v6150_v10 }
 0x19c   :  { %4988 = vmatmul.mubr.f32.gmra.mrb[10].mxu0 %v6954_v0 }
 0x19d   :  { %5324 = vmatmul.mubr.f32.gmra.mrb[10].mxu1 %v6954_v0  ;;  %4990 = vmatprep.mubr.f32.mxu0 %v6956_v20 }
 0x19e   :  { %5326 = vmatprep.mubr.f32.mxu1 %v6956_v20 }
 0x1a0   :  { %4991 = vmatmul.mubr.f32.gmra.mrb[12].mxu0 %v7024_v47 }
 0x1a1   :  { %5327 = vmatmul.mubr.f32.gmra.mrb[12].mxu1 %v7024_v47  ;;  %4993 = vmatprep.mubr.f32.mxu0 %v7057_v18 }
 0x1a2   :  { %5329 = vmatprep.mubr.f32.mxu1 %v7057_v18 }
 0x1a4   :  { %4994 = vmatmul.mubr.f32.gmra.mrb[14].mxu0 %v7095_v17 }
 0x1a5   :  { %5330 = vmatmul.mubr.f32.gmra.mrb[14].mxu1 %v7095_v17 }
 0x25b   :  { %v7535_v56 = vpop.f32.mrb[0].mxu0 }
 0x25c   :  { %v7537_v0 = vpop.f32.mrb[0].mxu1  ;;  %2879 = vmax.xlane.f32.xlu0 %v7535_v56  ;;  %v7540_v20 = vpop.f32.mrb[1].mxu0 }
 0x25d   :  { %v7542_v31 = vpop.f32.mrb[1].mxu1 }
 0x25e   :  { %3473 = vmax.xlane.f32.xlu1 %v7542_v31 }
 0x25f   :  { %v7545_v22 = vpop.f32.mrb[2].mxu0 }
 0x260   :  { %v7547_v17 = vpop.f32.mrb[2].mxu1  ;;  %3475 = vmax.xlane.f32.xlu0 %v7537_v0  ;;  %v7550_v59 = vpop.f32.mrb[3].mxu0 }
 0x261   :  { %v7552_v47 = vpop.f32.mrb[3].mxu1 }
 0x262   :  { %2883 = vmax.xlane.f32.xlu1 %v7545_v22 }
 0x263   :  { %v7555_v13 = vpop.f32.mrb[4].mxu0 }
 0x264   :  { %v3416_v33 = vmax.f32 %v7535_v56, %v7555_v13  ;;  %v7687_v18 = vpop.f32.mrb[4].mxu1  ;;  %2877 = vmax.xlane.f32.xlu0 %v7540_v20  ;;  %v7690_v39 = vpop.f32.mrb[5].mxu0 }
 0x265   :  { %v7692_v34 = vpop.f32.mrb[5].mxu1  ;;  %v3415_v21 = vmax.f32 %v7540_v20, %v7690_v39 }
 0x266   :  { %3479 = vmax.xlane.f32.xlu1 %v7547_v17 }
 0x267   :  { %v7697_v58 = vpop.f32.mrb[6].mxu0 }
 0x268   :  { %v3418_v40 = vmax.f32 %v7545_v22, %v7697_v58  ;;  %v7701_v38 = vpop.f32.mrb[6].mxu1  ;;  %2885 = vmax.xlane.f32.xlu0 %v7690_v39  ;;  %v7704_v57 = vpop.f32.mrb[7].mxu0 }
 0x269   :  { %v7706_v16 = vpop.f32.mrb[7].mxu1  ;;  %v3417_v46 = vmax.f32 %v7550_v59, %v7704_v57 }
 0x26a   :  { %2881 = vmax.xlane.f32.xlu1 %v7550_v59 }
 0x26b   :  { %v7711_v27 = vpop.f32.mrb[8].mxu0 }
 0x26c   :  { %v3420_v52 = vmax.f32 %v3416_v33, %v7711_v27  ;;  %v7714_v43 = vpop.f32.mrb[8].mxu1  ;;  %2889 = vmax.xlane.f32.xlu0 %v7704_v57  ;;  %v7717_v12 = vpop.f32.mrb[9].mxu0  ;;  %v7796_v33 = vld [vmem:[#allocation4 + $0x18] sm:$0xff] }
 0x26d   :  { %v7719_v54 = vpop.f32.mrb[9].mxu1  ;;  %v3419_v28 = vmax.f32 %v3415_v21, %v7717_v12  ;;  %v7881_v21 = vld [vmem:[#allocation6 + $0x28] sm:$0xff] }
 0x26e   :  { %3477 = vmax.xlane.f32.xlu1 %v7552_v47  ;;  %9149 = vst [vmem:[#allocation16_spill] sm:$0xff] %v7881_v21 }
 0x26f   :  { %v7723_v30 = vpop.f32.mrb[10].mxu0 }
 0x270   :  { %v3422_v45 = vmax.f32 %v3418_v40, %v7723_v30  ;;  %v7726_v2 = vpop.f32.mrb[10].mxu1  ;;  %2893 = vmax.xlane.f32.xlu0 %v7717_v12  ;;  %v7729_v35 = vpop.f32.mrb[11].mxu0 }
 0x271   :  { %v7731_v55 = vpop.f32.mrb[11].mxu1  ;;  %v3421_v7 = vmax.f32 %v3417_v46, %v7729_v35 }
 0x272   :  { %2887 = vmax.xlane.f32.xlu1 %v7555_v13 }
 0x273   :  { %v7735_v37 = vpop.f32.mrb[12].mxu0 }
 0x274   :  { %v3424_v50 = vmax.f32 %v3420_v52, %v7735_v37  ;;  %v7738_v63 = vpop.f32.mrb[12].mxu1  ;;  %3489 = vmax.xlane.f32.xlu0 %v7719_v54  ;;  %v7741_v60 = vpop.f32.mrb[13].mxu0  ;;  %v7805_v52 = vld [vmem:[#allocation4] sm:$0xff] }
 0x275   :  { %v7743_v3 = vpop.f32.mrb[13].mxu1  ;;  %v3423_v29 = vmax.f32 %v3419_v28, %v7741_v60  ;;  %9133 = vst [vmem:[#allocation62_spill] sm:$0xff] %v7805_v52 }
 0x276   :  { %3483 = vmax.xlane.f32.xlu1 %v7687_v18 }
 0x277   :  { %v3427_v48 = vmax.f32 %v3423_v29, %v3424_v50  ;;  %v7747_v36 = vpop.f32.mrb[14].mxu0 }
 0x278   :  { %v3426_v9 = vmax.f32 %v3422_v45, %v7747_v36  ;;  %v7750_v42 = vpop.f32.mrb[14].mxu1  ;;  %2897 = vmax.xlane.f32.xlu0 %v7729_v35  ;;  %v7753_v11 = vpop.f32.mrb[15].mxu0 }
 0x279   :  { %v7755_v62 = vpop.f32.mrb[15].mxu1  ;;  %v3425_v26 = vmax.f32 %v3421_v7, %v7753_v11  ;;  %v7815_v7 = vld [vmem:[#allocation6 + $0x18] sm:$0xff] }
 0x27a   :  { %3481 = vmax.xlane.f32.xlu1 %v7692_v34  ;;  %9134 = vst [vmem:[#allocation67_spill] sm:$0xff] %v7815_v7 }
 0x27b   :  { %v3428_v49 = vmax.f32 %v3425_v26, %v3426_v9 }
 0x27c   :  { %3493 = vmax.xlane.f32.xlu0 %v7731_v55 }
 0x27d   :  { %v3429_v19 = vmax.f32 %v3427_v48, %v3428_v49  ;;  %v7822_v48 = vld [vmem:[#allocation4 + $0x20] sm:$0xff]  ;;  %v7831_v49 = vld [vmem:[#allocation4 + $0x10] sm:$0xff] }
 0x27e   :  { %2891 = vmax.xlane.f32.xlu1 %v7697_v58  ;;  %9136 = vst [vmem:[#allocation73_spill] sm:$0xff] %v7822_v48  ;;  %9138 = vst [vmem:[#allocation81_spill] sm:$0xff] %v7831_v49 }
 0x27f   :  { %v3430_v53 = vrot.slane %v3429_v19, 4 }
 0x280   :  { %2901 = vmax.xlane.f32.xlu0 %v7741_v60 }
 0x281   :  { %v3431_v23 = vmax.f32 %v3429_v19, %v3430_v53  ;;  %v7873_v19 = vld [vmem:[#allocation6 + $0x40] sm:$0xff] }
 0x282   :  { %3487 = vmax.xlane.f32.xlu1 %v7701_v38  ;;  %9147 = vst [vmem:[#allocation69_spill] sm:$0xff] %v7873_v19 }
 0x283   :  { %v3432_v4 = vrot.slane %v3431_v23, 2 }
 0x284   :  { %3497 = vmax.xlane.f32.xlu0 %v7743_v3 }
 0x285   :  { %v3433_v6 = vmax.f32 %v3431_v23, %v3432_v4  ;;  %v7840_v4 = vld [vmem:[#allocation4 + $0x30] sm:$0xff] }
 0x286   :  { %3485 = vmax.xlane.f32.xlu1 %v7706_v16  ;;  %9140 = vst [vmem:[#allocation12_spill] sm:$0xff] %v7840_v4 }
 0x287   :  { %v3434_v51 = vrot.slane %v3433_v6, 1 }
 0x288   :  { %2905 = vmax.xlane.f32.xlu0 %v7753_v11 }
 0x289   :  { %v3435_v44 = vmax.f32 %v3433_v6, %v3434_v51 }
 0x28a   :  { %2895 = vmax.xlane.f32.xlu1 %v7711_v27 }
 0x28b   :  { %v7770_v41 = vmax.f32 %v7765_v24, %v3435_v44  ;;  %v7849_v44 = vld [vmem:[#allocation6 + $0x10] sm:$0xff] }
 0x28c   :  { %3501 = vmax.xlane.f32.xlu0 %v7755_v62  ;;  %9141 = vst [vmem:[#allocation13_spill] sm:$0xff] %v7849_v44  ;;  %v7889_v24 = vld [vmem:[#allocation4 + $0x50] sm:$0xff] }
 0x28d   :  { %9128 = vst [vmem:[#allocation77_spill] sm:$0xff] %v7770_v41  ;;  %3472 = vst [vmem:[#allocation2] sm:$0x1] %v7770_v41 }
 0x28e   :  { %3491 = vmax.xlane.f32.xlu1 %v7714_v43  ;;  %9151 = vst [vmem:[#allocation88_spill] sm:$0xff] %v7889_v24 }
 0x292   :  { %2899 = vmax.xlane.f32.xlu1 %v7723_v30 }
 0x296   :  { %3495 = vmax.xlane.f32.xlu1 %v7726_v2 }
 0x29a   :  { %2903 = vmax.xlane.f32.xlu1 %v7735_v37 }
 0x29e   :  { %3499 = vmax.xlane.f32.xlu1 %v7738_v63 }
 0x2a2   :  { %2907 = vmax.xlane.f32.xlu1 %v7747_v36 }
 0x2a6   :  { %3503 = vmax.xlane.f32.xlu1 %v7750_v42 }
 0x2e9   :  { %v2880_v5 = vpop.xlane.xlu0 %2879 }
 0x2ea   :  { %v7786_v32 = vmax.f32 %v7781_v61, %v2880_v5 }
 0x2eb   :  { %v3474_v14 = vpop.xlane.xlu1 %3473 }
 0x2ec   :  { %3215 = vst.msk [vmem:[#allocation4 + $0x8] sm:$0xff] %vm31_vm1, %v7786_v32  ;;  %v7793_v1 = vmax.f32 %v7783_v8, %v3474_v14  ;;  %2948 = vperm.xlu0 %5886, %v7786_v32  }
 0x2ed   :  { %v3476_v15 = vpop.xlane.xlu0 %3475 }
 0x2ee   :  { %9131 = vst [vmem:[#allocation56_spill] sm:$0xff] %v7793_v1  ;;  %3809 = vst.msk [vmem:[#allocation6] sm:$0xff] %vm31_vm1, %v7793_v1  ;;  %v7803_v40 = vmax.f32 %v7788_v25, %v3476_v15  ;;  %v7856_v15 = vld [vmem:[#allocation4 + $0x40] sm:$0xff]  ;;  %v7970_v25 = vld [vmem:[#allocation4 + $0x48] sm:$0xff] }
 0x2ef   :  { %v2884_v46 = vpop.xlane.xlu1 %2883  ;;  %9143 = vst [vmem:[#allocation14_spill] sm:$0xff] %v7856_v15  ;;  %9168 = vst [vmem:[#allocation33_spill] sm:$0xff] %v7970_v25 }
 0x2f0   :  { %9132 = vst [vmem:[#allocation57_spill] sm:$0xff] %v7803_v40  ;;  %3810 = vst.msk [vmem:[#allocation6 + $0x8] sm:$0xff] %vm31_vm1, %v7803_v40  ;;  %v7812_v28 = vmax.f32 %v7796_v33, %v2884_v46  ;;  %3624 = vperm.xlu0 %5886, %v7803_v40   ;;  %v7961_v40 = vld [vmem:[#allocation4 + $0x70] sm:$0xff] }
 0x2f1   :  { %v2878_v45 = vpop.xlane.xlu0 %2877  ;;  %9166 = vst [vmem:[#allocation31_spill] sm:$0xff] %v7961_v40 }
 0x2f2   :  { %3217 = vst.msk [vmem:[#allocation4 + $0x18] sm:$0xff] %vm31_vm1, %v7812_v28  ;;  %v7820_v50 = vmax.f32 %v7805_v52, %v2878_v45 }
 0x2f3   :  { %v3480_v29 = vpop.xlane.xlu1 %3479 }
 0x2f4   :  { %9135 = vst [vmem:[#allocation72_spill] sm:$0xff] %v7820_v50  ;;  %3214 = vst.msk [vmem:[#allocation4] sm:$0xff] %vm31_vm1, %v7820_v50  ;;  %v7827_v9 = vmax.f32 %v7815_v7, %v3480_v29  ;;  %2958 = vperm.xlu0 %5886, %v7812_v28   ;;  %2943 = vperm.xlu1 %5887, %v7820_v50   ;;  %v7864_v29 = vld [vmem:[#allocation4 + $0x28] sm:$0xff]  ;;  %v7915_v7 = vld [vmem:[#allocation4 + $0x38] sm:$0xff] }
 0x2f5   :  { %v2886_v26 = vpop.xlane.xlu0 %2885  ;;  %9145 = vst [vmem:[#allocation63_spill] sm:$0xff] %v7864_v29  ;;  %9157 = vst [vmem:[#allocation29_spill] sm:$0xff] %v7915_v7 }
 0x2f6   :  { %9137 = vst [vmem:[#allocation76_spill] sm:$0xff] %v7827_v9  ;;  %3812 = vst.msk [vmem:[#allocation6 + $0x18] sm:$0xff] %vm31_vm1, %v7827_v9  ;;  %v7838_v53 = vmax.f32 %v7822_v48, %v2886_v26 }
 0x2f7   :  { %v2882_v23 = vpop.xlane.xlu1 %2881 }
 0x2f8   :  { %9139 = vst [vmem:[#allocation22_spill] sm:$0xff] %v7838_v53  ;;  %3218 = vst.msk [vmem:[#allocation4 + $0x20] sm:$0xff] %vm31_vm1, %v7838_v53  ;;  %v7845_v6 = vmax.f32 %v7831_v49, %v2882_v23  ;;  %3634 = vperm.xlu0 %5886, %v7827_v9   ;;  %3619 = vperm.xlu1 %5887, %v7793_v1   ;;  %v7987_v1 = vld [vmem:[#allocation6 + $0x48] sm:$0xff] }
 0x2f9   :  { %v2890_v51 = vpop.xlane.xlu0 %2889  ;;  %9172 = vst [vmem:[#allocation70_spill] sm:$0xff] %v7987_v1 }
 0x2fa   :  { %3216 = vst.msk [vmem:[#allocation4 + $0x10] sm:$0xff] %vm31_vm1, %v7845_v6  ;;  %v7854_v5 = vmax.f32 %v7840_v4, %v2890_v51  ;;  %v7950_v4 = vld [vmem:[#allocation6 + $0x30] sm:$0xff] }
 0x2fb   :  { %v3478_v14 = vpop.xlane.xlu1 %3477  ;;  %9164 = vst [vmem:[#allocation28_spill] sm:$0xff] %v7950_v4 }
 0x2fc   :  { %9142 = vst [vmem:[#allocation39_spill] sm:$0xff] %v7854_v5  ;;  %3220 = vst.msk [vmem:[#allocation4 + $0x30] sm:$0xff] %vm31_vm1, %v7854_v5  ;;  %v7861_v46 = vmax.f32 %v7849_v44, %v3478_v14  ;;  %2953 = vperm.xlu1 %5887, %v7845_v6   ;;  %v7898_v44 = vld [vmem:[#allocation6 + $0x20] sm:$0xff] }
 0x2fd   :  { %v2894_v45 = vpop.xlane.xlu0 %2893  ;;  %9153 = vst [vmem:[#allocation20_spill] sm:$0xff] %v7898_v44 }
 0x2fe   :  { %9144 = vst [vmem:[#allocation15_spill] sm:$0xff] %v7861_v46  ;;  %3811 = vst.msk [vmem:[#allocation6 + $0x10] sm:$0xff] %vm31_vm1, %v7861_v46  ;;  %v7871_v23 = vmax.f32 %v7856_v15, %v2894_v45 }
 0x2ff   :  { %v2888_v51 = vpop.xlane.xlu1 %2887 }
 0x300   :  { %9146 = vst [vmem:[#allocation64_spill] sm:$0xff] %v7871_v23  ;;  %3222 = vst.msk [vmem:[#allocation4 + $0x40] sm:$0xff] %vm31_vm1, %v7871_v23  ;;  %v7878_v14 = vmax.f32 %v7864_v29, %v2888_v51  ;;  %3629 = vperm.xlu1 %5887, %v7861_v46   ;;  %v3230_v29 = vsel %vm31_vm1, %v7820_v50, -inf }
 0x301   :  { %v3490_v10 = vpop.xlane.xlu0 %3489 }
 0x302   :  { %9148 = vst [vmem:[#allocation75_spill] sm:$0xff] %v7878_v14  ;;  %3219 = vst.msk [vmem:[#allocation4 + $0x28] sm:$0xff] %vm31_vm1, %v7878_v14  ;;  %v7886_v45 = vmax.f32 %v7873_v19, %v3490_v10  ;;  %2968 = vperm.xlu0 %5886, %v7878_v14   ;;  %v7908_v19 = vld [vmem:[#allocation6 + $0x50] sm:$0xff] }
 0x303   :  { %v3484_v26 = vpop.xlane.xlu1 %3483  ;;  %9155 = vst [vmem:[#allocation26_spill] sm:$0xff] %v7908_v19 }
 0x304   :  { %9150 = vst [vmem:[#allocation17_spill] sm:$0xff] %v7886_v45  ;;  %3817 = vst.msk [vmem:[#allocation6 + $0x40] sm:$0xff] %vm31_vm1, %v7886_v45  ;;  %v7896_v41 = vmax.f32 %v7881_v21, %v3484_v26  ;;  %v7925_v21 = vld [vmem:[#allocation4 + $0x60] sm:$0xff] }
 0x305   :  { %v2898_v46 = vpop.xlane.xlu0 %2897  ;;  %9159 = vst [vmem:[#allocation38_spill] sm:$0xff] %v7925_v21 }
 0x306   :  { %9152 = vst [vmem:[#allocation18_spill] sm:$0xff] %v7896_v41  ;;  %3814 = vst.msk [vmem:[#allocation6 + $0x28] sm:$0xff] %vm31_vm1, %v7896_v41  ;;  %v7905_v15 = vmax.f32 %v7889_v24, %v2898_v46  ;;  %3644 = vperm.xlu1 %5887, %v7896_v41  }
 0x307   :  { %v3482_v51 = vpop.xlane.xlu1 %3481 }
 0x308   :  { %9154 = vst [vmem:[#allocation24_spill] sm:$0xff] %v7905_v15  ;;  %3224 = vst.msk [vmem:[#allocation4 + $0x50] sm:$0xff] %vm31_vm1, %v7905_v15  ;;  %v7913_v26 = vmax.f32 %v7898_v44, %v3482_v51  ;;  %v7934_v44 = vld [vmem:[#allocation6 + $0x38] sm:$0xff] }
 0x309   :  { %v3494_v9 = vpop.xlane.xlu0 %3493  ;;  %9161 = vst [vmem:[#allocation44_spill] sm:$0xff] %v7934_v44 }
 0x30a   :  { %9156 = vst [vmem:[#allocation25_spill] sm:$0xff] %v7913_v26  ;;  %3813 = vst.msk [vmem:[#allocation6 + $0x20] sm:$0xff] %vm31_vm1, %v7913_v26  ;;  %v7922_v46 = vmax.f32 %v7908_v19, %v3494_v9  ;;  %2963 = vperm.xlu1 %5887, %v7838_v53   ;;  %v7943_v19 = vld [vmem:[#allocation6 + $0x60] sm:$0xff] }
 0x30b   :  { %v2892_v41 = vpop.xlane.xlu1 %2891  ;;  %9162 = vst [vmem:[#allocation48_spill] sm:$0xff] %v7943_v19 }
 0x30c   :  { %9158 = vst [vmem:[#allocation34_spill] sm:$0xff] %v7922_v46  ;;  %3819 = vst.msk [vmem:[#allocation6 + $0x50] sm:$0xff] %vm31_vm1, %v7922_v46  ;;  %v7932_v24 = vmax.f32 %v7915_v7, %v2892_v41 }
 0x30d   :  { %v2902_v10 = vpop.xlane.xlu0 %2901 }
 0x30e   :  { %9160 = vst [vmem:[#allocation40_spill] sm:$0xff] %v7932_v24  ;;  %3221 = vst.msk [vmem:[#allocation4 + $0x38] sm:$0xff] %vm31_vm1, %v7932_v24  ;;  %v7939_v9 = vmax.f32 %v7925_v21, %v2902_v10  ;;  %2978 = vperm.xlu0 %5886, %v7932_v24   ;;  %3639 = vperm.xlu1 %5887, %v7913_v26  }
 0x30f   :  { %v3488_v51 = vpop.xlane.xlu1 %3487 }
 0x310   :  { %3226 = vst.msk [vmem:[#allocation4 + $0x60] sm:$0xff] %vm31_vm1, %v7939_v9  ;;  %v7948_v41 = vmax.f32 %v7934_v44, %v3488_v51 }
 0x311   :  { %v3498_v7 = vpop.xlane.xlu0 %3497 }
 0x312   :  { %9163 = vst [vmem:[#allocation27_spill] sm:$0xff] %v7948_v41  ;;  %3816 = vst.msk [vmem:[#allocation6 + $0x38] sm:$0xff] %vm31_vm1, %v7948_v41  ;;  %v7957_v26 = vmax.f32 %v7943_v19, %v3498_v7  ;;  %2973 = vperm.xlu0 %5886, %v7854_v5   ;;  %3654 = vperm.xlu1 %5887, %v7948_v41   ;;  %v7980_v19 = vld [vmem:[#allocation6 + $0x70] sm:$0xff] }
 0x313   :  { %v3486_v21 = vpop.xlane.xlu1 %3485  ;;  %9170 = vst [vmem:[#allocation37_spill] sm:$0xff] %v7980_v19 }
 0x314   :  { %9165 = vst [vmem:[#allocation30_spill] sm:$0xff] %v7957_v26  ;;  %3821 = vst.msk [vmem:[#allocation6 + $0x60] sm:$0xff] %vm31_vm1, %v7957_v26  ;;  %v7968_v10 = vmax.f32 %v7950_v4, %v3486_v21 }
 0x315   :  { %v2906_v44 = vpop.xlane.xlu0 %2905 }
 0x316   :  { %9167 = vst [vmem:[#allocation32_spill] sm:$0xff] %v7968_v10  ;;  %3815 = vst.msk [vmem:[#allocation6 + $0x30] sm:$0xff] %vm31_vm1, %v7968_v10  ;;  %v7977_v41 = vmax.f32 %v7961_v40, %v2906_v44  ;;  %3649 = vperm.xlu1 %5887, %v7968_v10   ;;  %v8002_v10 = vld [vmem:[#allocation4 + $0x58] sm:$0xff] }
 0x317   :  { %v2896_v51 = vpop.xlane.xlu1 %2895  ;;  %9175 = vst [vmem:[#allocation41_spill] sm:$0xff] %v8002_v10 }
 0x318   :  { %9169 = vst [vmem:[#allocation36_spill] sm:$0xff] %v7977_v41  ;;  %3228 = vst.msk [vmem:[#allocation4 + $0x70] sm:$0xff] %vm31_vm1, %v7977_v41  ;;  %v7985_v21 = vmax.f32 %v7970_v25, %v2896_v51 }
 0x319   :  { %v3502_v48 = vpop.xlane.xlu0 %3501 }
 0x31a   :  { %9171 = vst [vmem:[#allocation43_spill] sm:$0xff] %v7985_v21  ;;  %3223 = vst.msk [vmem:[#allocation4 + $0x48] sm:$0xff] %vm31_vm1, %v7985_v21  ;;  %v7992_v44 = vmax.f32 %v7980_v19, %v3502_v48  ;;  %2988 = vperm.xlu0 %5886, %v7985_v21   ;;  %v8013_v19 = vld [vmem:[#allocation6 + $0x58] sm:$0xff]  ;;  %v3244_v25 = vsel %vm31_vm1, %v7985_v21, -inf  ;;  %v3254_v21 = vsel %vm31_vm1, %v7977_v41, -inf }
 0x31b   :  { %v3492_v7 = vpop.xlane.xlu1 %3491  ;;  %9177 = vst [vmem:[#allocation45_spill] sm:$0xff] %v8013_v19 }
 0x31c   :  { %9173 = vst [vmem:[#allocation71_spill] sm:$0xff] %v7992_v44  ;;  %3823 = vst.msk [vmem:[#allocation6 + $0x70] sm:$0xff] %vm31_vm1, %v7992_v44  ;;  %v8000_v51 = vmax.f32 %v7987_v1, %v3492_v7  ;;  %v8022_v1 = vld [vmem:[#allocation4 + $0x68] sm:$0xff] }
 0x31d   :  { %9179 = vst [vmem:[#allocation80_spill] sm:$0xff] %v8022_v1 }
 0x31e   :  { %9174 = vst [vmem:[#allocation78_spill] sm:$0xff] %v8000_v51  ;;  %3818 = vst.msk [vmem:[#allocation6 + $0x48] sm:$0xff] %vm31_vm1, %v8000_v51  ;;  %2983 = vperm.xlu0 %5886, %v7871_v23   ;;  %3664 = vperm.xlu1 %5887, %v8000_v51  }
 0x31f   :  { %v2900_v48 = vpop.xlane.xlu1 %2899 }
 0x320   :  { %v8011_v40 = vmax.f32 %v8002_v10, %v2900_v48 }
 0x322   :  { %9176 = vst [vmem:[#allocation42_spill] sm:$0xff] %v8011_v40  ;;  %3225 = vst.msk [vmem:[#allocation4 + $0x58] sm:$0xff] %vm31_vm1, %v8011_v40  ;;  %2998 = vperm.xlu0 %5886, %v8011_v40   ;;  %3659 = vperm.xlu1 %5887, %v7886_v45   ;;  %v8033_v45 = vld [vmem:[#allocation6 + $0x68] sm:$0xff] }
 0x323   :  { %v3496_v7 = vpop.xlane.xlu1 %3495  ;;  %9181 = vst [vmem:[#allocation84_spill] sm:$0xff] %v8033_v45 }
 0x324   :  { %v8020_v4 = vmax.f32 %v8013_v19, %v3496_v7  ;;  %v8042_v19 = vld [vmem:[#allocation4 + $0x78] sm:$0xff] }
 0x325   :  { %9183 = vst [vmem:[#allocation47_spill] sm:$0xff] %v8042_v19 }
 0x326   :  { %9178 = vst [vmem:[#allocation46_spill] sm:$0xff] %v8020_v4  ;;  %3820 = vst.msk [vmem:[#allocation6 + $0x58] sm:$0xff] %vm31_vm1, %v8020_v4  ;;  %2993 = vperm.xlu0 %5886, %v7905_v15   ;;  %3674 = vperm.xlu1 %5887, %v8020_v4  }
 0x327   :  { %v2904_v48 = vpop.xlane.xlu1 %2903 }
 0x328   :  { %v8031_v10 = vmax.f32 %v8022_v1, %v2904_v48 }
 0x32a   :  { %9180 = vst [vmem:[#allocation83_spill] sm:$0xff] %v8031_v10  ;;  %3227 = vst.msk [vmem:[#allocation4 + $0x68] sm:$0xff] %vm31_vm1, %v8031_v10  ;;  %3008 = vperm.xlu0 %5886, %v8031_v10   ;;  %3669 = vperm.xlu1 %5887, %v7922_v46   ;;  %v8053_v46 = vld [vmem:[#allocation6 + $0x78] sm:$0xff] }
 0x32b   :  { %v3500_v7 = vpop.xlane.xlu1 %3499  ;;  %9184 = vst [vmem:[#allocation50_spill] sm:$0xff] %v8053_v46 }
 0x32c   :  { %v8040_v51 = vmax.f32 %v8033_v45, %v3500_v7  ;;  %v3231_v45 = vsel %vm31_vm1, %v7786_v32, -inf }
 0x32e   :  { %9182 = vst [vmem:[#allocation87_spill] sm:$0xff] %v8040_v51  ;;  %3822 = vst.msk [vmem:[#allocation6 + $0x68] sm:$0xff] %vm31_vm1, %v8040_v51  ;;  %3003 = vperm.xlu0 %5886, %v7939_v9   ;;  %3684 = vperm.xlu1 %5887, %v8040_v51   ;;  %v3248_v51 = vsel %vm31_vm1, %v8011_v40, -inf }
 0x32f   :  { %v2908_v48 = vpop.xlane.xlu1 %2907 }
 0x330   :  { %v8051_v1 = vmax.f32 %v8042_v19, %v2908_v48  ;;  %v3240_v48 = vsel %vm31_vm1, %v7932_v24, -inf  ;;  %v3233_v19 = vsel %vm31_vm1, %v7812_v28, -inf  ;;  %v3246_v24 = vsel %vm31_vm1, %v7905_v15, -inf }
 0x332   :  { %3229 = vst.msk [vmem:[#allocation4 + $0x78] sm:$0xff] %vm31_vm1, %v8051_v1  ;;  %3013 = vperm.xlu0 %5886, %v7977_v41   ;;  %3679 = vperm.xlu1 %5887, %v7957_v26   ;;  %v3238_v26 = vsel %vm31_vm1, %v7854_v5, -inf  ;;  %v3256_v5 = vsel %vm31_vm1, %v8051_v1, -inf  ;;  %v9186_v41 = vld [vmem:[#allocation19_spill] sm:$0xff] }
 0x333   :  { %v3504_v7 = vpop.xlane.xlu1 %3503 }
 0x334   :  { %v8060_v4 = vmax.f32 %v8053_v46, %v3504_v7  ;;  %v3236_v7 = vsel %vm31_vm1, %v7878_v14, -inf  ;;  %v3232_v46 = vsel %vm31_vm1, %v7845_v6, -inf }
 0x335   :  { %v3237_v40 = vmax.f32 %v3231_v45, %v3236_v7  ;;  %v3239_v8 = vmax.f32 %v3232_v46, %v3238_v26  ;;  %v3250_v45 = vsel %vm31_vm1, %v7939_v9, -inf }
 0x336   :  { %9185 = vst [vmem:[#allocation53_spill] sm:$0xff] %v8060_v4  ;;  %3824 = vst.msk [vmem:[#allocation6 + $0x78] sm:$0xff] %vm31_vm1, %v8060_v4  ;;  %3689 = vperm.xlu1 %5887, %v7992_v44   ;;  %v3234_v44 = vsel %vm31_vm1, %v7838_v53, -inf }
 0x337   :  { %v3235_v53 = vmax.f32 %v3230_v29, %v3234_v44  ;;  %v3245_v15 = vmax.f32 %v3237_v40, %v3244_v25  ;;  %v3247_v14 = vmax.f32 %v3239_v8, %v3246_v24  ;;  %v3830_v24 = vld [vmem:[%s8627_s1 + $0x10] sm:$0xff] }
 0x338   :  { %v9187_v25 = vld [vmem:[#allocation49_spill] sm:$0xff] }
 0x339   :  { %v3255_v46 = vmax.f32 %v3247_v14, %v3254_v21  ;;  %v3846_v40 = vmul.f32 %v3830_v24, %v9187_v25  ;;  %v9189_v21 = vld [vmem:[#allocation51_spill] sm:$0xff] }
 0x33a   :  { %3694 = vperm.xlu1 %5887, %v8060_v4   ;;  %v3241_v4 = vmax.f32 %v3233_v19, %v3240_v48  ;;  %v3242_v19 = vsel %vm31_vm1, %v7871_v23, -inf  ;;  %v3252_v48 = vsel %vm31_vm1, %v8031_v10, -inf  ;;  %v3828_v10 = vld [vmem:[%s8627_s1] sm:$0xff] }
 0x33b   :  { %v3253_v26 = vmax.f32 %v3245_v15, %v3252_v48  ;;  %v3844_v29 = vmul.f32 %v3828_v10, %v9186_v41  ;;  %v6121_v15 = vld [vmem:[%s8626_s0 + $0x10] sm:$0xff]  ;;  %v6122_v10 = vld [vmem:[%s8626_s0 + $0x18] sm:$0xff] }
 0x33c   :  { %v3249_v52 = vmax.f32 %v3241_v4, %v3248_v51  ;;  %v3243_v4 = vmax.f32 %v3235_v53, %v3242_v19  ;;  %v3911_v44 = vmul.f32 %v6122_v10, %v9189_v21 }
 0x33d   :  { %v3860_v8 = vsel %vm160_vm0, %v3844_v29, 0.0 }
 0x33e   :  { %v3257_v49 = vmax.f32 %v3249_v52, %v3256_v5  ;;  %v3251_v51 = vmax.f32 %v3243_v4, %v3250_v45  ;;  %v3866_v52 = vsel %vm160_vm0, %v3846_v40, 0.0  ;;  %v3933_v48 = vsel %vm160_vm0, %v3911_v44, 0.0 }
 0x340   :  { %v3259_v7 = vmax.f32 %v3255_v46, %v3257_v49  ;;  %v3258_v50 = vmax.f32 %v3251_v51, %v3253_v26  ;;  %v9188_v49 = vld [vmem:[#allocation23_spill] sm:$0xff] }
 0x342   :  { %v3260_v23 = vmax.f32 %v3258_v50, %v3259_v7  ;;  %v6120_v50 = vld [vmem:[%s8626_s0 + $0x8] sm:$0xff] }
 0x343   :  { %v3909_v53 = vmul.f32 %v6120_v50, %v9188_v49 }
 0x345   :  { %v3927_v5 = vsel %vm160_vm0, %v3909_v53, 0.0 }
 0x351   :  { %3261 = vmax.xlane.f32.xlu0 %v3260_v23  ;;  %v3910_v23 = vmul.f32 %v6121_v15, %v9187_v25 }
 0x353   :  { %v3930_v14 = vsel %vm160_vm0, %v3910_v23, 0.0 }
 0x35e   :  { %3861 = vadd.xlane.f32.xlu1 %v3860_v8 }
 0x362   :  { %3867 = vadd.xlane.f32.xlu1 %v3866_v52 }
 0x366   :  { %3928 = vadd.xlane.f32.xlu1 %v3927_v5 }
 0x367   :  { %3018 = vperm.xlu0 %5886, %v8051_v1  }
 0x36a   :  { %3931 = vadd.xlane.f32.xlu1 %v3930_v14  ;;  %v6123_v14 = vld [vmem:[%s8626_s0] sm:$0xff] }
 0x36b   :  { %v2949_v19 = vpop.permute.xlu0 %2948  ;;  %v3908_v10 = vmul.f32 %v6123_v14, %v9186_v41 }
 0x36c   :  { %v3022_v45 = vsub.f32 %v7535_v56, %v2949_v19  ;;  %v3829_v56 = vld [vmem:[%s8627_s1 + $0x8] sm:$0xff] }
 0x36e   :  { %v3039_v4 = vmul.f32 1.442695, %v3022_v45  ;;  %3934 = vadd.xlane.f32.xlu1 %v3933_v48  ;;  %v3924_v48 = vsel %vm160_vm0, %v3908_v10, 0.0 }
 0x36f   :  { %v3625_v26 = vpop.permute.xlu0 %3624 }
 0x370   :  { %5888 = vpow2.f32 %v3039_v4  ;;  %v3832_v4 = vld [vmem:[%s8627_s1 + $0x20] sm:$0xff] }
 0x373   :  { %v2959_v46 = vpop.permute.xlu0 %2958  ;;  %v2944_v51 = vpop.permute.xlu1 %2943 }
 0x374   :  { %v3024_v7 = vsub.f32 %v7545_v22, %v2959_v46  ;;  %v3845_v22 = vmul.f32 %v3829_v56, %v9188_v49  ;;  %v3831_v49 = vld [vmem:[%s8627_s1 + $0x18] sm:$0xff]  ;;  %v3021_v56 = vsub.f32 %v7540_v20, %v2944_v51 }
 0x375   :  { %v3847_v45 = vmul.f32 %v3831_v49, %v9189_v21  ;;  %v9191_v51 = vld [vmem:[#allocation58_spill] sm:$0xff] }
 0x376   :  { %v3043_v29 = vmul.f32 1.442695, %v3024_v7 }
 0x377   :  { %v3620_v24 = vpop.permute.xlu1 %3619  ;;  %v3635_v52 = vpop.permute.xlu0 %3634 }
 0x378   :  { %5890 = vpow2.f32 %v3043_v29  ;;  %v9190_v29 = vld [vmem:[#allocation52_spill] sm:$0xff]  ;;  %v3697_v20 = vsub.f32 %v7542_v31, %v3620_v24 }
 0x37a   :  { %v8128_v8 = vpop.eup %5888 }
 0x37b   :  { %3151 = vadd.xlane.f32.xlu1 %v8128_v8  ;;  %v2954_v25 = vpop.permute.xlu1 %2953 }
 0x37c   :  { %v3023_v40 = vsub.f32 %v7550_v59, %v2954_v25  ;;  %v3863_v59 = vsel %vm160_vm0, %v3845_v22, 0.0  ;;  %v3848_v25 = vmul.f32 %v3832_v4, %v9190_v29 }
 0x37e   :  { %v3041_v50 = vmul.f32 1.442695, %v3023_v40 }
 0x37f   :  { %v8135_v53 = vpop.permute.xlu1 %3629 }
 0x380   :  { %5892 = vpow2.f32 %v3041_v50  ;;  %v3699_v4 = vsub.f32 %v7552_v47, %v8135_v53 }
 0x381   :  { %v2969_v5 = vpop.permute.xlu0 %2968 }
 0x382   :  { %v8138_v15 = vpop.eup %5890  ;;  %v3026_v23 = vsub.f32 %v7555_v13, %v2969_v5  ;;  %v3698_v13 = vsub.f32 %v7537_v0, %v3625_v26  ;;  %v3869_v0 = vsel %vm160_vm0, %v3847_v45, 0.0  ;;  %v3833_v26 = vld [vmem:[%s8627_s1 + $0x28] sm:$0xff]  ;;  %v3872_v5 = vsel %vm160_vm0, %v3848_v25, 0.0 }
 0x383   :  { %3155 = vadd.xlane.f32.xlu1 %v8138_v15 }
 0x384   :  { %v3047_v44 = vmul.f32 1.442695, %v3026_v23  ;;  %v3715_v40 = vmul.f32 1.442695, %v3698_v13  ;;  %v3037_v23 = vmul.f32 1.442695, %v3021_v56 }
 0x385   :  { %v8150_v19 = vpop.permute.xlu1 %3644  ;;  %v3713_v13 = vmul.f32 1.442695, %v3697_v20 }
 0x386   :  { %5894 = vpow2.f32 %v3047_v44  ;;  %3864 = vadd.xlane.f32.xlu0 %v3863_v59  ;;  %v3849_v59 = vmul.f32 %v3833_v26, %v9191_v51 }
 0x388   :  { %v3875_v45 = vsel %vm160_vm0, %v3849_v59, 0.0 }
 0x389   :  { %v2964_v41 = vpop.permute.xlu1 %2963 }
 0x38a   :  { %v8158_v46 = vpop.eup %5892  ;;  %v3025_v7 = vsub.f32 %v7690_v39, %v2964_v41  ;;  %3925 = vadd.xlane.f32.xlu0 %v3924_v48 }
 0x38b   :  { %3153 = vadd.xlane.f32.xlu1 %v8158_v46 }
 0x38c   :  { %v3045_v21 = vmul.f32 1.442695, %v3025_v7 }
 0x38d   :  { %v2979_v50 = vpop.permute.xlu0 %2978  ;;  %v3640_v22 = vpop.permute.xlu1 %3639 }
 0x38e   :  { %5896 = vpow2.f32 %v3045_v21  ;;  %v3028_v39 = vsub.f32 %v7697_v58, %v2979_v50  ;;  %3870 = vadd.xlane.f32.xlu0 %v3869_v0  ;;  %v3700_v58 = vsub.f32 %v7547_v17, %v3635_v52  ;;  %v3717_v52 = vmul.f32 1.442695, %v3699_v4 }
 0x38f   :  { %5898 = vpow2.f32 %v3715_v40  ;;  %v3702_v40 = vsub.f32 %v7687_v18, %v8150_v19  ;;  %v3701_v50 = vsub.f32 %v7692_v34, %v3640_v22 }
 0x390   :  { %v8172_v14 = vpop.eup %5894  ;;  %v3051_v10 = vmul.f32 1.442695, %v3028_v39  ;;  %v3719_v24 = vmul.f32 1.442695, %v3700_v58 }
 0x391   :  { %v2974_v44 = vpop.permute.xlu0 %2973  ;;  %3159 = vadd.xlane.f32.xlu1 %v8172_v14  ;;  %v3655_v48 = vpop.permute.xlu1 %3654 }
 0x392   :  { %5900 = vpow2.f32 %v3051_v10  ;;  %v3027_v49 = vsub.f32 %v7704_v57, %v2974_v44  ;;  %3873 = vadd.xlane.f32.xlu0 %v3872_v5  ;;  %v3704_v59 = vsub.f32 %v7701_v38, %v3655_v48 }
 0x393   :  { %5902 = vpow2.f32 %v3037_v23 }
 0x394   :  { %v3049_v31 = vmul.f32 1.442695, %v3027_v49  ;;  %v3727_v58 = vmul.f32 1.442695, %v3704_v59 }
 0x395   :  { %v3650_v57 = vpop.permute.xlu1 %3649 }
 0x396   :  { %5904 = vpow2.f32 %v3049_v31  ;;  %3876 = vadd.xlane.f32.xlu0 %v3875_v45 }
 0x397   :  { %5906 = vpow2.f32 %v3713_v13  ;;  %v3703_v13 = vsub.f32 %v7706_v16, %v3650_v57 }
 0x398   :  { %v8180_v41 = vpop.eup %5896  ;;  %5908 = vpow2.f32 %v3719_v24 }
 0x399   :  { %v5899_v7 = vpop.eup %5898  ;;  %v2989_v25 = vpop.permute.xlu0 %2988  ;;  %3157 = vadd.xlane.f32.xlu1 %v8180_v41  ;;  %v3725_v4 = vmul.f32 1.442695, %v3703_v13 }
 0x39a   :  { %v3030_v17 = vsub.f32 %v7711_v27, %v2989_v25  ;;  %3747 = vadd.xlane.f32.xlu0 %v5899_v7  ;;  %v3723_v27 = vmul.f32 1.442695, %v3702_v40 }
 0x39c   :  { %v8186_v56 = vpop.eup %5900  ;;  %v3055_v0 = vmul.f32 1.442695, %v3030_v17 }
 0x39d   :  { %v8188_v21 = vpop.eup %5902  ;;  %v2984_v47 = vpop.permute.xlu0 %2983  ;;  %3163 = vadd.xlane.f32.xlu1 %v8186_v56 }
 0x39e   :  { %v3665_v53 = vpop.permute.xlu1 %3664  ;;  %5910 = vpow2.f32 %v3055_v0  ;;  %v3029_v26 = vsub.f32 %v7717_v12, %v2984_v47  ;;  %3149 = vadd.xlane.f32.xlu0 %v8188_v21  ;;  %v3721_v12 = vmul.f32 1.442695, %v3701_v50 }
 0x39f   :  { %5912 = vpow2.f32 %v3717_v52 }
 0x3a0   :  { %v8194_v39 = vpop.eup %5904  ;;  %v3053_v18 = vmul.f32 1.442695, %v3029_v26 }
 0x3a1   :  { %v5907_v19 = vpop.eup %5906  ;;  %v2999_v5 = vpop.permute.xlu0 %2998  ;;  %3161 = vadd.xlane.f32.xlu1 %v8194_v39 }
 0x3a2   :  { %v3660_v23 = vpop.permute.xlu1 %3659  ;;  %5914 = vpow2.f32 %v3053_v18  ;;  %v3032_v20 = vsub.f32 %v7723_v30, %v2999_v5  ;;  %3745 = vadd.xlane.f32.xlu0 %v5907_v19  ;;  %v5909_v44 = vpop.eup %5908 }
 0x3a3   :  { %5916 = vpow2.f32 %v3723_v27 }
 0x3a4   :  { %v3059_v10 = vmul.f32 1.442695, %v3032_v20 }
 0x3a5   :  { %v2994_v49 = vpop.permute.xlu0 %2993 }
 0x3a6   :  { %v3675_v34 = vpop.permute.xlu1 %3674  ;;  %5918 = vpow2.f32 %v3059_v10  ;;  %v3031_v22 = vsub.f32 %v7729_v35, %v2994_v49  ;;  %3751 = vadd.xlane.f32.xlu0 %v5909_v44  ;;  %v3706_v35 = vsub.f32 %v7714_v43, %v3665_v53 }
 0x3a7   :  { %5920 = vpow2.f32 %v3721_v12  ;;  %v3708_v27 = vsub.f32 %v7726_v2, %v3675_v34 }
 0x3a8   :  { %v8201_v45 = vpop.eup %5910  ;;  %v3057_v30 = vmul.f32 1.442695, %v3031_v22  ;;  %v3731_v40 = vmul.f32 1.442695, %v3706_v35 }
 0x3a9   :  { %v5913_v31 = vpop.eup %5912  ;;  %v3009_v24 = vpop.permute.xlu0 %3008  ;;  %3167 = vadd.xlane.f32.xlu1 %v8201_v45 }
 0x3aa   :  { %v3670_v38 = vpop.permute.xlu1 %3669  ;;  %5922 = vpow2.f32 %v3057_v30  ;;  %v3034_v48 = vsub.f32 %v7735_v37, %v3009_v24  ;;  %3749 = vadd.xlane.f32.xlu0 %v5913_v31  ;;  %v3705_v37 = vsub.f32 %v7719_v54, %v3660_v23  ;;  %v3735_v54 = vmul.f32 1.442695, %v3708_v27 }
 0x3ab   :  { %5924 = vpow2.f32 %v3727_v58  ;;  %v3707_v19 = vsub.f32 %v7731_v55, %v3670_v38  ;;  %v3086_v27 = vsub.f32 %v7781_v61, %v7786_v32  ;;  %v9192_v61 = vld [vmem:[#allocation81_spill] sm:$0xff] }
 0x3ac   :  { %v8206_v7 = vpop.eup %5914  ;;  %v3063_v25 = vmul.f32 1.442695, %v3034_v48  ;;  %v3729_v26 = vmul.f32 1.442695, %v3705_v37 }
 0x3ad   :  { %v5917_v16 = vpop.eup %5916  ;;  %v3004_v57 = vpop.permute.xlu0 %3003  ;;  %3165 = vadd.xlane.f32.xlu1 %v8206_v7  ;;  %v3733_v59 = vmul.f32 1.442695, %v3707_v19  ;;  %v3103_v19 = vmul.f32 1.442695, %v3086_v27  ;;  %v9206_v27 = vld [vmem:[#allocation12_spill] sm:$0xff] }
 0x3ae   :  { %v3685_v17 = vpop.permute.xlu1 %3684  ;;  %5926 = vpow2.f32 %v3063_v25  ;;  %v3033_v52 = vsub.f32 %v7741_v60, %v3004_v57  ;;  %3755 = vadd.xlane.f32.xlu0 %v5917_v16 }
 0x3af   :  { %5928 = vpow2.f32 %v3725_v4  ;;  %v3710_v10 = vsub.f32 %v7738_v63, %v3685_v17 }
 0x3b0   :  { %v8211_v0 = vpop.eup %5918  ;;  %v3061_v47 = vmul.f32 1.442695, %v3033_v52 }
 0x3b1   :  { %v5921_v43 = vpop.eup %5920  ;;  %3171 = vadd.xlane.f32.xlu1 %v8211_v0  ;;  %v3739_v22 = vmul.f32 1.442695, %v3710_v10  ;;  %v3014_v48 = vpop.permute.xlu0 %3013 }
 0x3b2   :  { %v3680_v53 = vpop.permute.xlu1 %3679  ;;  %5930 = vpow2.f32 %v3061_v47  ;;  %3753 = vadd.xlane.f32.xlu0 %v5921_v43  ;;  %v3035_v17 = vsub.f32 %v7753_v11, %v3014_v48  ;;  %v9197_v48 = vld [vmem:[#allocation21_spill] sm:$0xff] }
 0x3b3   :  { %5932 = vpow2.f32 %v3731_v40 }
 0x3b4   :  { %v8215_v50 = vpop.eup %5922  ;;  %5934 = vpow2.f32 %v3729_v26  ;;  %v3065_v43 = vmul.f32 1.442695, %v3035_v17 }
 0x3b5   :  { %v5925_v60 = vpop.eup %5924  ;;  %3169 = vadd.xlane.f32.xlu1 %v8215_v50  ;;  %5936 = vpow2.f32 %v3735_v54 }
 0x3b6   :  { %v3690_v18 = vpop.permute.xlu1 %3689  ;;  %3759 = vadd.xlane.f32.xlu0 %v5925_v60 }
 0x3b7   :  { %v3711_v12 = vsub.f32 %v7755_v62, %v3690_v18  ;;  %v3709_v62 = vsub.f32 %v7743_v3, %v3680_v53 }
 0x3b8   :  { %v8219_v5 = vpop.eup %5926 }
 0x3b9   :  { %v5929_v23 = vpop.eup %5928  ;;  %3175 = vadd.xlane.f32.xlu1 %v8219_v5  ;;  %v3741_v55 = vmul.f32 1.442695, %v3711_v12 }
 0x3ba   :  { %v3695_v20 = vpop.permute.xlu1 %3694  ;;  %3757 = vadd.xlane.f32.xlu0 %v5929_v23 }
 0x3bb   :  { %v3712_v2 = vsub.f32 %v7750_v42, %v3695_v20  ;;  %v3737_v42 = vmul.f32 1.442695, %v3709_v62  ;;  %v3088_v20 = vsub.f32 %v7796_v33, %v7812_v28  ;;  %v9194_v62 = vld [vmem:[#allocation63_spill] sm:$0xff] }
 0x3bc   :  { %v8225_v44 = vpop.eup %5930 }
 0x3bd   :  { %v3743_v49 = vmul.f32 1.442695, %v3712_v2  ;;  %v5933_v34 = vpop.eup %5932  ;;  %3173 = vadd.xlane.f32.xlu1 %v8225_v44  ;;  %v3107_v12 = vmul.f32 1.442695, %v3088_v20  ;;  %v3087_v2 = vsub.f32 %v9192_v61, %v7845_v6  ;;  %v9207_v20 = vld [vmem:[#allocation67_spill] sm:$0xff] }
 0x3be   :  { %3763 = vadd.xlane.f32.xlu0 %v5933_v34  ;;  %v5935_v58 = vpop.eup %5934 }
 0x3bf   :  { %5938 = vpow2.f32 %v3743_v49  ;;  %v5937_v13 = vpop.eup %5936  ;;  %v3070_v49 = vld [vmem:[#allocation5 + $0x8] sm:$0xff]  ;;  %v3105_v34 = vmul.f32 1.442695, %v3087_v2 }
 0x3c0   :  { %5940 = vpow2.f32 %v3733_v59 }
 0x3c1   :  { %5942 = vpow2.f32 %v3741_v55 }
 0x3c2   :  { %3761 = vadd.xlane.f32.xlu0 %v5935_v58  ;;  %5944 = vpow2.f32 %v3739_v22  ;;  %v9193_v22 = vld [vmem:[#allocation75_spill] sm:$0xff] }
 0x3c3   :  { %5946 = vpow2.f32 %v3737_v42  ;;  %v3090_v58 = vsub.f32 %v9194_v62, %v9193_v22 }
 0x3c6   :  { %3767 = vadd.xlane.f32.xlu0 %v5937_v13 }
 0x3c9   :  { %v5939_v63 = vpop.eup %5938 }
 0x3ca   :  { %v5941_v30 = vpop.eup %5940  ;;  %3775 = vadd.xlane.f32.xlu1 %v5939_v63  ;;  %v3111_v63 = vmul.f32 1.442695, %v3090_v58 }
 0x3cb   :  { %3765 = vadd.xlane.f32.xlu0 %v5941_v30  ;;  %v5943_v31 = vpop.eup %5942  ;;  %v3072_v30 = vld [vmem:[#allocation5 + $0x18] sm:$0xff] }
 0x3cc   :  { %v5945_v24 = vpop.eup %5944 }
 0x3cd   :  { %v5947_v38 = vpop.eup %5946 }
 0x3ce   :  { %3773 = vadd.xlane.f32.xlu1 %v5943_v31  ;;  %v9195_v31 = vld [vmem:[#allocation72_spill] sm:$0xff] }
 0x3cf   :  { %3771 = vadd.xlane.f32.xlu0 %v5945_v24  ;;  %v9196_v24 = vld [vmem:[#allocation62_spill] sm:$0xff] }
 0x3d3   :  { %3769 = vadd.xlane.f32.xlu0 %v5947_v38  ;;  %v3085_v38 = vsub.f32 %v9196_v24, %v9195_v31  ;;  %v3071_v24 = vld [vmem:[#allocation5 + $0x10] sm:$0xff] }
 0x3de   :  { %v3262_v3 = vpop.xlane.xlu0 %3261 }
 0x3df   :  { %v3263_v4 = vrot.slane %v3262_v3, 4 }
 0x3e1   :  { %v3264_v35 = vmax.f32 %v3262_v3, %v3263_v4  ;;  %v9198_v3 = vld [vmem:[#allocation56_spill] sm:$0xff] }
 0x3e2   :  { %v9199_v4 = vsub.f32 %v9197_v48, %v9198_v3  ;;  %v9214_v48 = vld [vmem:[#allocation13_spill] sm:$0xff]  ;;  %v9215_v3 = vld [vmem:[#allocation15_spill] sm:$0xff] }
 0x3e3   :  { %v3265_v25 = vrot.slane %v3264_v35, 2 }
 0x3e5   :  { %v3266_v16 = vmax.f32 %v3264_v35, %v3265_v25  ;;  %v3569_v35 = vmul.f32 1.442695, %v9199_v4  ;;  %v9216_v4 = vsub.f32 %v9214_v48, %v9215_v3 }
 0x3e6   :  { %v3019_v57 = vpop.permute.xlu0 %3018 }
 0x3e7   :  { %v3036_v52 = vsub.f32 %v7747_v36, %v3019_v57  ;;  %v3267_v40 = vrot.slane %v3266_v16, 1  ;;  %v9201_v57 = vld [vmem:[#allocation73_spill] sm:$0xff] }
 0x3e9   :  { %v3067_v37 = vmul.f32 1.442695, %v3036_v52  ;;  %v3268_v47 = vmax.f32 %v3266_v16, %v3267_v40  ;;  %v9200_v16 = vld [vmem:[#allocation22_spill] sm:$0xff]  ;;  %v9202_v40 = vld [vmem:[#allocation35_spill] sm:$0xff] }
 0x3ea   :  { %v3089_v17 = vsub.f32 %v9201_v57, %v9200_v16 }
 0x3eb   :  { %5948 = vpow2.f32 %v3067_v37  ;;  %5876 = vpush %v3268_v47  ;;  %v3862_v53 = vpop.xlane.xlu1 %3861  ;;  %v9203_v37 = vld [vmem:[#allocation57_spill] sm:$0xff] }
 0x3ec   :  { %5950 = vpow2.f32 %v3065_v43  ;;  %v9204_v47 = vsub.f32 %v9202_v40, %v9203_v37  ;;  %v3109_v58 = vmul.f32 1.442695, %v3089_v17  ;;  %v9218_v40 = vld [vmem:[#allocation88_spill] sm:$0xff] }
 0x3ed   :  { %5952 = vpow2.f32 %v3103_v19 }
 0x3ee   :  { %5954 = vpow2.f32 %v3107_v12  ;;  %v3571_v43 = vmul.f32 1.442695, %v9204_v47  ;;  %v9208_v12 = vld [vmem:[#allocation76_spill] sm:$0xff] }
 0x3ef   :  { %v3868_v26 = vpop.xlane.xlu1 %3867  ;;  %5956 = vpow2.f32 %v3105_v34  ;;  %v9209_v61 = vsub.f32 %v9207_v20, %v9208_v12 }
 0x3f0   :  { %v4150_v18 = vmul.f32 2.0, %v3868_v26  ;;  %5958 = vpow2.f32 %v3111_v63  ;;  %v9205_v26 = vld [vmem:[#allocation39_spill] sm:$0xff]  ;;  %v4148_v63 = vmul.f32 2.0, %v3862_v53 }
 0x3f1   :  { %5960 = vpow2.f32 %v3569_v35  ;;  %v3575_v2 = vmul.f32 1.442695, %v9209_v61  ;;  %v3573_v35 = vmul.f32 1.442695, %v9216_v4  ;;  %v3074_v61 = vld [vmem:[#allocation5 + $0x28] sm:$0xff] }
 0x3f2   :  { %5962 = vpow2.f32 %v3571_v43 }
 0x3f3   :  { %v3929_v60 = vpop.xlane.xlu1 %3928 }
 0x3f5   :  { %v8233_v54 = vpop.eup %5948 }
 0x3f6   :  { %3179 = vadd.xlane.f32.xlu0 %v8233_v54  ;;  %v8238_v23 = vpop.eup %5950 }
 0x3f7   :  { %v3932_v36 = vpop.xlane.xlu1 %3931  ;;  %v5953_v10 = vpop.eup %5952 }
 0x3f8   :  { %v8236_v11 = vadd.f32 %v4150_v18, %v3932_v36  ;;  %v3134_v55 = vmul.f32 %v5953_v10, %v3070_v49  ;;  %v5955_v33 = vpop.eup %5954  ;;  %v3091_v18 = vsub.f32 %v9206_v27, %v9205_v26  ;;  %v3101_v36 = vmul.f32 1.442695, %v3085_v38  ;;  %v9210_v10 = vld [vmem:[#allocation64_spill] sm:$0xff]  ;;  %v9211_v49 = vld [vmem:[#allocation14_spill] sm:$0xff] }
 0x3f9   :  { %v3136_v25 = vmul.f32 %v5955_v33, %v3072_v30  ;;  %v3093_v34 = vsub.f32 %v9211_v49, %v9210_v10  ;;  %v5957_v62 = vpop.eup %5956 }
 0x3fa   :  { %3177 = vadd.xlane.f32.xlu0 %v8238_v23  ;;  %v3113_v38 = vmul.f32 1.442695, %v3091_v18  ;;  %5964 = vpow2.f32 %v3101_v36  ;;  %v3135_v47 = vmul.f32 %v5957_v62, %v3071_v24  ;;  %v9219_v18 = vld [vmem:[#allocation16_spill] sm:$0xff] }
 0x3fb   :  { %v8245_v59 = vpop.xlane.xlu1 %3934  ;;  %5966 = vpow2.f32 %v3575_v2  ;;  %v3117_v57 = vmul.f32 1.442695, %v3093_v34  ;;  %v9222_v34 = vld [vmem:[#allocation38_spill] sm:$0xff] }
 0x3fc   :  { %5968 = vpow2.f32 %v3109_v58 }
 0x3fd   :  { %5970 = vpow2.f32 %v3113_v38 }
 0x3fe   :  { %5972 = vpow2.f32 %v3573_v35 }
 0x3ff   :  { %5974 = vpow2.f32 %v3117_v57 }
 0x408   :  { %v3152_v42 = vpop.xlane.xlu1 %3151 }
 0x409   :  { %v3182_v13 = vadd.f32 %v3152_v42, %v3134_v55  ;;  %v9212_v42 = vld [vmem:[#allocation40_spill] sm:$0xff] }
 0x40b   :  { %3199 = vst.msk [vmem:[#allocation5 + $0x8] sm:$0xff] %vm31_vm1, %v3182_v13  ;;  %v9213_v13 = vld [vmem:[#allocation29_spill] sm:$0xff] }
 0x40c   :  { %v3092_v33 = vsub.f32 %v9213_v13, %v9212_v42  ;;  %v9223_v13 = vld [vmem:[#allocation20_spill] sm:$0xff] }
 0x40e   :  { %v3115_v53 = vmul.f32 1.442695, %v3092_v33  ;;  %v9224_v33 = vld [vmem:[#allocation25_spill] sm:$0xff] }
 0x410   :  { %v3156_v52 = vpop.xlane.xlu1 %3155  ;;  %5976 = vpow2.f32 %v3115_v53 }
 0x411   :  { %v3184_v19 = vadd.f32 %v3156_v52, %v3136_v25  ;;  %v9217_v52 = vld [vmem:[#allocation24_spill] sm:$0xff] }
 0x412   :  { %v3095_v17 = vsub.f32 %v9218_v40, %v9217_v52 }
 0x413   :  { %3201 = vst.msk [vmem:[#allocation5 + $0x18] sm:$0xff] %vm31_vm1, %v3184_v19  ;;  %v3865_v55 = vpop.xlane.xlu0 %3864  ;;  %v9220_v19 = vld [vmem:[#allocation18_spill] sm:$0xff] }
 0x414   :  { %v4149_v30 = vmul.f32 2.0, %v3865_v55  ;;  %v9221_v36 = vsub.f32 %v9219_v18, %v9220_v19  ;;  %v3121_v2 = vmul.f32 1.442695, %v3095_v17  ;;  %v3097_v55 = vsub.f32 %v9222_v34, %v7939_v9  ;;  %v9227_v18 = vld [vmem:[#allocation33_spill] sm:$0xff] }
 0x416   :  { %v8273_v25 = vadd.f32 %v4149_v30, %v3929_v60  ;;  %v3579_v20 = vmul.f32 1.442695, %v9221_v36  ;;  %v5959_v60 = vpop.eup %5958  ;;  %v3125_v53 = vmul.f32 1.442695, %v3097_v55 }
 0x417   :  { %v3926_v37 = vpop.xlane.xlu0 %3925  ;;  %v8285_v58 = vpop.eup %5960  ;;  %v3138_v38 = vmul.f32 %v5959_v60, %v3074_v61 }
 0x418   :  { %v8277_v27 = vadd.f32 %v4148_v63, %v3926_v37  ;;  %v3154_v43 = vpop.xlane.xlu1 %3153  ;;  %5978 = vpow2.f32 %v3579_v20  ;;  %v9225_v63 = vsub.f32 %v9223_v13, %v9224_v33  ;;  %v5963_v40 = vpop.eup %5962 }
 0x419   :  { %v3183_v12 = vadd.f32 %v3154_v43, %v3135_v47  ;;  %5980 = vpow2.f32 %v3121_v2  ;;  %v9226_v43 = vld [vmem:[#allocation43_spill] sm:$0xff]  ;;  %v3073_v2 = vld [vmem:[#allocation5 + $0x20] sm:$0xff] }
 0x41a   :  { %v3577_v30 = vmul.f32 1.442695, %v9225_v63  ;;  %v3094_v19 = vsub.f32 %v9227_v18, %v9226_v43 }
 0x41b   :  { %3200 = vst.msk [vmem:[#allocation5 + $0x10] sm:$0xff] %vm31_vm1, %v3183_v12  ;;  %v3871_v49 = vpop.xlane.xlu0 %3870 }
 0x41c   :  { %v4151_v62 = vmul.f32 2.0, %v3871_v49  ;;  %s5877_s23 = spop %5876  ;;  %5982 = vpow2.f32 %v3577_v30  ;;  %v3119_v30 = vmul.f32 1.442695, %v3094_v19 }
 0x41d   :  { %v8290_v24 = vstv %s5877_s23 }
 0x41e   :  { %v8293_v48 = vadd.f32 %v4151_v62, %v8245_v59  ;;  %v3160_v3 = vpop.xlane.xlu1 %3159  ;;  %v3272_v4 = vsub.f32 %v7786_v32, %v8290_v24  ;;  %v3271_v35 = vsub.f32 %v9195_v31, %v8290_v24  ;;  %v3274_v57 = vsub.f32 %v7812_v28, %v8290_v24  ;;  %v5965_v59 = vpop.eup %5964  ;;  %v9228_v31 = vld [vmem:[#allocation44_spill] sm:$0xff]  ;;  %v9229_v28 = vld [vmem:[#allocation27_spill] sm:$0xff]  ;;  %v3538_v62 = vld [vmem:[#allocation7 + $0x8] sm:$0xff] }
 0x41f   :  { %v3186_v17 = vadd.f32 %v3160_v3, %v3138_v38  ;;  %v8301_v37 = vpop.xlane.xlu0 %3873  ;;  %v3273_v47 = vsub.f32 %v7845_v6, %v8290_v24  ;;  %v8307_v20 = vpop.eup %5966  ;;  %v9230_v12 = vsub.f32 %v9228_v31, %v9229_v28  ;;  %v3276_v49 = vsub.f32 %v9193_v22, %v8290_v24  ;;  %v9232_v3 = vld [vmem:[#allocation28_spill] sm:$0xff]  ;;  %v3076_v28 = vld [vmem:[#allocation5 + $0x38] sm:$0xff] }
 0x420   :  { %v3289_v32 = vmul.f32 1.442695, %v3272_v4  ;;  %v3287_v36 = vmul.f32 1.442695, %v3271_v35  ;;  %v5969_v61 = vpop.eup %5968  ;;  %v3293_v6 = vmul.f32 1.442695, %v3274_v57  ;;  %v3275_v33 = vsub.f32 %v9200_v16, %v8290_v24 }
 0x421   :  { %v3583_v60 = vmul.f32 1.442695, %v9230_v12  ;;  %3203 = vst.msk [vmem:[#allocation5 + $0x28] sm:$0xff] %vm31_vm1, %v3186_v17  ;;  %v5971_v34 = vpop.eup %5970  ;;  %v3291_v13 = vmul.f32 1.442695, %v3273_v47  ;;  %v9233_v4 = vld [vmem:[#allocation32_spill] sm:$0xff]  ;;  %v3602_v31 = vmul.f32 %v5963_v40, %v3538_v62 }
 0x422   :  { %5984 = vpow2.f32 %v3289_v32  ;;  %v8319_v63 = vpop.eup %5972  ;;  %v9234_v35 = vsub.f32 %v9232_v3, %v9233_v4  ;;  %v9235_v57 = vld [vmem:[#allocation42_spill] sm:$0xff]  ;;  %v9236_v17 = vld [vmem:[#allocation41_spill] sm:$0xff]  ;;  %v3137_v32 = vmul.f32 %v5969_v61, %v3073_v2  ;;  %v3297_v16 = vmul.f32 1.442695, %v3276_v49  ;;  %v9241_v49 = vld [vmem:[#allocation80_spill] sm:$0xff] }
 0x423   :  { %v8315_v55 = vpop.xlane.xlu0 %3876  ;;  %5986 = vpow2.f32 %v3287_v36  ;;  %v8321_v38 = vpop.eup %5974  ;;  %v3096_v18 = vsub.f32 %v9236_v17, %v9235_v57  ;;  %v3295_v3 = vmul.f32 1.442695, %v3275_v33  ;;  %v3277_v4 = vsub.f32 %v9205_v26, %v8290_v24  ;;  %v9237_v61 = vld [vmem:[#allocation70_spill] sm:$0xff] }
 0x424   :  { %9231 = vst [vmem:[#allocation54_spill] sm:$0xff] %v8315_v55  ;;  %5988 = vpow2.f32 %v3125_v53  ;;  %v3581_v22 = vmul.f32 1.442695, %v9234_v35  ;;  %v5977_v36 = vpop.eup %5976  ;;  %v3278_v53 = vsub.f32 %v9212_v42, %v8290_v24  ;;  %v3069_v55 = vld [vmem:[#allocation5] sm:$0xff]  ;;  %v9238_v2 = vld [vmem:[#allocation78_spill] sm:$0xff] }
 0x425   :  { %5990 = vpow2.f32 %v3583_v60  ;;  %v8330_v19 = vpop.eup %5978  ;;  %v9239_v40 = vsub.f32 %v9237_v61, %v9238_v2  ;;  %v3133_v26 = vmul.f32 %v5965_v59, %v3069_v55  ;;  %v3280_v61 = vsub.f32 %v9226_v43, %v8290_v24 }
 0x426   :  { %v3158_v47 = vpop.xlane.xlu1 %3157  ;;  %5992 = vpow2.f32 %v3293_v6  ;;  %v9240_v6 = vld [vmem:[#allocation83_spill] sm:$0xff]  ;;  %v8339_v42 = vpop.eup %5980 }
 0x427   :  { %v3185_v12 = vadd.f32 %v3158_v47, %v3137_v32  ;;  %v3748_v60 = vpop.xlane.xlu0 %3747  ;;  %5994 = vpow2.f32 %v3291_v13  ;;  %v3587_v62 = vmul.f32 1.442695, %v9239_v40  ;;  %v3098_v35 = vsub.f32 %v9241_v49, %v9240_v6  ;;  %v8345_v2 = vpop.eup %5982  ;;  %v3537_v40 = vld [vmem:[#allocation7] sm:$0xff] }
 0x428   :  { %5996 = vpow2.f32 %v3119_v30  ;;  %v3778_v17 = vadd.f32 %v3748_v60, %v3602_v31  ;;  %v3123_v32 = vmul.f32 1.442695, %v3096_v18  ;;  %v3140_v13 = vmul.f32 %v5977_v36, %v3076_v28  ;;  %v3075_v30 = vld [vmem:[#allocation5 + $0x30] sm:$0xff] }
 0x429   :  { %5998 = vpow2.f32 %v3581_v22  ;;  %3202 = vst.msk [vmem:[#allocation5 + $0x20] sm:$0xff] %vm31_vm1, %v3185_v12  ;;  %v3301_v47 = vmul.f32 1.442695, %v3278_v53  ;;  %v3299_v22 = vmul.f32 1.442695, %v3277_v4  ;;  %v3279_v18 = vsub.f32 %v9210_v10, %v8290_v24  ;;  %v3973_v4 = vld [vmem:[#allocation5 + $0x8] sm:$0xff] }
 0x42a   :  { %3794 = vst.msk [vmem:[#allocation7 + $0x8] sm:$0xff] %vm31_vm1, %v3778_v17  ;;  %v3164_v33 = vpop.xlane.xlu1 %3163  ;;  %6000 = vpow2.f32 %v3297_v16  ;;  %v3127_v28 = vmul.f32 1.442695, %v3098_v35  ;;  %v3139_v43 = vmul.f32 %v5971_v34, %v3075_v30  ;;  %v3282_v16 = vsub.f32 %v9235_v57, %v8290_v24  ;;  %v3540_v17 = vld [vmem:[#allocation7 + $0x18] sm:$0xff] }
 0x42b   :  { %v3188_v31 = vadd.f32 %v3164_v33, %v3140_v13  ;;  %v3150_v60 = vpop.xlane.xlu0 %3149  ;;  %6002 = vpow2.f32 %v3295_v3  ;;  %v3601_v10 = vmul.f32 %v8285_v58, %v3537_v40  ;;  %v3305_v3 = vmul.f32 1.442695, %v3280_v61  ;;  %v3539_v40 = vld [vmem:[#allocation7 + $0x10] sm:$0xff] }
 0x42c   :  { %v5985_v36 = vpop.eup %5984  ;;  %6004 = vpow2.f32 %v3587_v62  ;;  %v3181_v59 = vadd.f32 %v3150_v60, %v3133_v26  ;;  %v3303_v34 = vmul.f32 1.442695, %v3279_v18  ;;  %v3281_v57 = vsub.f32 %v9217_v52, %v8290_v24  ;;  %v3078_v52 = vld [vmem:[#allocation5 + $0x48] sm:$0xff] }
 0x42d   :  { %v5987_v55 = vpop.eup %5986  ;;  %6006 = vpow2.f32 %v3123_v32  ;;  %3205 = vst.msk [vmem:[#allocation5 + $0x38] sm:$0xff] %vm31_vm1, %v3188_v31  ;;  %3326 = vperm.xlu1 %5887, %v5985_v36   ;;  %v3309_v58 = vmul.f32 1.442695, %v3282_v16  ;;  %v3284_v26 = vsub.f32 %v9240_v6, %v8290_v24  ;;  %v3604_v61 = vmul.f32 %v8307_v20, %v3540_v17  ;;  %v3542_v17 = vld [vmem:[#allocation7 + $0x28] sm:$0xff] }
 0x42e   :  { %v8352_v53 = vpop.eup %5988  ;;  %3198 = vst.msk [vmem:[#allocation5] sm:$0xff] %vm31_vm1, %v3181_v59  ;;  %3321 = vperm.xlu0 %5886, %v5987_v55   ;;  %v3162_v12 = vpop.xlane.xlu1 %3161  ;;  %6008 = vpow2.f32 %v3301_v47  ;;  %v3283_v18 = vsub.f32 %v7939_v9, %v8290_v24  ;;  %v3603_v9 = vmul.f32 %v8319_v63, %v3539_v40  ;;  %v3974_v40 = vld [vmem:[#allocation5 + $0x10] sm:$0xff] }
 0x42f   :  { %v8356_v62 = vpop.eup %5990  ;;  %v3187_v49 = vadd.f32 %v3162_v12, %v3139_v43  ;;  %v3746_v35 = vpop.xlane.xlu0 %3745  ;;  %6010 = vpow2.f32 %v3299_v22  ;;  %v3307_v22 = vmul.f32 1.442695, %v3281_v57  ;;  %v3313_v55 = vmul.f32 1.442695, %v3284_v26  ;;  %v3975_v43 = vld [vmem:[#allocation5 + $0x18] sm:$0xff]  ;;  %v9242_v57 = vld [vmem:[#allocation36_spill] sm:$0xff] }
 0x430   :  { %v5993_v32 = vpop.eup %5992  ;;  %6012 = vpow2.f32 %v3127_v28  ;;  %v3777_v13 = vadd.f32 %v3746_v35, %v3601_v10  ;;  %v3286_v28 = vsub.f32 %v8051_v1, %v8290_v24 }
 0x431   :  { %v5995_v33 = vpop.eup %5994  ;;  %3204 = vst.msk [vmem:[#allocation5 + $0x30] sm:$0xff] %vm31_vm1, %v3187_v49  ;;  %3336 = vperm.xlu1 %5887, %v5993_v32   ;;  %6014 = vlog2.f32 %v3973_v4  ;;  %v4053_v30 = vld [vmem:[#allocation7 + $0x8] sm:$0xff]  ;;  %v3285_v32 = vsub.f32 %v9242_v57, %v8290_v24 }
 0x432   :  { %v5997_v47 = vpop.eup %5996  ;;  %3793 = vst.msk [vmem:[#allocation7] sm:$0xff] %vm31_vm1, %v3777_v13  ;;  %3331 = vperm.xlu0 %5886, %v5995_v33   ;;  %6016 = vpow2.f32 %v3305_v3  ;;  %v3077_v3 = vld [vmem:[#allocation5 + $0x40] sm:$0xff] }
 0x433   :  { %v8365_v31 = vpop.eup %5998  ;;  %v3752_v60 = vpop.xlane.xlu0 %3751  ;;  %6018 = vpow2.f32 %v3303_v34  ;;  %v3142_v20 = vmul.f32 %v5997_v47, %v3078_v52  ;;  %v3311_v34 = vmul.f32 1.442695, %v3283_v18  ;;  %v3141_v63 = vmul.f32 %v8321_v38, %v3077_v3 }
 0x434   :  { %v6001_v6 = vpop.eup %6000  ;;  %v3780_v36 = vadd.f32 %v3752_v60, %v3604_v61  ;;  %6020 = vlog2.f32 %v4053_v30  ;;  %v3606_v52 = vmul.f32 %v8330_v19, %v3542_v17  ;;  %v3080_v60 = vld [vmem:[#allocation5 + $0x58] sm:$0xff]  ;;  %v3079_v17 = vld [vmem:[#allocation5 + $0x50] sm:$0xff] }
 0x435   :  { %v6003_v59 = vpop.eup %6002  ;;  %3346 = vperm.xlu1 %5887, %v6001_v6   ;;  %6022 = vpow2.f32 %v3309_v58  ;;  %v3972_v16 = vld [vmem:[#allocation5] sm:$0xff]  ;;  %v3317_v58 = vmul.f32 1.442695, %v3286_v28  ;;  %v3315_v28 = vmul.f32 1.442695, %v3285_v32 }
 0x436   :  { %v8371_v12 = vpop.eup %6004  ;;  %3796 = vst.msk [vmem:[#allocation7 + $0x18] sm:$0xff] %vm31_vm1, %v3780_v36  ;;  %3341 = vperm.xlu0 %5886, %v6003_v59   ;;  %v3168_v10 = vpop.xlane.xlu1 %3167  ;;  %6024 = vlog2.f32 %v3972_v16  ;;  %v3541_v36 = vld [vmem:[#allocation7 + $0x20] sm:$0xff] }
 0x437   :  { %v6007_v4 = vpop.eup %6006  ;;  %v3190_v49 = vadd.f32 %v3168_v10, %v3142_v20  ;;  %v3750_v35 = vpop.xlane.xlu0 %3749  ;;  %6026 = vpow2.f32 %v3307_v22 }
 0x438   :  { %v6009_v13 = vpop.eup %6008  ;;  %v3779_v33 = vadd.f32 %v3750_v35, %v3603_v9  ;;  %6028 = vlog2.f32 %v3975_v43  ;;  %v9244_v43 = vld [vmem:[#allocation17_spill] sm:$0xff]  ;;  %v3144_v19 = vmul.f32 %v6007_v4, %v3080_v60  ;;  %v3605_v35 = vmul.f32 %v8345_v2, %v3541_v36  ;;  %v9247_v60 = vld [vmem:[#allocation46_spill] sm:$0xff] }
 0x439   :  { %v6011_v26 = vpop.eup %6010  ;;  %3207 = vst.msk [vmem:[#allocation5 + $0x48] sm:$0xff] %vm31_vm1, %v3190_v49  ;;  %3356 = vperm.xlu1 %5887, %v6009_v13   ;;  %6030 = vpow2.f32 %v3313_v55  ;;  %v4052_v30 = vld [vmem:[#allocation7] sm:$0xff]  ;;  %v9243_v55 = vld [vmem:[#allocation69_spill] sm:$0xff]  ;;  %v3143_v2 = vmul.f32 %v8339_v42, %v3079_v17  ;;  %v3543_v42 = vld [vmem:[#allocation7 + $0x30] sm:$0xff] }
 0x43a   :  { %v8379_v47 = vpop.eup %6012  ;;  %3795 = vst.msk [vmem:[#allocation7 + $0x10] sm:$0xff] %vm31_vm1, %v3779_v33  ;;  %3351 = vperm.xlu0 %5886, %v6011_v26   ;;  %v3166_v61 = vpop.xlane.xlu1 %3165  ;;  %6032 = vlog2.f32 %v4052_v30  ;;  %v9245_v16 = vsub.f32 %v9243_v55, %v9244_v43  ;;  %v3544_v33 = vld [vmem:[#allocation7 + $0x38] sm:$0xff]  ;;  %v4101_v30 = vld [vmem:[#allocation6 + $0x8] sm:$0xff]  ;;  %v9249_v43 = vld [vmem:[#allocation26_spill] sm:$0xff] }
 0x43b   :  { %v6015_v22 = vpop.eup %6014  ;;  %v3189_v18 = vadd.f32 %v3166_v61, %v3141_v63  ;;  %v3756_v6 = vpop.xlane.xlu0 %3755  ;;  %6034 = vpow2.f32 %v3311_v34 }
 0x43c   :  { %v6017_v38 = vpop.eup %6016  ;;  %v3782_v59 = vadd.f32 %v3756_v6, %v3606_v52  ;;  %6036 = vpow2.f32 %v3317_v58  ;;  %v3585_v10 = vmul.f32 1.442695, %v9245_v16  ;;  %v3991_v58 = vmul.f32 0.6931472, %v6015_v22  ;;  %v9246_v52 = vld [vmem:[#allocation45_spill] sm:$0xff]  ;;  %v9250_v16 = vld [vmem:[#allocation34_spill] sm:$0xff] }
 0x43d   :  { %v6019_v20 = vpop.eup %6018  ;;  %3206 = vst.msk [vmem:[#allocation5 + $0x40] sm:$0xff] %vm31_vm1, %v3189_v18  ;;  %3366 = vperm.xlu1 %5887, %v6017_v38   ;;  %6038 = vlog2.f32 %v3974_v40  ;;  %v4055_v9 = vld [vmem:[#allocation7 + $0x18] sm:$0xff]  ;;  %v9248_v40 = vsub.f32 %v9246_v52, %v9247_v60 }
 0x43e   :  { %v6021_v3 = vpop.eup %6020  ;;  %3798 = vst.msk [vmem:[#allocation7 + $0x28] sm:$0xff] %vm31_vm1, %v3782_v59  ;;  %3361 = vperm.xlu0 %5886, %v6019_v20   ;;  %v3172_v49 = vpop.xlane.xlu1 %3171  ;;  %6040 = vlog2.f32 %v4055_v9  ;;  %v3082_v59 = vld [vmem:[#allocation5 + $0x68] sm:$0xff] }
 0x43f   :  { %v6023_v34 = vpop.eup %6022  ;;  %v3192_v32 = vadd.f32 %v3172_v49, %v3144_v19  ;;  %v3754_v13 = vpop.xlane.xlu0 %3753  ;;  %6042 = vpow2.f32 %v3315_v28  ;;  %v4071_v26 = vmul.f32 0.6931472, %v6021_v3  ;;  %v3591_v18 = vmul.f32 1.442695, %v9248_v40  ;;  %v4021_v20 = vld [vmem:[#allocation4 + $0x8] sm:$0xff] }
 0x440   :  { %v6025_v63 = vpop.eup %6024  ;;  %v3781_v4 = vadd.f32 %v3754_v13, %v3605_v35  ;;  %6044 = vpow2.f32 %v3585_v10  ;;  %v3608_v28 = vmul.f32 %v8356_v62, %v3544_v33  ;;  %v9251_v10 = vsub.f32 %v9249_v43, %v9250_v16  ;;  %v9255_v40 = vld [vmem:[#allocation37_spill] sm:$0xff] }
 0x441   :  { %v6027_v61 = vpop.eup %6026  ;;  %3209 = vst.msk [vmem:[#allocation5 + $0x58] sm:$0xff] %vm31_vm1, %v3192_v32  ;;  %3376 = vperm.xlu1 %5887, %v6023_v34   ;;  %v4054_v6 = vld [vmem:[#allocation7 + $0x10] sm:$0xff]  ;;  %v4117_v36 = vadd.f32 %v4101_v30, %v4071_v26  ;;  %v4037_v49 = vadd.f32 %v4021_v20, %v3991_v58  ;;  %v3989_v35 = vmul.f32 0.6931472, %v6025_v63  ;;  %v9253_v32 = vld [vmem:[#allocation53_spill] sm:$0xff]  ;;  %v3146_v33 = vmul.f32 %v8379_v47, %v3082_v59  ;;  %v3081_v30 = vld [vmem:[#allocation5 + $0x60] sm:$0xff] }
 0x442   :  { %v6029_v38 = vpop.eup %6028  ;;  %3797 = vst.msk [vmem:[#allocation7 + $0x20] sm:$0xff] %vm31_vm1, %v3781_v4  ;;  %3371 = vperm.xlu0 %5886, %v6027_v61   ;;  %v3170_v22 = vpop.xlane.xlu1 %3169  ;;  %6046 = vlog2.f32 %v4054_v6  ;;  %v3589_v19 = vmul.f32 1.442695, %v9251_v10  ;;  %v9252_v34 = vld [vmem:[#allocation50_spill] sm:$0xff]  ;;  %v9256_v58 = vld [vmem:[#allocation71_spill] sm:$0xff]  ;;  %v3546_v59 = vld [vmem:[#allocation7 + $0x48] sm:$0xff] }
 0x443   :  { %v6031_v55 = vpop.eup %6030  ;;  %v3191_v9 = vadd.f32 %v3170_v22, %v3143_v2  ;;  %v3760_v3 = vpop.xlane.xlu0 %3759  ;;  %v9254_v13 = vsub.f32 %v9252_v34, %v9253_v32  ;;  %6048 = vpow2.f32 %v3591_v18  ;;  %v4133_v52 = vadd.f32 %v4117_v36, %v4037_v49  ;;  %v4100_v18 = vld [vmem:[#allocation6] sm:$0xff] }
 0x444   :  { %v6033_v17 = vpop.eup %6032  ;;  %v3784_v4 = vadd.f32 %v3760_v3, %v3608_v28  ;;  %v9257_v63 = vsub.f32 %v9255_v40, %v9256_v58  ;;  %v3607_v22 = vmul.f32 %v8365_v31, %v3543_v42  ;;  %v4020_v28 = vld [vmem:[#allocation4] sm:$0xff]  ;;  %6050 = vpow2.f32 %v3589_v19 }
 0x445   :  { %v3599_v26 = vmul.f32 1.442695, %v9254_v13  ;;  %v6035_v62 = vpop.eup %6034  ;;  %3208 = vst.msk [vmem:[#allocation5 + $0x50] sm:$0xff] %vm31_vm1, %v3191_v9  ;;  %3386 = vperm.xlu1 %5887, %v6031_v55   ;;  %v4069_v61 = vmul.f32 0.6931472, %v6033_v17  ;;  %v4036_v43 = vadd.f32 %v4020_v28, %v3989_v35  ;;  %v9258_v10 = vld [vmem:[#allocation84_spill] sm:$0xff]  ;;  %v3145_v34 = vmul.f32 %v8352_v53, %v3081_v30 }
 0x446   :  { %v6037_v60 = vpop.eup %6036  ;;  %v3597_v2 = vmul.f32 1.442695, %v9257_v63  ;;  %3800 = vst.msk [vmem:[#allocation7 + $0x38] sm:$0xff] %vm31_vm1, %v3784_v4  ;;  %3381 = vperm.xlu0 %5886, %v6035_v62   ;;  %v3176_v6 = vpop.xlane.xlu1 %3175  ;;  %v9259_v9 = vld [vmem:[#allocation87_spill] sm:$0xff]  ;;  %v3995_v31 = vmul.f32 0.6931472, %v6029_v38  ;;  %v4181_v13 = vsub.f32 %v4133_v52, %v8273_v25  ;;  %v3610_v4 = vmul.f32 %v8371_v12, %v3546_v59 }
 0x447   :  { %v6039_v20 = vpop.eup %6038  ;;  %v3194_v55 = vadd.f32 %v3176_v6, %v3146_v33  ;;  %v3758_v47 = vpop.xlane.xlu0 %3757  ;;  %v4116_v36 = vadd.f32 %v4100_v18, %v4069_v61  ;;  %v9260_v3 = vsub.f32 %v9258_v10, %v9259_v9  ;;  %6052 = vpow2.f32 %v3599_v26  ;;  %v4103_v26 = vld [vmem:[#allocation6 + $0x18] sm:$0xff]  ;;  %v3545_v30 = vld [vmem:[#allocation7 + $0x40] sm:$0xff]  ;;  %v9262_v63 = vld [vmem:[#allocation30_spill] sm:$0xff] }
 0x448   :  { %v6041_v16 = vpop.eup %6040  ;;  %v3783_v17 = vadd.f32 %v3758_v47, %v3607_v22  ;;  %6054 = vpow2.f32 %v3597_v2  ;;  %v3993_v61 = vmul.f32 0.6931472, %v6039_v20  ;;  %v9261_v58 = vld [vmem:[#allocation48_spill] sm:$0xff]  ;;  %v4023_v6 = vld [vmem:[#allocation4 + $0x18] sm:$0xff]  ;;  %v4198_v28 = vsel %vm31_vm1, %v4181_v13, 0.0 }
 0x449   :  { %v3595_v49 = vmul.f32 1.442695, %v9260_v3  ;;  %v6043_v32 = vpop.eup %6042  ;;  %3211 = vst.msk [vmem:[#allocation5 + $0x68] sm:$0xff] %vm31_vm1, %v3194_v55  ;;  %3396 = vperm.xlu1 %5887, %v6037_v60   ;;  %v4075_v19 = vmul.f32 0.6931472, %v6041_v16  ;;  %v4132_v42 = vadd.f32 %v4116_v36, %v4036_v43  ;;  %v9263_v25 = vsub.f32 %v9261_v58, %v9262_v63  ;;  %v4102_v55 = vld [vmem:[#allocation6 + $0x10] sm:$0xff] }
 0x44a   :  { %3799 = vst.msk [vmem:[#allocation7 + $0x30] sm:$0xff] %vm31_vm1, %v3783_v17  ;;  %3391 = vperm.xlu0 %5886, %v6043_v32   ;;  %v3174_v35 = vpop.xlane.xlu1 %3173  ;;  %v6045_v62 = vpop.eup %6044  ;;  %v4039_v12 = vadd.f32 %v4023_v6, %v3995_v31  ;;  %v3548_v36 = vld [vmem:[#allocation7 + $0x58] sm:$0xff]  ;;  %v3550_v63 = vld [vmem:[#allocation7 + $0x68] sm:$0xff] }
 0x44b   :  { %v3193_v33 = vadd.f32 %v3174_v35, %v3145_v34  ;;  %v3764_v53 = vpop.xlane.xlu0 %3763  ;;  %v4119_v40 = vadd.f32 %v4103_v26, %v4075_v19  ;;  %v4180_v38 = vsub.f32 %v4132_v42, %v8277_v27  ;;  %v3593_v52 = vmul.f32 1.442695, %v9263_v25  ;;  %v4022_v27 = vld [vmem:[#allocation4 + $0x10] sm:$0xff]  ;;  %v3552_v31 = vld [vmem:[#allocation7 + $0x78] sm:$0xff] }
 0x44c   :  { %v6047_v60 = vpop.eup %6046  ;;  %6056 = vpow2.f32 %v3595_v49  ;;  %v3786_v2 = vadd.f32 %v3764_v53, %v3610_v4  ;;  %v3609_v20 = vmul.f32 %v6045_v62, %v3545_v30  ;;  %v4038_v16 = vadd.f32 %v4022_v27, %v3993_v61  ;;  %v3547_v42 = vld [vmem:[#allocation7 + $0x50] sm:$0xff] }
 0x44d   :  { %3210 = vst.msk [vmem:[#allocation5 + $0x60] sm:$0xff] %vm31_vm1, %v3193_v33  ;;  %v4073_v22 = vmul.f32 0.6931472, %v6047_v60  ;;  %v4197_v18 = vsel %vm31_vm1, %v4180_v38, 0.0  ;;  %v6049_v59 = vpop.eup %6048  ;;  %v4135_v9 = vadd.f32 %v4119_v40, %v4039_v12  ;;  %6058 = vpow2.f32 %v3593_v52  ;;  %v3551_v40 = vld [vmem:[#allocation7 + $0x70] sm:$0xff] }
 0x44e   :  { %3802 = vst.msk [vmem:[#allocation7 + $0x48] sm:$0xff] %vm31_vm1, %v3786_v2  ;;  %v4199_v47 = vadd.f32 %v4198_v28, %v4197_v18  ;;  %v6051_v49 = vpop.eup %6050  ;;  %v3612_v32 = vmul.f32 %v6049_v59, %v3548_v36  ;;  %v3549_v28 = vld [vmem:[#allocation7 + $0x60] sm:$0xff] }
 0x44f   :  { %v3762_v43 = vpop.xlane.xlu0 %3761  ;;  %v4118_v10 = vadd.f32 %v4102_v55, %v4073_v22  ;;  %v4183_v35 = vsub.f32 %v4135_v9, %v8293_v48  ;;  %v3611_v61 = vmul.f32 %v6051_v49, %v3547_v42  ;;  %v9265_v9 = vld [vmem:[#allocation66_spill] sm:$0xff]  ;;  %v6124_v49 = vld [vmem:[%s8626_s0 + $0x20] sm:$0xff] }
 0x450   :  { %v3785_v3 = vadd.f32 %v3762_v43, %v3609_v20  ;;  %v9264_v43 = vld [vmem:[#allocation65_spill] sm:$0xff] }
 0x451   :  { %v4134_v17 = vadd.f32 %v4118_v10, %v4038_v16  ;;  %v6053_v34 = vpop.eup %6052  ;;  %v4202_v25 = vsel %vm31_vm1, %v4183_v35, 0.0  ;;  %v3835_v16 = vld [vmem:[%s8627_s1 + $0x38] sm:$0xff] }
 0x452   :  { %3801 = vst.msk [vmem:[#allocation7 + $0x40] sm:$0xff] %vm31_vm1, %v3785_v3  ;;  %v6055_v4 = vpop.eup %6054  ;;  %v3616_v62 = vmul.f32 %v6053_v34, %v3552_v31  ;;  %v3851_v3 = vmul.f32 %v3835_v16, %v9265_v9  ;;  %v3836_v34 = vld [vmem:[%s8627_s1 + $0x40] sm:$0xff]  ;;  %v6129_v16 = vld [vmem:[%s8626_s0 + $0x48] sm:$0xff] }
 0x453   :  { %v3768_v19 = vpop.xlane.xlu0 %3767  ;;  %v4182_v13 = vsub.f32 %v4134_v17, %v8236_v11  ;;  %v3615_v48 = vmul.f32 %v6055_v4, %v3551_v40  ;;  %v3912_v17 = vmul.f32 %v6124_v49, %v9190_v29  ;;  %v3837_v29 = vld [vmem:[%s8627_s1 + $0x48] sm:$0xff]  ;;  %v9267_v4 = vld [vmem:[#allocation47_spill] sm:$0xff]  ;;  %v3838_v40 = vld [vmem:[%s8627_s1 + $0x50] sm:$0xff] }
 0x454   :  { %v3788_v26 = vadd.f32 %v3768_v19, %v3612_v32  ;;  %v3881_v32 = vsel %vm160_vm0, %v3851_v3, 0.0  ;;  %v9266_v19 = vld [vmem:[#allocation68_spill] sm:$0xff] }
 0x455   :  { %v4200_v33 = vsel %vm31_vm1, %v4182_v13, 0.0  ;;  %v3936_v31 = vsel %vm160_vm0, %v3912_v17, 0.0  ;;  %v3852_v42 = vmul.f32 %v3836_v34, %v9266_v19  ;;  %v6125_v13 = vld [vmem:[%s8626_s0 + $0x28] sm:$0xff]  ;;  %v3084_v34 = vld [vmem:[#allocation5 + $0x78] sm:$0xff] }
 0x456   :  { %v6057_v53 = vpop.eup %6056  ;;  %3804 = vst.msk [vmem:[#allocation7 + $0x58] sm:$0xff] %vm31_vm1, %v3788_v26  ;;  %v4201_v38 = vadd.f32 %v4200_v33, %v4199_v47  ;;  %v3834_v47 = vld [vmem:[%s8627_s1 + $0x30] sm:$0xff]  ;;  %v3913_v35 = vmul.f32 %v6125_v13, %v9191_v51  ;;  %v3100_v26 = vsub.f32 %v9267_v4, %v8051_v1  ;;  %v9269_v1 = vld [vmem:[#allocation31_spill] sm:$0xff] }
 0x457   :  { %v3776_v30 = vpop.xlane.xlu1 %3775  ;;  %v3614_v6 = vmul.f32 %v6057_v53, %v3550_v63  ;;  %v6059_v12 = vpop.eup %6058  ;;  %v3850_v36 = vmul.f32 %v3834_v47, %v9264_v43  ;;  %v9268_v53 = vld [vmem:[#allocation79_spill] sm:$0xff]  ;;  %v3842_v13 = vld [vmem:[%s8627_s1 + $0x70] sm:$0xff] }
 0x458   :  { %v3792_v60 = vadd.f32 %v3776_v30, %v3616_v62  ;;  %v3766_v58 = vpop.xlane.xlu0 %3765  ;;  %v8431_v52 = vadd.f32 %v4202_v25, %v4201_v38  ;;  %v3613_v27 = vmul.f32 %v6059_v12, %v3549_v28  ;;  %v3884_v62 = vsel %vm160_vm0, %v3852_v42, 0.0  ;;  %v9270_v25 = vld [vmem:[#allocation82_spill] sm:$0xff] }
 0x459   :  { %v3787_v11 = vadd.f32 %v3766_v58, %v3611_v61  ;;  %v3878_v10 = vsel %vm160_vm0, %v3850_v36, 0.0  ;;  %v3939_v33 = vsel %vm160_vm0, %v3913_v35, 0.0  ;;  %v3853_v30 = vmul.f32 %v3837_v29, %v9268_v53  ;;  %v6126_v61 = vld [vmem:[%s8626_s0 + $0x30] sm:$0xff] }
 0x45a   :  { %3808 = vst.msk [vmem:[#allocation7 + $0x78] sm:$0xff] %vm31_vm1, %v3792_v60  ;;  %v3914_v51 = vmul.f32 %v6126_v61, %v9264_v43  ;;  %v3099_v38 = vsub.f32 %v9269_v1, %v9242_v57  ;;  %v3131_v60 = vmul.f32 1.442695, %v3100_v26  ;;  %v9272_v43 = vld [vmem:[#allocation86_spill] sm:$0xff] }
 0x45b   :  { %3803 = vst.msk [vmem:[#allocation7 + $0x50] sm:$0xff] %vm31_vm1, %v3787_v11  ;;  %v3774_v2 = vpop.xlane.xlu1 %3773  ;;  %v3887_v58 = vsel %vm160_vm0, %v3853_v30, 0.0  ;;  %v3854_v11 = vmul.f32 %v3838_v40, %v9270_v25  ;;  %v6131_v30 = vld [vmem:[%s8626_s0 + $0x58] sm:$0xff] }
 0x45c   :  { %v3791_v22 = vadd.f32 %v3774_v2, %v3615_v48  ;;  %v3772_v18 = vpop.xlane.xlu0 %3771  ;;  %v3942_v63 = vsel %vm160_vm0, %v3914_v51, 0.0  ;;  %v6127_v48 = vld [vmem:[%s8626_s0 + $0x38] sm:$0xff]  ;;  %v3129_v57 = vmul.f32 1.442695, %v3099_v38  ;;  %6060 = vpow2.f32 %v3131_v60 }
 0x45d   :  { %v3790_v20 = vadd.f32 %v3772_v18, %v3614_v6  ;;  %v3915_v2 = vmul.f32 %v6127_v48, %v9265_v9  ;;  %v3839_v6 = vld [vmem:[%s8627_s1 + $0x58] sm:$0xff]  ;;  %v3890_v12 = vsel %vm160_vm0, %v3854_v11, 0.0  ;;  %v9271_v18 = vld [vmem:[#allocation85_spill] sm:$0xff]  ;;  %v6132_v11 = vld [vmem:[%s8626_s0 + $0x60] sm:$0xff] }
 0x45e   :  { %3807 = vst.msk [vmem:[#allocation7 + $0x70] sm:$0xff] %vm31_vm1, %v3791_v22  ;;  %v3855_v28 = vmul.f32 %v3839_v6, %v9271_v18  ;;  %6062 = vpow2.f32 %v3129_v57  ;;  %v3841_v9 = vld [vmem:[%s8627_s1 + $0x68] sm:$0xff]  ;;  %v3919_v61 = vmul.f32 %v6131_v30, %v9271_v18  ;;  %v3843_v40 = vld [vmem:[%s8627_s1 + $0x78] sm:$0xff]  ;;  %v3920_v48 = vmul.f32 %v6132_v11, %v9272_v43 }
 0x45f   :  { %3806 = vst.msk [vmem:[#allocation7 + $0x68] sm:$0xff] %vm31_vm1, %v3790_v20  ;;  %v3945_v22 = vsel %vm160_vm0, %v3915_v2, 0.0  ;;  %v6128_v20 = vld [vmem:[%s8626_s0 + $0x40] sm:$0xff] }
 0x460   :  { %v3770_v55 = vpop.xlane.xlu0 %3769  ;;  %v3893_v47 = vsel %vm160_vm0, %v3855_v28, 0.0  ;;  %v6134_v28 = vld [vmem:[%s8626_s0 + $0x68] sm:$0xff] }
 0x461   :  { %v3789_v59 = vadd.f32 %v3770_v55, %v3613_v27  ;;  %v3916_v27 = vmul.f32 %v6128_v20, %v9266_v19  ;;  %v3840_v55 = vld [vmem:[%s8627_s1 + $0x60] sm:$0xff]  ;;  %v6130_v19 = vld [vmem:[%s8626_s0 + $0x50] sm:$0xff] }
 0x462   :  { %v3856_v36 = vmul.f32 %v3840_v55, %v9272_v43  ;;  %v3918_v42 = vmul.f32 %v6130_v19, %v9270_v25 }
 0x463   :  { %3805 = vst.msk [vmem:[#allocation7 + $0x60] sm:$0xff] %vm31_vm1, %v3789_v59  ;;  %v3948_v59 = vsel %vm160_vm0, %v3916_v27, 0.0 }
 0x464   :  { %v3896_v49 = vsel %vm160_vm0, %v3856_v36, 0.0  ;;  %v3954_v26 = vsel %vm160_vm0, %v3918_v42, 0.0 }
 0x466   :  { %v6061_v3 = vpop.eup %6060 }
 0x467   :  { %v3148_v35 = vmul.f32 %v6061_v3, %v3084_v34 }
 0x468   :  { %v6063_v29 = vpop.eup %6062 }
 0x469   :  { %3879 = vadd.xlane.f32.xlu0 %v3878_v10  ;;  %v3917_v10 = vmul.f32 %v6129_v16, %v9268_v53 }
 0x46b   :  { %v3951_v17 = vsel %vm160_vm0, %v3917_v10, 0.0 }
 0x46d   :  { %3882 = vadd.xlane.f32.xlu0 %v3881_v32  ;;  %3937 = vadd.xlane.f32.xlu1 %v3936_v31  ;;  %v9273_v32 = vld [vmem:[#allocation90_spill] sm:$0xff] }
 0x46e   :  { %v3857_v31 = vmul.f32 %v3841_v9, %v9273_v32  ;;  %v3921_v20 = vmul.f32 %v6134_v28, %v9273_v32 }
 0x470   :  { %v3899_v4 = vsel %vm160_vm0, %v3857_v31, 0.0  ;;  %v3963_v55 = vsel %vm160_vm0, %v3921_v20, 0.0 }
 0x471   :  { %3885 = vadd.xlane.f32.xlu0 %v3884_v62  ;;  %3940 = vadd.xlane.f32.xlu1 %v3939_v33  ;;  %v3083_v62 = vld [vmem:[#allocation5 + $0x70] sm:$0xff]  ;;  %v9274_v33 = vld [vmem:[#allocation91_spill] sm:$0xff] }
 0x472   :  { %v3858_v53 = vmul.f32 %v3842_v13, %v9274_v33  ;;  %v3147_v38 = vmul.f32 %v6063_v29, %v3083_v62 }
 0x474   :  { %v3902_v60 = vsel %vm160_vm0, %v3858_v53, 0.0 }
 0x475   :  { %3888 = vadd.xlane.f32.xlu0 %v3887_v58  ;;  %3943 = vadd.xlane.f32.xlu1 %v3942_v63  ;;  %v3957_v58 = vsel %vm160_vm0, %v3919_v61, 0.0  ;;  %v9275_v63 = vld [vmem:[#allocation95_spill] sm:$0xff] }
 0x476   :  { %v3859_v25 = vmul.f32 %v3843_v40, %v9275_v63 }
 0x478   :  { %v3905_v57 = vsel %vm160_vm0, %v3859_v25, 0.0 }
 0x479   :  { %3891 = vadd.xlane.f32.xlu0 %v3890_v12  ;;  %3946 = vadd.xlane.f32.xlu1 %v3945_v22  ;;  %v3960_v12 = vsel %vm160_vm0, %v3920_v48, 0.0  ;;  %v6133_v22 = vld [vmem:[%s8626_s0 + $0x78] sm:$0xff] }
 0x47a   :  { %v3923_v18 = vmul.f32 %v6133_v22, %v9275_v63 }
 0x47c   :  { %v3969_v27 = vsel %vm160_vm0, %v3923_v18, 0.0 }
 0x47d   :  { %3894 = vadd.xlane.f32.xlu0 %v3893_v47  ;;  %3949 = vadd.xlane.f32.xlu1 %v3948_v59  ;;  %v6135_v47 = vld [vmem:[%s8626_s0 + $0x70] sm:$0xff] }
 0x47e   :  { %v3922_v59 = vmul.f32 %v6135_v47, %v9274_v33  ;;  %v4056_v47 = vld [vmem:[#allocation7 + $0x20] sm:$0xff] }
 0x480   :  { %v3966_v43 = vsel %vm160_vm0, %v3922_v59, 0.0  ;;  %v3976_v59 = vld [vmem:[#allocation5 + $0x20] sm:$0xff] }
 0x481   :  { %3897 = vadd.xlane.f32.xlu0 %v3896_v49  ;;  %3952 = vadd.xlane.f32.xlu1 %v3951_v17 }
 0x483   :  { %v3180_v51 = vpop.xlane.xlu0 %3179 }
 0x484   :  { %v3196_v1 = vadd.f32 %v3180_v51, %v3148_v35 }
 0x485   :  { %3900 = vadd.xlane.f32.xlu0 %v3899_v4  ;;  %3955 = vadd.xlane.f32.xlu1 %v3954_v26 }
 0x486   :  { %3213 = vst.msk [vmem:[#allocation5 + $0x78] sm:$0xff] %vm31_vm1, %v3196_v1 }
 0x487   :  { %v3178_v2 = vpop.xlane.xlu0 %3177 }
 0x488   :  { %v3195_v6 = vadd.f32 %v3178_v2, %v3147_v38 }
 0x489   :  { %3903 = vadd.xlane.f32.xlu0 %v3902_v60  ;;  %3958 = vadd.xlane.f32.xlu1 %v3957_v58 }
 0x48a   :  { %3212 = vst.msk [vmem:[#allocation5 + $0x70] sm:$0xff] %vm31_vm1, %v3195_v6 }
 0x48d   :  { %3906 = vadd.xlane.f32.xlu0 %v3905_v57  ;;  %3961 = vadd.xlane.f32.xlu1 %v3960_v12 }
 0x491   :  { %3970 = vadd.xlane.f32.xlu0 %v3969_v27  ;;  %3964 = vadd.xlane.f32.xlu1 %v3963_v55  ;;  %v9277_v55 = vld [vmem:[#allocation74_spill] sm:$0xff] }
 0x495   :  { %3967 = vadd.xlane.f32.xlu1 %v3966_v43 }
 0x4ac   :  { %v3327_v36 = vpop.permute.xlu1 %3326 }
 0x4ad   :  { %v3322_v16 = vpop.permute.xlu0 %3321  ;;  %v3400_v10 = vmul.f32 %v8128_v8, %v3327_v36 }
 0x4ae   :  { %v3399_v9 = vmul.f32 %v8188_v21, %v3322_v16  ;;  %v4057_v16 = vld [vmem:[#allocation7 + $0x28] sm:$0xff] }
 0x4b0   :  { %v3337_v3 = vpop.permute.xlu1 %3336  ;;  %v3436_v17 = vadd.f32 %v3400_v10, %v3399_v9  ;;  %v3977_v10 = vld [vmem:[#allocation5 + $0x28] sm:$0xff] }
 0x4b1   :  { %v3332_v49 = vpop.permute.xlu0 %3331  ;;  %v3402_v32 = vmul.f32 %v8138_v15, %v3337_v3 }
 0x4b2   :  { %v3401_v34 = vmul.f32 %v8158_v46, %v3332_v49 }
 0x4b4   :  { %v3437_v31 = vadd.f32 %v3436_v17, %v3401_v34  ;;  %v3347_v19 = vpop.permute.xlu1 %3346 }
 0x4b5   :  { %v3342_v42 = vpop.permute.xlu0 %3341  ;;  %v3404_v29 = vmul.f32 %v8172_v14, %v3347_v19  ;;  %v3978_v19 = vld [vmem:[#allocation5 + $0x30] sm:$0xff] }
 0x4b6   :  { %v3438_v13 = vadd.f32 %v3437_v31, %v3402_v32  ;;  %v3403_v35 = vmul.f32 %v8180_v41, %v3342_v42  ;;  %v3979_v32 = vld [vmem:[#allocation5 + $0x38] sm:$0xff] }
 0x4b8   :  { %v3439_v4 = vadd.f32 %v3438_v13, %v3403_v35  ;;  %v3357_v26 = vpop.permute.xlu1 %3356  ;;  %v3461_v13 = vld [vmem:[#allocation3] sm:$0x1] }
 0x4b9   :  { %v3352_v8 = vpop.permute.xlu0 %3351  ;;  %v3406_v33 = vmul.f32 %v8186_v56, %v3357_v26  ;;  %v4104_v26 = vld [vmem:[#allocation6 + $0x20] sm:$0xff] }
 0x4ba   :  { %v3440_v62 = vadd.f32 %v3439_v4, %v3404_v29  ;;  %v3405_v21 = vmul.f32 %v8194_v39, %v3352_v8  ;;  %v3981_v29 = vld [vmem:[#allocation5 + $0x48] sm:$0xff]  ;;  %v4058_v8 = vld [vmem:[#allocation7 + $0x30] sm:$0xff] }
 0x4bc   :  { %v3441_v53 = vadd.f32 %v3440_v62, %v3405_v21  ;;  %v3367_v46 = vpop.permute.xlu1 %3366 }
 0x4bd   :  { %v3362_v30 = vpop.permute.xlu0 %3361  ;;  %v3408_v51 = vmul.f32 %v8201_v45, %v3367_v46  ;;  %v4024_v46 = vld [vmem:[#allocation4 + $0x20] sm:$0xff] }
 0x4be   :  { %v3442_v15 = vadd.f32 %v3441_v53, %v3406_v33  ;;  %v3407_v61 = vmul.f32 %v8206_v7, %v3362_v30  ;;  %v3980_v33 = vld [vmem:[#allocation5 + $0x40] sm:$0xff]  ;;  %v4059_v30 = vld [vmem:[#allocation7 + $0x38] sm:$0xff] }
 0x4c0   :  { %v3443_v40 = vadd.f32 %v3442_v15, %v3407_v61  ;;  %v3377_v41 = vpop.permute.xlu1 %3376  ;;  %v4152_v61 = vmul.f32 2.0, %v8301_v37 }
 0x4c1   :  { %v3372_v1 = vpop.permute.xlu0 %3371  ;;  %v3410_v60 = vmul.f32 %v8211_v0, %v3377_v41 }
 0x4c2   :  { %v3444_v14 = vadd.f32 %v3443_v40, %v3408_v51  ;;  %v3409_v38 = vmul.f32 %v8215_v50, %v3372_v1 }
 0x4c4   :  { %v3445_v58 = vadd.f32 %v3444_v14, %v3409_v38  ;;  %v3387_v39 = vpop.permute.xlu1 %3386  ;;  %v4105_v38 = vld [vmem:[#allocation6 + $0x28] sm:$0xff] }
 0x4c5   :  { %v3382_v63 = vpop.permute.xlu0 %3381  ;;  %v3412_v11 = vmul.f32 %v8219_v5, %v3387_v39 }
 0x4c6   :  { %v3446_v56 = vadd.f32 %v3445_v58, %v3410_v60  ;;  %v3411_v25 = vmul.f32 %v8225_v44, %v3382_v63  ;;  %v9276_v44 = vld [vmem:[#allocation77_spill] sm:$0xff]  ;;  %v4060_v60 = vld [vmem:[#allocation7 + $0x40] sm:$0xff] }
 0x4c7   :  { %v3463_v5 = vsub.f32 %v9277_v55, %v9276_v44 }
 0x4c8   :  { %v3447_v48 = vadd.f32 %v3446_v56, %v3411_v25  ;;  %v3397_v7 = vpop.permute.xlu1 %3396  ;;  %v4025_v56 = vld [vmem:[#allocation4 + $0x28] sm:$0xff] }
 0x4c9   :  { %v3392_v2 = vpop.permute.xlu0 %3391  ;;  %v3414_v57 = vmul.f32 %v8233_v54, %v3397_v7  ;;  %v3464_v36 = vmul.f32 1.442695, %v3463_v5  ;;  %v4061_v25 = vld [vmem:[#allocation7 + $0x48] sm:$0xff] }
 0x4ca   :  { %v3448_v45 = vadd.f32 %v3447_v48, %v3412_v11  ;;  %v3413_v6 = vmul.f32 %v8238_v23, %v3392_v2  ;;  %v9278_v11 = vld [vmem:[#allocation54_spill] sm:$0xff] }
 0x4cb   :  { %v4153_v48 = vmul.f32 2.0, %v9278_v11  ;;  %v3982_v2 = vld [vmem:[#allocation5 + $0x50] sm:$0xff] }
 0x4cc   :  { %v3449_v12 = vadd.f32 %v3448_v45, %v3413_v6 }
 0x4ce   :  { %v3450_v50 = vadd.f32 %v3449_v12, %v3414_v57  ;;  %v4062_v57 = vld [vmem:[#allocation7 + $0x50] sm:$0xff] }
 0x4d0   :  { %v3451_v22 = vrot.slane %v3450_v50, 4 }
 0x4d2   :  { %v3452_v0 = vadd.f32 %v3451_v22, %v3450_v50 }
 0x4d4   :  { %v3453_v18 = vrot.slane %v3452_v0, 2 }
 0x4d6   :  { %v3454_v28 = vadd.f32 %v3453_v18, %v3452_v0  ;;  %v3983_v0 = vld [vmem:[#allocation5 + $0x58] sm:$0xff] }
 0x4d8   :  { %v3455_v20 = vrot.slane %v3454_v28, 1 }
 0x4da   :  { %v3456_v27 = vadd.f32 %v3455_v20, %v3454_v28  ;;  %v4063_v20 = vld [vmem:[#allocation7 + $0x58] sm:$0xff] }
 0x4dc   :  { %6064 = vlog2.f32 %v3456_v27 }
 0x4dd   :  { %6066 = vlog2.f32 %v4056_v47 }
 0x4de   :  { %6068 = vlog2.f32 %v3976_v59  ;;  %v4064_v59 = vld [vmem:[#allocation7 + $0x60] sm:$0xff] }
 0x4df   :  { %6070 = vlog2.f32 %v4057_v16 }
 0x4e0   :  { %6072 = vpow2.f32 %v3464_v36 }
 0x4e1   :  { %6074 = vlog2.f32 %v3977_v10 }
 0x4e6   :  { %v6065_v43 = vpop.eup %6064 }
 0x4e7   :  { %v3458_v23 = vmul.f32 0.6931472, %v6065_v43  ;;  %v6067_v49 = vpop.eup %6066 }
 0x4e8   :  { %v6069_v17 = vpop.eup %6068  ;;  %v4077_v34 = vmul.f32 0.6931472, %v6067_v49 }
 0x4e9   :  { %v3459_v54 = vadd.f32 %v3458_v23, %v8290_v24  ;;  %v6071_v31 = vpop.eup %6070  ;;  %v3997_v35 = vmul.f32 0.6931472, %v6069_v17 }
 0x4ea   :  { %v6073_v42 = vpop.eup %6072  ;;  %v4120_v62 = vadd.f32 %v4104_v26, %v4077_v34  ;;  %v4079_v21 = vmul.f32 0.6931472, %v6071_v31  ;;  %v4065_v34 = vld [vmem:[#allocation7 + $0x68] sm:$0xff]  ;;  %v4027_v26 = vld [vmem:[#allocation4 + $0x38] sm:$0xff] }
 0x4eb   :  { %v3467_v9 = vsub.f32 %v3459_v54, %v9276_v44  ;;  %v6075_v4 = vpop.eup %6074  ;;  %v3466_v53 = vmul.f32 %v6073_v42, %v3461_v13  ;;  %v4040_v51 = vadd.f32 %v4024_v46, %v3997_v35  ;;  %v3985_v35 = vld [vmem:[#allocation5 + $0x68] sm:$0xff] }
 0x4ec   :  { %v3999_v40 = vmul.f32 0.6931472, %v6075_v4  ;;  %v4121_v63 = vadd.f32 %v4105_v38, %v4079_v21  ;;  %v4106_v4 = vld [vmem:[#allocation6 + $0x30] sm:$0xff]  ;;  %v4107_v38 = vld [vmem:[#allocation6 + $0x38] sm:$0xff] }
 0x4ed   :  { %v3468_v3 = vmul.f32 1.442695, %v3467_v9  ;;  %v4136_v58 = vadd.f32 %v4120_v62, %v4040_v51  ;;  %v4026_v21 = vld [vmem:[#allocation4 + $0x30] sm:$0xff]  ;;  %v3987_v51 = vld [vmem:[#allocation5 + $0x78] sm:$0xff] }
 0x4ee   :  { %v4041_v7 = vadd.f32 %v4025_v56, %v3999_v40 }
 0x4ef   :  { %6076 = vpow2.f32 %v3468_v3 }
 0x4f0   :  { %6078 = vlog2.f32 %v3979_v32  ;;  %v4137_v50 = vadd.f32 %v4121_v63, %v4041_v7 }
 0x4f1   :  { %6080 = vlog2.f32 %v3978_v19 }
 0x4f2   :  { %6082 = vlog2.f32 %v3981_v29 }
 0x4f3   :  { %6084 = vlog2.f32 %v4058_v8  ;;  %v4067_v8 = vld [vmem:[#allocation7 + $0x78] sm:$0xff] }
 0x4f4   :  { %6086 = vlog2.f32 %v3980_v33 }
 0x4f5   :  { %6088 = vlog2.f32 %v4059_v30 }
 0x4f6   :  { %v8574_v24 = vpop.xlane.xlu0 %3879  ;;  %6090 = vlog2.f32 %v4060_v60  ;;  %v4028_v60 = vld [vmem:[#allocation4 + $0x40] sm:$0xff] }
 0x4f7   :  { %6092 = vlog2.f32 %v4061_v25 }
 0x4f8   :  { %6094 = vlog2.f32 %v3982_v2 }
 0x4f9   :  { %v6077_v15 = vpop.eup %6076  ;;  %6096 = vlog2.f32 %v4062_v57 }
 0x4fa   :  { %v3470_v41 = vadd.f32 %v6077_v15, %v3466_v53  ;;  %v8577_v1 = vpop.xlane.xlu0 %3882  ;;  %v3938_v14 = vpop.xlane.xlu1 %3937  ;;  %6098 = vlog2.f32 %v3983_v0 }
 0x4fb   :  { %v4168_v39 = vadd.f32 %v4152_v61, %v3938_v14  ;;  %v6079_v18 = vpop.eup %6078  ;;  %6100 = vlog2.f32 %v4063_v20  ;;  %v4029_v61 = vld [vmem:[#allocation4 + $0x48] sm:$0xff]  ;;  %v4155_v7 = vmul.f32 2.0, %v8577_v1 }
 0x4fc   :  { %3471 = vst [vmem:[#allocation3] sm:$0x1] %v3470_v41  ;;  %v6081_v27 = vpop.eup %6080  ;;  %v4003_v49 = vmul.f32 0.6931472, %v6079_v18  ;;  %v4154_v41 = vmul.f32 2.0, %v8574_v24 }
 0x4fd   :  { %v4184_v37 = vsub.f32 %v4136_v58, %v4168_v39  ;;  %v6083_v55 = vpop.eup %6082  ;;  %v4001_v31 = vmul.f32 0.6931472, %v6081_v27  ;;  %v3986_v39 = vld [vmem:[#allocation5 + $0x70] sm:$0xff] }
 0x4fe   :  { %v8580_v45 = vpop.xlane.xlu0 %3885  ;;  %v3941_v6 = vpop.xlane.xlu1 %3940  ;;  %v4007_v19 = vmul.f32 0.6931472, %v6083_v55  ;;  %v4043_v53 = vadd.f32 %v4027_v26, %v4003_v49  ;;  %v4111_v26 = vld [vmem:[#allocation6 + $0x58] sm:$0xff] }
 0x4ff   :  { %v4204_v12 = vsel %vm31_vm1, %v4184_v37, 0.0  ;;  %v4169_v22 = vadd.f32 %v4153_v48, %v3941_v6  ;;  %v6085_v43 = vpop.eup %6084  ;;  %v4042_v14 = vadd.f32 %v4026_v21, %v4001_v31  ;;  %v4066_v48 = vld [vmem:[#allocation7 + $0x70] sm:$0xff]  ;;  %v4108_v6 = vld [vmem:[#allocation6 + $0x40] sm:$0xff]  ;;  %v4156_v20 = vmul.f32 2.0, %v8580_v45 }
 0x500   :  { %v4205_v28 = vadd.f32 %v4204_v12, %v8431_v52  ;;  %v6087_v16 = vpop.eup %6086  ;;  %v3984_v52 = vld [vmem:[#allocation5 + $0x60] sm:$0xff]  ;;  %v4081_v9 = vmul.f32 0.6931472, %v6085_v43  ;;  %v4045_v58 = vadd.f32 %v4029_v61, %v4007_v19 }
 0x501   :  { %v4185_v44 = vsub.f32 %v4137_v50, %v4169_v22  ;;  %v6089_v10 = vpop.eup %6088  ;;  %v4005_v13 = vmul.f32 0.6931472, %v6087_v16 }
 0x502   :  { %v8584_v5 = vpop.xlane.xlu0 %3888  ;;  %v3944_v47 = vpop.xlane.xlu1 %3943  ;;  %v4083_v42 = vmul.f32 0.6931472, %v6089_v10  ;;  %v4122_v33 = vadd.f32 %v4106_v4, %v4081_v9  ;;  %v4110_v10 = vld [vmem:[#allocation6 + $0x50] sm:$0xff] }
 0x503   :  { %v4206_v36 = vsel %vm31_vm1, %v4185_v44, 0.0  ;;  %v4243_v23 = vld [vmem:[#allocation3] sm:$0x1]  ;;  %v6091_v32 = vpop.eup %6090  ;;  %v4044_v25 = vadd.f32 %v4028_v60, %v4005_v13  ;;  %v4170_v2 = vadd.f32 %v4154_v41, %v3944_v47  ;;  %v4109_v44 = vld [vmem:[#allocation6 + $0x48] sm:$0xff] }
 0x504   :  { %v8587_v54 = vadd.f32 %v4206_v36, %v4205_v28  ;;  %6102 = vlog2.f32 %v4243_v23  ;;  %v6093_v29 = vpop.eup %6092  ;;  %v4085_v15 = vmul.f32 0.6931472, %v6091_v32  ;;  %v4123_v56 = vadd.f32 %v4107_v38, %v4083_v42 }
 0x505   :  { %6104 = vlog2.f32 %v4064_v59  ;;  %v6095_v62 = vpop.eup %6094  ;;  %v4087_v11 = vmul.f32 0.6931472, %v6093_v29  ;;  %v4138_v12 = vadd.f32 %v4122_v33, %v4042_v14  ;;  %v4242_v59 = vld [vmem:[#allocation2] sm:$0x1]  ;;  %v4157_v23 = vmul.f32 2.0, %v8584_v5  ;;  %v4030_v29 = vld [vmem:[#allocation4 + $0x50] sm:$0xff] }
 0x506   :  { %v8589_v3 = vpop.xlane.xlu0 %3891  ;;  %v3947_v17 = vpop.xlane.xlu1 %3946  ;;  %6106 = vlog2.f32 %v3984_v52  ;;  %v4009_v57 = vmul.f32 0.6931472, %v6095_v62  ;;  %v4124_v50 = vadd.f32 %v4108_v6, %v4085_v15  ;;  %v4139_v1 = vadd.f32 %v4123_v56, %v4043_v53 }
 0x507   :  { %6108 = vlog2.f32 %v4065_v34  ;;  %v6097_v40 = vpop.eup %6096  ;;  %v4171_v27 = vadd.f32 %v4155_v7, %v3947_v17  ;;  %v4125_v47 = vadd.f32 %v4109_v44, %v4087_v11  ;;  %v4186_v16 = vsub.f32 %v4138_v12, %v4170_v2 }
 0x508   :  { %6110 = vlog2.f32 %v3985_v35  ;;  %v6099_v63 = vpop.eup %6098  ;;  %v4089_v18 = vmul.f32 0.6931472, %v6097_v40  ;;  %v4140_v49 = vadd.f32 %v4124_v50, %v4044_v25  ;;  %v4158_v42 = vmul.f32 2.0, %v8589_v3  ;;  %v4112_v3 = vld [vmem:[#allocation6 + $0x60] sm:$0xff] }
 0x509   :  { %6112 = vlog2.f32 %v4067_v8  ;;  %v6101_v37 = vpop.eup %6100  ;;  %v4011_v17 = vmul.f32 0.6931472, %v6099_v63  ;;  %v4187_v13 = vsub.f32 %v4139_v1, %v4171_v27  ;;  %v4141_v5 = vadd.f32 %v4125_v47, %v4045_v58 }
 0x50a   :  { %v8591_v46 = vpop.xlane.xlu0 %3894  ;;  %v3950_v30 = vpop.xlane.xlu1 %3949  ;;  %6114 = vlog2.f32 %v3987_v51  ;;  %v4091_v43 = vmul.f32 0.6931472, %v6101_v37  ;;  %v4126_v45 = vadd.f32 %v4110_v10, %v4089_v18  ;;  %v4046_v8 = vadd.f32 %v4030_v29, %v4009_v57  ;;  %v4031_v51 = vld [vmem:[#allocation4 + $0x58] sm:$0xff] }
 0x50b   :  { %6116 = vlog2.f32 %v3986_v39  ;;  %v4172_v52 = vadd.f32 %v4156_v20, %v3950_v30  ;;  %v4208_v53 = vsel %vm31_vm1, %v4186_v16, 0.0  ;;  %v4159_v30 = vmul.f32 2.0, %v8591_v46  ;;  %v4115_v29 = vld [vmem:[#allocation6 + $0x78] sm:$0xff] }
 0x50c   :  { %6118 = vlog2.f32 %v4066_v48  ;;  %v4127_v62 = vadd.f32 %v4111_v26, %v4091_v43  ;;  %v4047_v14 = vadd.f32 %v4031_v51, %v4011_v17  ;;  %v4210_v63 = vsel %vm31_vm1, %v4187_v13, 0.0  ;;  %v4032_v48 = vld [vmem:[#allocation4 + $0x60] sm:$0xff]  ;;  %v4114_v26 = vld [vmem:[#allocation6 + $0x70] sm:$0xff] }
 0x50d   :  { %v4188_v15 = vsub.f32 %v4140_v49, %v4172_v52  ;;  %v4142_v25 = vadd.f32 %v4126_v45, %v4046_v8  ;;  %v4209_v46 = vadd.f32 %v4208_v53, %v8587_v54  ;;  %v4035_v45 = vld [vmem:[#allocation4 + $0x78] sm:$0xff] }
 0x50e   :  { %v6103_v24 = vpop.eup %6102  ;;  %v8595_v22 = vpop.xlane.xlu0 %3897  ;;  %v4143_v50 = vadd.f32 %v4127_v62, %v4047_v14 }
 0x50f   :  { %v3953_v0 = vpop.xlane.xlu1 %3952  ;;  %v6105_v28 = vpop.eup %6104  ;;  %v4245_v55 = vmul.f32 0.6931472, %v6103_v24  ;;  %v4212_v57 = vsel %vm31_vm1, %v4188_v15, 0.0  ;;  %v4160_v24 = vmul.f32 2.0, %v8595_v22  ;;  %v4211_v18 = vadd.f32 %v4210_v63, %v4209_v46 }
 0x510   :  { %v6107_v36 = vpop.eup %6106  ;;  %v4093_v31 = vmul.f32 0.6931472, %v6105_v28  ;;  %v4173_v35 = vadd.f32 %v4157_v23, %v3953_v0  ;;  %v4113_v0 = vld [vmem:[#allocation6 + $0x68] sm:$0xff] }
 0x511   :  { %v4246_v9 = vadd.f32 %v4245_v55, %v4242_v59  ;;  %v6109_v19 = vpop.eup %6108  ;;  %v4013_v21 = vmul.f32 0.6931472, %v6107_v36  ;;  %v4033_v59 = vld [vmem:[#allocation4 + $0x68] sm:$0xff]  ;;  %v4213_v36 = vadd.f32 %v4212_v57, %v4211_v18 }
 0x512   :  { %v3901_v34 = vpop.xlane.xlu0 %3900  ;;  %v6111_v33 = vpop.eup %6110  ;;  %v4128_v60 = vadd.f32 %v4112_v3, %v4093_v31  ;;  %v4095_v39 = vmul.f32 0.6931472, %v6109_v19  ;;  %v4189_v56 = vsub.f32 %v4141_v5, %v4173_v35 }
 0x513   :  { %v3956_v32 = vpop.xlane.xlu1 %3955  ;;  %v4249_v4 = vsel %vm4248_vm2, %v4246_v9, 0.0  ;;  %v6113_v40 = vpop.eup %6112  ;;  %v4048_v7 = vadd.f32 %v4032_v48, %v4013_v21  ;;  %v4015_v2 = vmul.f32 0.6931472, %v6111_v33  ;;  %v4161_v22 = vmul.f32 2.0, %v3901_v34 }
 0x514   :  { %4250 = vadd.xlane.f32.xlu0 %v4249_v4  ;;  %v4174_v61 = vadd.f32 %v4158_v42, %v3956_v32  ;;  %v6115_v58 = vpop.eup %6114  ;;  %v4129_v55 = vadd.f32 %v4113_v0, %v4095_v39  ;;  %v4214_v1 = vsel %vm31_vm1, %v4189_v56, 0.0  ;;  %v4099_v23 = vmul.f32 0.6931472, %v6113_v40  ;;  %v4034_v42 = vld [vmem:[#allocation4 + $0x70] sm:$0xff] }
 0x515   :  { %v6117_v37 = vpop.eup %6116  ;;  %v4144_v27 = vadd.f32 %v4128_v60, %v4048_v7  ;;  %v4019_v44 = vmul.f32 0.6931472, %v6115_v58  ;;  %v4049_v16 = vadd.f32 %v4033_v59, %v4015_v2  ;;  %v4215_v32 = vadd.f32 %v4214_v1, %v4213_v36 }
 0x516   :  { %v3904_v41 = vpop.xlane.xlu0 %3903  ;;  %v6119_v6 = vpop.eup %6118  ;;  %v4190_v12 = vsub.f32 %v4142_v25, %v4174_v61  ;;  %v4017_v43 = vmul.f32 0.6931472, %v6117_v37  ;;  %v4131_v62 = vadd.f32 %v4115_v29, %v4099_v23 }
 0x517   :  { %v3959_v38 = vpop.xlane.xlu1 %3958  ;;  %v4097_v52 = vmul.f32 0.6931472, %v6119_v6  ;;  %v4145_v19 = vadd.f32 %v4129_v55, %v4049_v16  ;;  %v4051_v35 = vadd.f32 %v4035_v45, %v4019_v44  ;;  %v4162_v21 = vmul.f32 2.0, %v3904_v41 }
 0x518   :  { %v4175_v11 = vadd.f32 %v4159_v30, %v3959_v38  ;;  %v4216_v10 = vsel %vm31_vm1, %v4190_v12, 0.0  ;;  %v4050_v5 = vadd.f32 %v4034_v42, %v4017_v43 }
 0x519   :  { %v4217_v8 = vadd.f32 %v4216_v10, %v4215_v32  ;;  %v4130_v34 = vadd.f32 %v4114_v26, %v4097_v52  ;;  %v4147_v51 = vadd.f32 %v4131_v62, %v4051_v35 }
 0x51a   :  { %v3907_v28 = vpop.xlane.xlu0 %3906  ;;  %v4191_v47 = vsub.f32 %v4143_v50, %v4175_v11 }
 0x51b   :  { %v3962_v20 = vpop.xlane.xlu1 %3961  ;;  %v4163_v9 = vmul.f32 2.0, %v3907_v28  ;;  %v4146_v40 = vadd.f32 %v4130_v34, %v4050_v5 }
 0x51c   :  { %v4176_v54 = vadd.f32 %v4160_v24, %v3962_v20  ;;  %v4218_v13 = vsel %vm31_vm1, %v4191_v47, 0.0 }
 0x51d   :  { %v4219_v15 = vadd.f32 %v4218_v13, %v4217_v8 }
 0x51e   :  { %v4192_v49 = vsub.f32 %v4144_v27, %v4176_v54  ;;  %v3971_v17 = vpop.xlane.xlu0 %3970 }
 0x51f   :  { %v3965_v31 = vpop.xlane.xlu1 %3964  ;;  %v4179_v53 = vadd.f32 %v4163_v9, %v3971_v17 }
 0x520   :  { %v4177_v4 = vadd.f32 %v4161_v22, %v3965_v31  ;;  %v4220_v33 = vsel %vm31_vm1, %v4192_v49, 0.0 }
 0x521   :  { %v4221_v38 = vadd.f32 %v4220_v33, %v4219_v15  ;;  %v4195_v60 = vsub.f32 %v4147_v51, %v4179_v53 }
 0x522   :  { %v4193_v30 = vsub.f32 %v4145_v19, %v4177_v4 }
 0x523   :  { %v3968_v61 = vpop.xlane.xlu1 %3967  ;;  %v4226_v41 = vsel %vm31_vm1, %v4195_v60, 0.0 }
 0x524   :  { %v4222_v3 = vsel %vm31_vm1, %v4193_v30, 0.0  ;;  %v4178_v14 = vadd.f32 %v4162_v21, %v3968_v61 }
 0x525   :  { %v4223_v58 = vadd.f32 %v4222_v3, %v4221_v38 }
 0x526   :  { %v4194_v39 = vsub.f32 %v4146_v40, %v4178_v14 }
 0x528   :  { %v4224_v63 = vsel %vm31_vm1, %v4194_v39, 0.0 }
 0x529   :  { %v4225_v56 = vadd.f32 %v4224_v63, %v4223_v58 }
 0x52b   :  { %v4227_v25 = vadd.f32 %v4226_v41, %v4225_v56 }
 0x52d   :  { %4228 = vadd.xlane.f32.xlu1 %v4227_v25 }
 0x5a1   :  { %v4251_v11 = vpop.xlane.xlu0 %4250 }
 0x5a2   :  { %v4252_v48 = vrot.slane %v4251_v11, 4 }
 0x5a4   :  { %v4253_v37 = vadd.f32 %v4252_v48, %v4251_v11 }
 0x5a6   :  { %v4254_v46 = vrot.slane %v4253_v37, 2 }
 0x5a8   :  { %v4255_v57 = vadd.f32 %v4254_v46, %v4253_v37 }
 0x5aa   :  { %v4256_v50 = vrot.slane %v4255_v57, 1 }
 0x5ac   :  { %v4257_v28 = vadd.f32 %v4256_v50, %v4255_v57 }
 0x5ba   :  { %v4229_v7 = vpop.xlane.xlu1 %4228 }
 0x5bb   :  { %v4230_v2 = vrot.slane %v4229_v7, 4 }
 0x5bd   :  { %v4231_v6 = vadd.f32 %v4230_v2, %v4229_v7 }
 0x5bf   :  { %v4232_v24 = vrot.slane %v4231_v6, 2 }
 0x5c1   :  { %v4233_v12 = vadd.f32 %v4232_v24, %v4231_v6 }
 0x5c3   :  { %v4234_v0 = vrot.slane %v4233_v12, 1 }
 0x5c5   :  { %v4235_v18 = vadd.f32 %v4234_v0, %v4233_v12 }
 0x5c7   :  { %5878 = vpush %v4235_v18 }
 0x5c8   :  { %5880 = vpush %v4257_v28 }
 0x5f8   :  { %s5879_s0 = spop %5878 }
 0x5f9   :  { %s5881_s11 = spop %5880 }
 0x5fa   :  { %s4259_s12 = sadd.f32 %s5881_s11, %s5879_s0 }
 0x5fc   :  { %s4260_s13 = smul.f32 0.0078125, %s4259_s12 }
 0x5fe   :  { %4262 = sst [smem:[#allocation9]] %s4260_s13 }
 0x5ff   :  { %6145 = shalt.err (!%p6142_p2)
}
 0x600   :  { %s6151_s21 = smov [#allocation9]  }
 0x601   :  { %4270 = dma.smem_to_hbm %s6151_s21, 16, %s8630_s4, [#allocation10]  }
 0x602   :  { %6146 = dma.done.wait [#allocation10], 16  }
 0x603   :  { %6147 = vsyncadd [#allocation10], 4294967280 }
 0x604   :  { %4274 = sfence }
 0x605   :  { %4275 = vsyncpa [#allocation10], 1 }

</bundles_post_ra>
